<compile_context>
chip_gen: v5e
topology: v5e:2x2
jax: 0.10.0
libtpu: 0.0.40
codegen_flags: <defaults>
</compile_context>

<pallas_src>
import functools

import jax
import jax.numpy as jnp
from jax import lax
from jax.experimental import pallas as pl
from jax.experimental.pallas import tpu as pltpu

BN_EPS = 1e-5
LANE = 128
SUBLANE = 8

# Conv configs: (kernel_size, left_pad) for PyTorch padding='same', stride=1.
K1, PL1 = 8, 3
K2, PL2 = 5, 2
K3, PL3 = 3, 1


def _round_up(x, m):
    return (x + m - 1) // m * m


def _cdiv(a, b):
    return (a + b - 1) // b


# ----------------------------------------------------------------------------
# Kernel
# ----------------------------------------------------------------------------
def _fcn_kernel(xt_ref, mask_ref, w1_ref, b1_ref, w2_ref, b2_ref, w3_ref, b3_ref,
                fcw_ref, fcb_ref, out_ref, *, b_tile, l_pad, l_real, dot_dtype):
    r = b_tile * l_pad
    inv_l = 1.0 / float(l_real)
    rowmask = mask_ref[...]                                    # (R, 1) f32, const

    def bias_relu(y, b_ref):
        # elementwise path stays f32 (mandatory on v5e: no bf16 VPU).
        return jnp.maximum(y + b_ref[...], 0.0) * rowmask

    # ---- layer 1 (Cin=1): wrapper-built 8-tap im2col, one MXU dot -----------
    xt = xt_ref[...].astype(dot_dtype)                         # (R, 8)
    h = jnp.dot(xt, w1_ref[...], preferred_element_type=jnp.float32)
    h = bias_relu(h, b1_ref)                                   # (R, C1) f32

    # ---- layers 2 & 3: K accumulating dots over sublane-rolled activations --
    # (no (R, K*Cin) tapmat is materialized in VMEM; partial sums stay in f32)
    def conv_bn_relu(x, w_ref, b_ref, k, pad_left):
        acc = None
        for j in range(k):
            s = (pad_left - j) % r                             # static shift
            tap = x if s == 0 else pltpu.roll(x, shift=s, axis=0)
            y = jnp.dot(tap.astype(dot_dtype), w_ref[j],
                        preferred_element_type=jnp.float32)
            acc = y if acc is None else acc + y
        return bias_relu(acc, b_ref)

    h = conv_bn_relu(h, w2_ref, b2_ref, K2, PL2)               # (R, C2)
    h = conv_bn_relu(h, w3_ref, b3_ref, K3, PL3)               # (R, C3)

    # ---- global average pool (one sublane reduction) + linear head ----------
    pooled = jnp.sum(h.reshape(b_tile, l_pad, h.shape[1]), axis=1) * inv_l
    logits = jnp.dot(pooled.astype(dot_dtype), fcw_ref[...],
                     preferred_element_type=jnp.float32) + fcb_ref[...]
    out_ref[...] = logits.reshape(out_ref.shape)


# ----------------------------------------------------------------------------
# Parameter / input prep (plain JAX): BN folding, channel padding, conv1 im2col
# ----------------------------------------------------------------------------
def _fold_bn(w_kio, gamma, beta, mean, var):
    scale = (gamma * lax.rsqrt(var + BN_EPS)).reshape(-1)      # (Cout,)
    w = w_kio * scale[None, None, :]
    bias = beta.reshape(-1) - mean.reshape(-1) * scale
    return w, bias


def _pad_axis(a, axis, target):
    pad = [(0, 0)] * a.ndim
    pad[axis] = (0, target - a.shape[axis])
    return jnp.pad(a, pad)


def prepare_inputs(x_blc, p, *, b_tile, l_pad, dot_dtype):
    B, L, _ = x_blc.shape
    F = p["w1"].shape[2]
    nb_classes = p["fcw"].shape[1]

    c1 = _round_up(F, LANE)
    c2 = _round_up(2 * F, LANE)
    c3 = _round_up(F, LANE)
    nc = _round_up(nb_classes, LANE)

    w1, b1 = _fold_bn(p["w1"], p["g1"], p["b1"], p["m1"], p["v1"])
    w2, b2 = _fold_bn(p["w2"], p["g2"], p["b2"], p["m2"], p["v2"])
    w3, b3 = _fold_bn(p["w3"], p["g3"], p["b3"], p["m3"], p["v3"])

    w1_mat = _pad_axis(w1.reshape(K1, F), 1, c1)                  # (8, C1)
    w2_t = _pad_axis(_pad_axis(w2, 1, c1), 2, c2)                 # (K2, C1, C2)
    w3_t = _pad_axis(_pad_axis(w3, 1, c2), 2, c3)                 # (K3, C2, C3)
    fcw = _pad_axis(_pad_axis(p["fcw"], 0, c3), 1, nc)            # (C3, NC)

    # MXU operands in dot_dtype (bf16 by default); biases stay f32 (VPU side).
    # TODO(synk): on v7x the static BN-folded weights could go to fp8 with
    #             per-channel scales for another ~2x MXU rate.
    # TODO(synk): for small real F (<128) pack {tap, channel} jointly into one
    #             128-lane contraction instead of padding each tap to 128 lanes.
    w1_mat, w2_t, w3_t, fcw = (w.astype(dot_dtype) for w in (w1_mat, w2_t, w3_t, fcw))

    b1p = _pad_axis(b1.reshape(1, F), 1, c1).astype(jnp.float32)
    b2p = _pad_axis(b2.reshape(1, 2 * F), 1, c2).astype(jnp.float32)
    b3p = _pad_axis(b3.reshape(1, F), 1, c3).astype(jnp.float32)
    fcb = _pad_axis(p["fcb"].reshape(1, nb_classes), 1, nc).astype(jnp.float32)

    # conv1 im2col (Cin=1): taps[b, l, j] = x[b, l + j - 3] (zero outside [0,L))
    # TODO(synk): for long L move this in-kernel; the wrapper-side stack is 8x
    #             input HBM traffic (negligible at these sizes).
    x1d = x_blc[..., 0]                                           # (B, L)
    xp = jnp.pad(x1d, ((0, 0), (PL1, (l_pad - L) + (K1 - 1 - PL1))))
    x_taps = jnp.stack([xp[:, j:j + l_pad] for j in range(K1)], axis=-1)
    x_taps = x_taps.astype(jnp.float32).reshape(B * l_pad, K1)    # (B*l_pad, 8)

    # Per-row validity mask: keeps the [L, l_pad) margin rows zero after every
    # layer so the circular rolls never mix adjacent samples.
    rowmask = ((jnp.arange(b_tile * l_pad) % l_pad) < L)
    rowmask = rowmask.astype(jnp.float32).reshape(-1, 1)          # (R, 1)

    weights = (w1_mat, b1p, w2_t, b2p, w3_t, b3p, fcw, fcb)
    meta = dict(nc=nc, nb_classes=nb_classes, c1=c1, c2=c2, c3=c3)
    return x_taps, rowmask, weights, meta


# ----------------------------------------------------------------------------
# Wrapper
# ----------------------------------------------------------------------------
def _choose_b_tile(B, l_pad, target_rows=512):
    # MXU M-dim per grid step is R = b_tile * l_pad: aim for ~512 rows (>=256
    # fills the 256-wide v6e/v7x array; >=128 for v5e).  Prefer an even number
    # of grid steps (>1) so v7x's two TensorCores stay balanced.
    bt = max(1, min(B, max(1, target_rows // l_pad)))
    n = _cdiv(B, bt)
    if n > 1 and n % 2 == 1:
        n += 1
    bt = _cdiv(B, n)
    return bt, n


def classifier_fcn(x_blc, p, *, b_tile=None, dot_dtype=jnp.bfloat16):
    """x_blc: (B, L, 1) float32. Returns logits (B, nb_classes) float32."""
    B, L, _ = x_blc.shape
    # margin >= max in-kernel halo (2 for the k=5 layer): rolls never wrap data
    l_pad = _round_up(L + 2, SUBLANE)

    if b_tile is None:
        b_tile, n_tiles = _choose_b_tile(B, l_pad)
    else:
        n_tiles = _cdiv(B, b_tile)
    b_pad = b_tile * n_tiles
    if b_pad != B:                                  # pad batch with zero samples
        x_blc = jnp.pad(x_blc, ((0, b_pad - B), (0, 0), (0, 0)))

    x_taps, rowmask, weights, meta = prepare_inputs(
        x_blc, p, b_tile=b_tile, l_pad=l_pad, dot_dtype=dot_dtype)
    nc, nb_classes = meta["nc"], meta["nb_classes"]
    c1, c2, c3 = meta["c1"], meta["c2"], meta["c3"]

    kernel = functools.partial(_fcn_kernel, b_tile=b_tile, l_pad=l_pad,
                               l_real=L, dot_dtype=dot_dtype)

    def const_spec(shape):
        return pl.BlockSpec(shape, lambda i: (0,) * len(shape))

    in_specs = [pl.BlockSpec((b_tile * l_pad, K1), lambda i: (i, 0)),
                const_spec(rowmask.shape)]
    in_specs += [const_spec(w.shape) for w in weights]
    out_specs = pl.BlockSpec((b_tile, 1, nc), lambda i: (i, 0, 0))

    flops = (2 * b_pad * l_pad * (K1 * c1 + K2 * c1 * c2 + K3 * c2 * c3)
             + 2 * b_pad * c3 * nc)
    bytes_accessed = int(4 * x_taps.size + 4 * rowmask.size
                         + sum(w.size * w.dtype.itemsize for w in weights)
                         + 4 * b_pad * nc)

    out = pl.pallas_call(
        kernel,
        grid=(n_tiles,),
        in_specs=in_specs,
        out_specs=out_specs,
        out_shape=jax.ShapeDtypeStruct((b_pad, 1, nc), jnp.float32),
        compiler_params=pltpu.CompilerParams(
            dimension_semantics=("parallel",),
            # sized against v7x's 64 MiB VMEM (leaves DMA headroom); may be
            # raised toward 96 MiB on v5e/v6e for much larger b_tile / L.
            vmem_limit_bytes=48 * 1024 * 1024),
        cost_estimate=pl.CostEstimate(
            flops=flops, transcendentals=0, bytes_accessed=bytes_accessed),
    )(x_taps, rowmask, *weights)

    return out[:B, 0, :nb_classes]


# ----------------------------------------------------------------------------
# Pure-JAX reference (mirrors PyTorch semantics, NCL layout internally)
# ----------------------------------------------------------------------------
def reference(x_blc, p):
    x = jnp.transpose(x_blc, (0, 2, 1))                            # (B, C, L)

    def conv(x, w_kio, pad):
        w = jnp.transpose(w_kio, (2, 1, 0))                        # (Cout, Cin, K)
        return lax.conv_general_dilated(x, w, window_strides=(1,), padding=[pad],
                                        dimension_numbers=("NCH", "OIH", "NCH"))

    def bnrelu(x, g, b, m, v):
        rs = lambda a: a.reshape(1, -1, 1)
        y = (x - rs(m)) / jnp.sqrt(rs(v) + BN_EPS) * rs(g) + rs(b)
        return jnp.maximum(y, 0.0)

    h = bnrelu(conv(x, p["w1"], (3, 4)), p["g1"], p["b1"], p["m1"], p["v1"])
    h = bnrelu(conv(h, p["w2"], (2, 2)), p["g2"], p["b2"], p["m2"], p["v2"])
    h = bnrelu(conv(h, p["w3"], (1, 1)), p["g3"], p["b3"], p["m3"], p["v3"])
    pooled = jnp.mean(h, axis=2)
    return pooled @ p["fcw"] + p["fcb"]


def make_params(key, filter_count, nb_classes):
    F = filter_count
    ks = jax.random.split(key, 20)
    f32 = jnp.float32

    def bn(k, c):
        k0, k1, k2, k3 = jax.random.split(k, 4)
        return (jax.random.uniform(k0, (1, c), f32, 0.5, 1.5),   # gamma
                0.1 * jax.random.normal(k1, (1, c), f32),        # beta
                0.1 * jax.random.normal(k2, (1, c), f32),        # running_mean
                jax.random.uniform(k3, (1, c), f32, 0.5, 1.5))   # running_var

    g1, b1, m1, v1 = bn(ks[3], F)
    g2, b2, m2, v2 = bn(ks[4], 2 * F)
    g3, b3, m3, v3 = bn(ks[5], F)
    return {
        "w1": 0.3 * jax.random.normal(ks[0], (8, 1, F), f32),
        "w2": 0.3 * jax.random.normal(ks[1], (5, F, 2 * F), f32),
        "w3": 0.3 * jax.random.normal(ks[2], (3, 2 * F, F), f32),
        "g1": g1, "b1": b1, "m1": m1, "v1": v1,
        "g2": g2, "b2": b2, "m2": m2, "v2": v2,
        "g3": g3, "b3": b3, "m3": m3, "v3": v3,
        "fcw": 0.3 * jax.random.normal(ks[6], (F, nb_classes), f32),
        "fcb": 0.1 * jax.random.normal(ks[7], (1, nb_classes), f32),
    }


if __name__ == "__main__":
    B, L = 32, 16           # PyTorch input: (B, 1, L)
    filter_count = 4
    nb_classes = 3

    key = jax.random.PRNGKey(0)
    kx, kp = jax.random.split(key)
    params = make_params(kp, filter_count, nb_classes)

    x_ncl = jax.random.normal(kx, (B, 1, L), jnp.float32)
    x_blc = jnp.transpose(x_ncl, (0, 2, 1))                 # kernel layout (B, L, 1)

    ref = jax.block_until_ready(reference(x_blc, params))

    # Structural correctness: f32 matmul operands must match to 1e-4.
    out_f32 = jax.block_until_ready(
        classifier_fcn(x_blc, params, dot_dtype=jnp.float32))
    assert out_f32.shape == (B, nb_classes)
    assert jnp.allclose(out_f32, ref, rtol=1e-4, atol=1e-4), (out_f32, ref)

    # Fast path: bf16 matmul operands with f32 accumulation (relaxed tolerance).
    out_bf16 = jax.block_until_ready(classifier_fcn(x_blc, params))
    assert out_bf16.shape == (B, nb_classes)
    assert jnp.allclose(out_bf16, ref, rtol=5e-2, atol=5e-2), (out_bf16, ref)

    print("KERNEL_OK")
</pallas_src>

<mosaic_0001>
module attributes {stable_mosaic.version = 11 : i64} {
  func.func @_fcn_kernel(%arg0: i32, %arg1: memref<384x8xf32, #tpu.memory_space<vmem>>, %arg2: memref<384x1xf32, #tpu.memory_space<vmem>>, %arg3: memref<8x128xf32, #tpu.memory_space<vmem>>, %arg4: memref<1x128xf32, #tpu.memory_space<vmem>>, %arg5: memref<5x128x128xf32, #tpu.memory_space<vmem>>, %arg6: memref<1x128xf32, #tpu.memory_space<vmem>>, %arg7: memref<3x128x128xf32, #tpu.memory_space<vmem>>, %arg8: memref<1x128xf32, #tpu.memory_space<vmem>>, %arg9: memref<128x128xf32, #tpu.memory_space<vmem>>, %arg10: memref<1x128xf32, #tpu.memory_space<vmem>>, %arg11: memref<16x1x128xf32, #tpu.memory_space<vmem>>) attributes {dimension_semantics = [#tpu.dimension_semantics<parallel>], iteration_bounds = array<i64: 2>, scalar_prefetch = 0 : i64, scratch_operands = 0 : i64, tpu.core_type = #tpu.core_type<tc>, window_params = [{transform_indices = @transform_0, window_bounds = array<i64: 384, 8>}, {pipeline_mode = #tpu.pipeline_mode<synchronous>, transform_indices = @transform_1, window_bounds = array<i64: 384, 1>}, {pipeline_mode = #tpu.pipeline_mode<synchronous>, transform_indices = @transform_2, window_bounds = array<i64: 8, 128>}, {pipeline_mode = #tpu.pipeline_mode<synchronous>, transform_indices = @transform_3, window_bounds = array<i64: 1, 128>}, {pipeline_mode = #tpu.pipeline_mode<synchronous>, transform_indices = @transform_4, window_bounds = array<i64: 5, 128, 128>}, {pipeline_mode = #tpu.pipeline_mode<synchronous>, transform_indices = @transform_5, window_bounds = array<i64: 1, 128>}, {pipeline_mode = #tpu.pipeline_mode<synchronous>, transform_indices = @transform_6, window_bounds = array<i64: 3, 128, 128>}, {pipeline_mode = #tpu.pipeline_mode<synchronous>, transform_indices = @transform_7, window_bounds = array<i64: 1, 128>}, {pipeline_mode = #tpu.pipeline_mode<synchronous>, transform_indices = @transform_8, window_bounds = array<i64: 128, 128>}, {pipeline_mode = #tpu.pipeline_mode<synchronous>, transform_indices = @transform_9, window_bounds = array<i64: 1, 128>}, {transform_indices = @transform_10, window_bounds = array<i64: 16, 1, 128>}]} {
    %c0 = arith.constant 0 : index
    %c0_0 = arith.constant 0 : index
    %0 = vector.load %arg2[%c0, %c0_0] : memref<384x1xf32, #tpu.memory_space<vmem>>, vector<384x1xf32>
    %c0_1 = arith.constant 0 : index
    %c0_2 = arith.constant 0 : index
    %1 = vector.load %arg1[%c0_1, %c0_2] : memref<384x8xf32, #tpu.memory_space<vmem>>, vector<384x8xf32>
    %c0_3 = arith.constant 0 : index
    %c0_4 = arith.constant 0 : index
    %2 = vector.load %arg3[%c0_3, %c0_4] : memref<8x128xf32, #tpu.memory_space<vmem>>, vector<8x128xf32>
    %cst = arith.constant dense<0.000000e+00> : vector<384x128xf32>
    %3 = tpu.matmul %1, %2, %cst {dimension_numbers = #tpu.dot_dimension_numbers<[1], [0], [0], [1], [0, 0, 1, 1], [], []>} : vector<384x8xf32>, vector<8x128xf32>, vector<384x128xf32> -> vector<384x128xf32>
    %c0_5 = arith.constant 0 : index
    %c0_6 = arith.constant 0 : index
    %4 = vector.load %arg4[%c0_5, %c0_6] : memref<1x128xf32, #tpu.memory_space<vmem>>, vector<1x128xf32>
    %5 = vector.broadcast %4 : vector<1x128xf32> to vector<384x128xf32>
    %6 = arith.addf %3, %5 : vector<384x128xf32>
    %cst_7 = arith.constant 0.000000e+00 : f32
    %7 = vector.broadcast %cst_7 : f32 to vector<384x128xf32>
    %8 = arith.maximumf %6, %7 : vector<384x128xf32>
    %9 = vector.broadcast %0 : vector<384x1xf32> to vector<384x128xf32>
    %10 = arith.mulf %8, %9 : vector<384x128xf32>
    %c2_i32 = arith.constant 2 : i32
    %11 = tpu.dynamic_rotate %10 by %c2_i32 dim 0 : vector<384x128xf32>, i32 -> vector<384x128xf32>
    %c0_8 = arith.constant 0 : index
    %c0_9 = arith.constant 0 : index
    %c0_10 = arith.constant 0 : index
    %12 = vector.load %arg5[%c0_8, %c0_9, %c0_10] : memref<5x128x128xf32, #tpu.memory_space<vmem>>, vector<1x128x128xf32>
    %13 = vector.shape_cast %12 : vector<1x128x128xf32> to vector<128x128xf32>
    %cst_11 = arith.constant dense<0.000000e+00> : vector<384x128xf32>
    %14 = tpu.matmul %11, %13, %cst_11 {dimension_numbers = #tpu.dot_dimension_numbers<[1], [0], [0], [1], [0, 0, 1, 1], [], []>} : vector<384x128xf32>, vector<128x128xf32>, vector<384x128xf32> -> vector<384x128xf32>
    %c1_i32 = arith.constant 1 : i32
    %15 = tpu.dynamic_rotate %10 by %c1_i32 dim 0 : vector<384x128xf32>, i32 -> vector<384x128xf32>
    %c1 = arith.constant 1 : index
    %c0_12 = arith.constant 0 : index
    %c0_13 = arith.constant 0 : index
    %16 = vector.load %arg5[%c1, %c0_12, %c0_13] : memref<5x128x128xf32, #tpu.memory_space<vmem>>, vector<1x128x128xf32>
    %17 = vector.shape_cast %16 : vector<1x128x128xf32> to vector<128x128xf32>
    %cst_14 = arith.constant dense<0.000000e+00> : vector<384x128xf32>
    %18 = tpu.matmul %15, %17, %cst_14 {dimension_numbers = #tpu.dot_dimension_numbers<[1], [0], [0], [1], [0, 0, 1, 1], [], []>} : vector<384x128xf32>, vector<128x128xf32>, vector<384x128xf32> -> vector<384x128xf32>
    %19 = arith.addf %14, %18 : vector<384x128xf32>
    %c2 = arith.constant 2 : index
    %c0_15 = arith.constant 0 : index
    %c0_16 = arith.constant 0 : index
    %20 = vector.load %arg5[%c2, %c0_15, %c0_16] : memref<5x128x128xf32, #tpu.memory_space<vmem>>, vector<1x128x128xf32>
    %21 = vector.shape_cast %20 : vector<1x128x128xf32> to vector<128x128xf32>
    %cst_17 = arith.constant dense<0.000000e+00> : vector<384x128xf32>
    %22 = tpu.matmul %10, %21, %cst_17 {dimension_numbers = #tpu.dot_dimension_numbers<[1], [0], [0], [1], [0, 0, 1, 1], [], []>} : vector<384x128xf32>, vector<128x128xf32>, vector<384x128xf32> -> vector<384x128xf32>
    %23 = arith.addf %19, %22 : vector<384x128xf32>
    %c383_i32 = arith.constant 383 : i32
    %24 = tpu.dynamic_rotate %10 by %c383_i32 dim 0 : vector<384x128xf32>, i32 -> vector<384x128xf32>
    %c3 = arith.constant 3 : index
    %c0_18 = arith.constant 0 : index
    %c0_19 = arith.constant 0 : index
    %25 = vector.load %arg5[%c3, %c0_18, %c0_19] : memref<5x128x128xf32, #tpu.memory_space<vmem>>, vector<1x128x128xf32>
    %26 = vector.shape_cast %25 : vector<1x128x128xf32> to vector<128x128xf32>
    %cst_20 = arith.constant dense<0.000000e+00> : vector<384x128xf32>
    %27 = tpu.matmul %24, %26, %cst_20 {dimension_numbers = #tpu.dot_dimension_numbers<[1], [0], [0], [1], [0, 0, 1, 1], [], []>} : vector<384x128xf32>, vector<128x128xf32>, vector<384x128xf32> -> vector<384x128xf32>
    %28 = arith.addf %23, %27 : vector<384x128xf32>
    %c382_i32 = arith.constant 382 : i32
    %29 = tpu.dynamic_rotate %10 by %c382_i32 dim 0 : vector<384x128xf32>, i32 -> vector<384x128xf32>
    %c4 = arith.constant 4 : index
    %c0_21 = arith.constant 0 : index
    %c0_22 = arith.constant 0 : index
    %30 = vector.load %arg5[%c4, %c0_21, %c0_22] : memref<5x128x128xf32, #tpu.memory_space<vmem>>, vector<1x128x128xf32>
    %31 = vector.shape_cast %30 : vector<1x128x128xf32> to vector<128x128xf32>
    %cst_23 = arith.constant dense<0.000000e+00> : vector<384x128xf32>
    %32 = tpu.matmul %29, %31, %cst_23 {dimension_numbers = #tpu.dot_dimension_numbers<[1], [0], [0], [1], [0, 0, 1, 1], [], []>} : vector<384x128xf32>, vector<128x128xf32>, vector<384x128xf32> -> vector<384x128xf32>
    %33 = arith.addf %28, %32 : vector<384x128xf32>
    %c0_24 = arith.constant 0 : index
    %c0_25 = arith.constant 0 : index
    %34 = vector.load %arg6[%c0_24, %c0_25] : memref<1x128xf32, #tpu.memory_space<vmem>>, vector<1x128xf32>
    %35 = vector.broadcast %34 : vector<1x128xf32> to vector<384x128xf32>
    %36 = arith.addf %33, %35 : vector<384x128xf32>
    %cst_26 = arith.constant 0.000000e+00 : f32
    %37 = vector.broadcast %cst_26 : f32 to vector<384x128xf32>
    %38 = arith.maximumf %36, %37 : vector<384x128xf32>
    %39 = vector.broadcast %0 : vector<384x1xf32> to vector<384x128xf32>
    %40 = arith.mulf %38, %39 : vector<384x128xf32>
    %c1_i32_27 = arith.constant 1 : i32
    %41 = tpu.dynamic_rotate %40 by %c1_i32_27 dim 0 : vector<384x128xf32>, i32 -> vector<384x128xf32>
    %c0_28 = arith.constant 0 : index
    %c0_29 = arith.constant 0 : index
    %c0_30 = arith.constant 0 : index
    %42 = vector.load %arg7[%c0_28, %c0_29, %c0_30] : memref<3x128x128xf32, #tpu.memory_space<vmem>>, vector<1x128x128xf32>
    %43 = vector.shape_cast %42 : vector<1x128x128xf32> to vector<128x128xf32>
    %cst_31 = arith.constant dense<0.000000e+00> : vector<384x128xf32>
    %44 = tpu.matmul %41, %43, %cst_31 {dimension_numbers = #tpu.dot_dimension_numbers<[1], [0], [0], [1], [0, 0, 1, 1], [], []>} : vector<384x128xf32>, vector<128x128xf32>, vector<384x128xf32> -> vector<384x128xf32>
    %c1_32 = arith.constant 1 : index
    %c0_33 = arith.constant 0 : index
    %c0_34 = arith.constant 0 : index
    %45 = vector.load %arg7[%c1_32, %c0_33, %c0_34] : memref<3x128x128xf32, #tpu.memory_space<vmem>>, vector<1x128x128xf32>
    %46 = vector.shape_cast %45 : vector<1x128x128xf32> to vector<128x128xf32>
    %cst_35 = arith.constant dense<0.000000e+00> : vector<384x128xf32>
    %47 = tpu.matmul %40, %46, %cst_35 {dimension_numbers = #tpu.dot_dimension_numbers<[1], [0], [0], [1], [0, 0, 1, 1], [], []>} : vector<384x128xf32>, vector<128x128xf32>, vector<384x128xf32> -> vector<384x128xf32>
    %48 = arith.addf %44, %47 : vector<384x128xf32>
    %c383_i32_36 = arith.constant 383 : i32
    %49 = tpu.dynamic_rotate %40 by %c383_i32_36 dim 0 : vector<384x128xf32>, i32 -> vector<384x128xf32>
    %c2_37 = arith.constant 2 : index
    %c0_38 = arith.constant 0 : index
    %c0_39 = arith.constant 0 : index
    %50 = vector.load %arg7[%c2_37, %c0_38, %c0_39] : memref<3x128x128xf32, #tpu.memory_space<vmem>>, vector<1x128x128xf32>
    %51 = vector.shape_cast %50 : vector<1x128x128xf32> to vector<128x128xf32>
    %cst_40 = arith.constant dense<0.000000e+00> : vector<384x128xf32>
    %52 = tpu.matmul %49, %51, %cst_40 {dimension_numbers = #tpu.dot_dimension_numbers<[1], [0], [0], [1], [0, 0, 1, 1], [], []>} : vector<384x128xf32>, vector<128x128xf32>, vector<384x128xf32> -> vector<384x128xf32>
    %53 = arith.addf %48, %52 : vector<384x128xf32>
    %c0_41 = arith.constant 0 : index
    %c0_42 = arith.constant 0 : index
    %54 = vector.load %arg8[%c0_41, %c0_42] : memref<1x128xf32, #tpu.memory_space<vmem>>, vector<1x128xf32>
    %55 = vector.broadcast %54 : vector<1x128xf32> to vector<384x128xf32>
    %56 = arith.addf %53, %55 : vector<384x128xf32>
    %cst_43 = arith.constant 0.000000e+00 : f32
    %57 = vector.broadcast %cst_43 : f32 to vector<384x128xf32>
    %58 = arith.maximumf %56, %57 : vector<384x128xf32>
    %59 = vector.broadcast %0 : vector<384x1xf32> to vector<384x128xf32>
    %60 = arith.mulf %58, %59 : vector<384x128xf32>
    %61 = vector.shape_cast %60 : vector<384x128xf32> to vector<16x24x128xf32>
    %cst_44 = arith.constant dense<0.000000e+00> : vector<16x128xf32>
    %62 = vector.multi_reduction <add>, %61, %cst_44 [1] : vector<16x24x128xf32> to vector<16x128xf32>
    %cst_45 = arith.constant 6.250000e-02 : f32
    %63 = vector.broadcast %cst_45 : f32 to vector<16x128xf32>
    %64 = arith.mulf %62, %63 : vector<16x128xf32>
    %c0_46 = arith.constant 0 : index
    %c0_47 = arith.constant 0 : index
    %65 = vector.load %arg9[%c0_46, %c0_47] : memref<128x128xf32, #tpu.memory_space<vmem>>, vector<128x128xf32>
    %cst_48 = arith.constant dense<0.000000e+00> : vector<16x128xf32>
    %66 = tpu.matmul %64, %65, %cst_48 {dimension_numbers = #tpu.dot_dimension_numbers<[1], [0], [0], [1], [0, 0, 1, 1], [], []>} : vector<16x128xf32>, vector<128x128xf32>, vector<16x128xf32> -> vector<16x128xf32>
    %c0_49 = arith.constant 0 : index
    %c0_50 = arith.constant 0 : index
    %67 = vector.load %arg10[%c0_49, %c0_50] : memref<1x128xf32, #tpu.memory_space<vmem>>, vector<1x128xf32>
    %68 = vector.broadcast %67 : vector<1x128xf32> to vector<16x128xf32>
    %69 = arith.addf %66, %68 : vector<16x128xf32>
    %70 = vector.shape_cast %69 : vector<16x128xf32> to vector<16x1x128xf32>
    %c0_51 = arith.constant 0 : index
    %c0_52 = arith.constant 0 : index
    %c0_53 = arith.constant 0 : index
    %71 = vector.load %arg11[%c0_51, %c0_52, %c0_53] : memref<16x1x128xf32, #tpu.memory_space<vmem>>, vector<16x1x128xf32>
    tpu.vector_store %arg11[%c0_51, %c0_52, %c0_53], %70 {strides = array<i32>} : memref<16x1x128xf32, #tpu.memory_space<vmem>>, vector<16x1x128xf32>,
    return
  }
  func.func @transform_0(%arg0: i32) -> (i32, i32) {
    %c0_i32 = arith.constant 0 : i32
    %c0_i32_0 = arith.constant 0 : i32
    return %arg0, %c0_i32 : i32, i32
  }
  func.func @transform_1(%arg0: i32) -> (i32, i32) {
    %c0_i32 = arith.constant 0 : i32
    %c0_i32_0 = arith.constant 0 : i32
    %c0_i32_1 = arith.constant 0 : i32
    return %c0_i32, %c0_i32_0 : i32, i32
  }
  func.func @transform_2(%arg0: i32) -> (i32, i32) {
    %c0_i32 = arith.constant 0 : i32
    %c0_i32_0 = arith.constant 0 : i32
    %c0_i32_1 = arith.constant 0 : i32
    return %c0_i32, %c0_i32_0 : i32, i32
  }
  func.func @transform_3(%arg0: i32) -> (i32, i32) {
    %c0_i32 = arith.constant 0 : i32
    %c0_i32_0 = arith.constant 0 : i32
    %c0_i32_1 = arith.constant 0 : i32
    return %c0_i32, %c0_i32_0 : i32, i32
  }
  func.func @transform_4(%arg0: i32) -> (i32, i32, i32) {
    %c0_i32 = arith.constant 0 : i32
    %c0_i32_0 = arith.constant 0 : i32
    %c0_i32_1 = arith.constant 0 : i32
    %c0_i32_2 = arith.constant 0 : i32
    return %c0_i32, %c0_i32_0, %c0_i32_1 : i32, i32, i32
  }
  func.func @transform_5(%arg0: i32) -> (i32, i32) {
    %c0_i32 = arith.constant 0 : i32
    %c0_i32_0 = arith.constant 0 : i32
    %c0_i32_1 = arith.constant 0 : i32
    return %c0_i32, %c0_i32_0 : i32, i32
  }
  func.func @transform_6(%arg0: i32) -> (i32, i32, i32) {
    %c0_i32 = arith.constant 0 : i32
    %c0_i32_0 = arith.constant 0 : i32
    %c0_i32_1 = arith.constant 0 : i32
    %c0_i32_2 = arith.constant 0 : i32
    return %c0_i32, %c0_i32_0, %c0_i32_1 : i32, i32, i32
  }
  func.func @transform_7(%arg0: i32) -> (i32, i32) {
    %c0_i32 = arith.constant 0 : i32
    %c0_i32_0 = arith.constant 0 : i32
    %c0_i32_1 = arith.constant 0 : i32
    return %c0_i32, %c0_i32_0 : i32, i32
  }
  func.func @transform_8(%arg0: i32) -> (i32, i32) {
    %c0_i32 = arith.constant 0 : i32
    %c0_i32_0 = arith.constant 0 : i32
    %c0_i32_1 = arith.constant 0 : i32
    return %c0_i32, %c0_i32_0 : i32, i32
  }
  func.func @transform_9(%arg0: i32) -> (i32, i32) {
    %c0_i32 = arith.constant 0 : i32
    %c0_i32_0 = arith.constant 0 : i32
    %c0_i32_1 = arith.constant 0 : i32
    return %c0_i32, %c0_i32_0 : i32, i32
  }
  func.func @transform_10(%arg0: i32) -> (i32, i32, i32) {
    %c0_i32 = arith.constant 0 : i32
    %c0_i32_0 = arith.constant 0 : i32
    %c0_i32_1 = arith.constant 0 : i32
    return %arg0, %c0_i32, %c0_i32_0 : i32, i32, i32
  }
}

</mosaic_0001>

<bundles_post_ra>
// kernel: tpu_custom_call.1
= control target key start
LH: loop header
LB: loop body
LE: loop exit
PB: predicated region body
PF: predicated region fallthrough
CT: control target
= control target key end

     0   :  { %15 = vsyncpa [#allocation3], 0  ;;  %s7661_s0 = inlined_call_operand.vmem [shape: f32[768,8], index: 0, kind: input, shape index: {}]   ;;  %s7662_s1 = inlined_call_operand.vmem [shape: f32[384,1], index: 1, kind: input, shape index: {}]   ;;  %s7663_s2 = inlined_call_operand.hbm [shape: f32[8,128], index: 2, kind: input, shape index: {}]   ;;  %s7664_s3 = inlined_call_operand.vmem [shape: f32[1,128], index: 3, kind: input, shape index: {}]   ;;  %s7665_s4 = inlined_call_operand.vmem [shape: f32[5,128,128], index: 4, kind: input, shape index: {}]   ;;  %s7666_s5 = inlined_call_operand.vmem [shape: f32[1,128], index: 5, kind: input, shape index: {}]   ;;  %s7667_s6 = inlined_call_operand.vmem [shape: f32[3,128,128], index: 6, kind: input, shape index: {}]   ;;  %s7668_s7 = inlined_call_operand.vmem [shape: f32[1,128], index: 7, kind: input, shape index: {}]   ;;  %s7669_s8 = inlined_call_operand.vmem [shape: f32[128,128], index: 8, kind: input, shape index: {}]   ;;  %s7670_s9 = inlined_call_operand.hbm [shape: f32[1,128], index: 9, kind: input, shape index: {}]   ;;  %s7671_s10 = inlined_call_operand.hbm [shape: f32[32,1,128], index: 10, kind: output, shape index: {}]  }
   0x1   :  { %16 = vsyncpa [#allocation6], 0 }
   0x2   :  { %17 = vsyncpa [#allocation4], 0 }
   0x3   :  { %19 = vsyncpa [#allocation4 + $0x1], 0  ;;  %s4423_s13 = smov 0   ;;  %s4425_s14 = smov 0  }
   0x4   :  { %s4427_s15 = smov 0   ;;  %s4429_s16 = smov 0  }
   0x5 LB: > { %s4444_s17 = sadd.s32 4294967295, %s4361_s16   ;;  %s3997_s18 = sadd.s32 4294967294, %s4361_s16   ;;  %s4361_s16 = sphi %s4429_s16, %s8340_s16   ;;  %s4357_s15 = sphi %s4427_s15, %s8339_s15   ;;  %s4353_s14 = sphi %s4425_s14, %s8338_s14   ;;  %s4349_s13 = sphi %s4423_s13, %s8337_s13  }
   0x6   : > { %s4448_s19 = sadd.s32 1, %s4361_s16   ;;  %s247_s20 = sadd.s32 1, %s4357_s15 }
   0x7   : > { %s244_s21 = ssub.s32 %s4361_s16, %s4448_s19  ;;  %p257_p0 = scmp.ne.s32.totalorder %s4357_s15, %s4353_s14 }
   0x8   : > { %p245_p1 = scmp.eq.s32.totalorder %s244_s21, 0  ;;  %p258_p2 = scmp.eq.s32.totalorder %s4444_s17, 1 }
   0x9   : > { %p263_p3 = scmp.ne.s32.totalorder %s4353_s14, %s4349_s13  ;;  %p264_p4 = scmp.eq.s32.totalorder %s3997_s18, 1 }
   0xa   : > { %s4459_s22 = scalar_select %p245_p1, %s4357_s15, %s247_s20  }
   0xb   : > { %p4461_p5 = por %p258_p2, %p257_p0  ;;  %p4465_p6 = por %p264_p4, %p263_p3 }
   0xc   : > { %p3998_p7 = scmp.ge.s32.totalorder %s4361_s16, 1  ;;  %p271_p8 = scmp.lt.s32.totalorder %s4361_s16, 3 }
   0xd   : > { %p4179_p9 = scmp.eq.s32.totalorder %s4444_s17, 0  ;;  %s286_s28 = sshll.u32 %s7663_s2, 4  ;;  %s287_s28 = int_to_ptr.hbm [resolvable:$true] %s286_s28 }
   0xe   : > { %p4472_p10 = pnand %p3998_p7, %p271_p8  ;;  %s4363_s29 = smov [#allocation2]  }
   0xf   : > { %s288_s30 = sshll.u32 %s4363_s29, 4  ;;  %s316_s18 = sshll.u32 %s7670_s9, 4  ;;  %s289_s30 = int_to_ptr.vmem [resolvable:$true] %s288_s30  ;;  %s317_s18 = int_to_ptr.hbm [resolvable:$true] %s316_s18 }
  0x10   : > { %p4168_p11 = pneg %p4472_p10  ;;  %s4364_s20 = smov [#allocation5]  }
  0x11   : > { %s318_s21 = sshll.u32 %s4364_s20, 4  ;;  %340 = sbr.rel (%p4472_p10) target bundleno = 1843 (0x733), region = 60  ;;  %s319_s21 = int_to_ptr.vmem [resolvable:$true] %s318_s21 }
  0x12   : > { %p4169_p12 = pnand %p4179_p9, %p4168_p11 }
  0x14   : > { %4171 = dma.hbm_to_vmem [thread:$0]  (!%p4169_p12), %s287_s28, 128, %s289_s30, [#allocation3]  }
  0x15   : > { %4174 = dma.hbm_to_vmem [thread:$0]  (!%p4169_p12), %s317_s18, 16, %s319_s21, [#allocation6]  }
  0x16   : > { %4336 = dma.done.wait (%p4179_p9), [#allocation3], 128  }
  0x17   : > { %4338 = vsyncadd (%p4179_p9), [#allocation3], 4294967168 }
  0x18   : > { %4340 = dma.done.wait (%p4179_p9), [#allocation6], 16  }
  0x19   : > { %4342 = vsyncadd (%p4179_p9), [#allocation6], 4294967280  ;;  %s384_s26 = smul.u32 48, %s4444_s17  ;;  %v4365_v0 = vmov 0   ;;  %v487_v1 = vld [vmem:[#allocation2] sm:$0xff]  ;;  %v394_v2 = vld [vmem:[%s7662_s1 + $0x18] sm:$0xff] }
  0x1a   : > { %4223 = vset.pattern.permute.xlu2 %v4365_v0  ;;  %4222 = vset.pattern.permute.xlu1 %v4365_v0  ;;  %v392_v3 = vld [vmem:[%s7662_s1 + $0x8] sm:$0xff]  ;;  %v391_v4 = vld [vmem:[%s7662_s1] sm:$0xff]  ;;  %vm492_vm0 = vcmask 64512   ;;  %v393_v9 = vld [vmem:[%s7662_s1 + $0x10] sm:$0xff]  ;;  %vm3806_vm5 = vcmask 1041409   ;;  %vm3808_vm6 = vcmask 1042434  }
  0x1b   : > { %4221 = vset.pattern.permute.xlu0 %v4365_v0  ;;  %p385_p13 = scmp.lt.s32.totalorder %s384_s26, 95  ;;  %652 = vmatpush.msra.mxu0 %v487_v1  ;;  %v395_v8 = vld [vmem:[%s7662_s1 + $0x20] sm:$0xff]  ;;  %v438_v10 = vld [vmem:[%s7662_s1 + $0x178] sm:$0xff]  ;;  %v397_v15 = vld [vmem:[%s7662_s1 + $0x30] sm:$0xff]  ;;  %vm3810_vm7 = vcmask 1043459   ;;  %vm3812_vm8 = vcmask 1044484  }
  0x1c   : > { %4156 = vmatpush.msra.mxu2 %v487_v1  ;;  %4157 = vmatpush.msra.mxu3 %v487_v1  ;;  %v398_v14 = vld [vmem:[%s7662_s1 + $0x38] sm:$0xff]  ;;  %v396_v16 = vld [vmem:[%s7662_s1 + $0x28] sm:$0xff]  ;;  %v401_v21 = vld [vmem:[%s7662_s1 + $0x50] sm:$0xff]  ;;  %vm3814_vm9 = vcmask 1045509   ;;  %vm3816_vm10 = vcmask 1046534   ;;  %vm3818_vm11 = vcmask 1047559  }
  0x1d   : > { %s8342_s26 = smov (!%p385_p13, %s384_s26), 95  ;;  %863 = vperm.xlu2 %4223, %v394_v2   ;;  %853 = vperm.xlu1 %4222, %v392_v3   ;;  %v400_v22 = vld [vmem:[%s7662_s1 + $0x48] sm:$0xff]  ;;  %v399_v23 = vld [vmem:[%s7662_s1 + $0x40] sm:$0xff]  ;;  %v402_v30 = vld [vmem:[%s7662_s1 + $0x58] sm:$0xff] }
  0x1e   : > { %s4006_s25 = sshll.u32 %s8342_s26, 3  ;;  %848 = vperm.xlu0 %4221, %v391_v4   ;;  %4155 = vmatpush.msra.mxu1 %v487_v1  ;;  %v404_v28 = vld [vmem:[%s7662_s1 + $0x68] sm:$0xff]  ;;  %v403_v29 = vld [vmem:[%s7662_s1 + $0x60] sm:$0xff]  ;;  %v406_v36 = vld [vmem:[%s7662_s1 + $0x78] sm:$0xff]  ;;  %s4152_s26 = sshll.u32 %s4444_s17, 4 }
  0x1f   : > { %s4506_s18 = scalar_lea.vmem %s7661_s0, %s4006_s25  ;;  %v407_v35 = vld [vmem:[%s7662_s1 + $0x80] sm:$0xff]  ;;  %v405_v37 = vld [vmem:[%s7662_s1 + $0x70] sm:$0xff]  ;;  %v410_v42 = vld [vmem:[%s7662_s1 + $0x98] sm:$0xff]  ;;  %s3909_s28 = scalar_lea.hbm %s7671_s10, %s4152_s26 }
  0x20   : > { %v439_v5 = vld [vmem:[%s4506_s18] sm:$0xff]  ;;  %v460_v6 = vld [vmem:[%s4506_s18 + $0xa8] sm:$0xff]  ;;  %v474_v7 = vld [vmem:[%s4506_s18 + $0x118] sm:$0xff]  ;;  %s3912_s17 = sshll.u32 %s3909_s28, 4  ;;  %s4311_s25 = scalar_lea.hbm %s7671_s10, 32  ;;  %s3913_s17 = int_to_ptr.hbm [resolvable:$true] %s3912_s17 }
  0x21   : > { %4007 = vmatmul.msk.f32.vlgmr.msra.gmra.mxu0 %vm492_vm0, %v439_v5  ;;  %4028 = vmatmul.msk.f32.vlgmr.msra.gmra.mxu2 %vm492_vm0, %v460_v6  ;;  %v440_v11 = vld [vmem:[%s4506_s18 + $0x8] sm:$0xff]  ;;  %v461_v12 = vld [vmem:[%s4506_s18 + $0xb0] sm:$0xff]  ;;  %v475_v13 = vld [vmem:[%s4506_s18 + $0x120] sm:$0xff] }
  0x22   : > { %4042 = vmatmul.msk.f32.vlgmr.msra.gmra.mxu3 %vm492_vm0, %v474_v7  ;;  %v441_v17 = vld [vmem:[%s4506_s18 + $0x10] sm:$0xff]  ;;  %v462_v18 = vld [vmem:[%s4506_s18 + $0xb8] sm:$0xff]  ;;  %v476_v19 = vld [vmem:[%s4506_s18 + $0x128] sm:$0xff] }
  0x23   : > { %v454_v20 = vld [vmem:[%s4506_s18 + $0x78] sm:$0xff]  ;;  %v463_v25 = vld [vmem:[%s4506_s18 + $0xc0] sm:$0xff]  ;;  %v477_v26 = vld [vmem:[%s4506_s18 + $0x130] sm:$0xff] }
  0x24   : > { %4022 = vmatmul.msk.f32.vlgmr.msra.gmra.mxu1 %vm492_vm0, %v454_v20  ;;  %v442_v24 = vld [vmem:[%s4506_s18 + $0x18] sm:$0xff]  ;;  %v455_v27 = vld [vmem:[%s4506_s18 + $0x80] sm:$0xff]  ;;  %v464_v32 = vld [vmem:[%s4506_s18 + $0xc8] sm:$0xff] }
  0x25   : > { %868 = vperm.xlu2 %4223, %v395_v8   ;;  %858 = vperm.xlu1 %4222, %v393_v9   ;;  %v443_v31 = vld [vmem:[%s4506_s18 + $0x20] sm:$0xff]  ;;  %v478_v33 = vld [vmem:[%s4506_s18 + $0x138] sm:$0xff]  ;;  %v456_v34 = vld [vmem:[%s4506_s18 + $0x88] sm:$0xff] }
  0x26   : > { %1083 = vperm.xlu0 %4221, %v438_v10   ;;  %v444_v38 = vld [vmem:[%s4506_s18 + $0x28] sm:$0xff]  ;;  %v465_v39 = vld [vmem:[%s4506_s18 + $0xd0] sm:$0xff]  ;;  %v479_v40 = vld [vmem:[%s4506_s18 + $0x140] sm:$0xff] }
  0x27   : > { %v457_v41 = vld [vmem:[%s4506_s18 + $0x90] sm:$0xff]  ;;  %v408_v44 = vld [vmem:[%s7662_s1 + $0x88] sm:$0xff]  ;;  %v466_v46 = vld [vmem:[%s4506_s18 + $0xd8] sm:$0xff] }
  0x28   : > { %v409_v43 = vld [vmem:[%s7662_s1 + $0x90] sm:$0xff]  ;;  %v480_v47 = vld [vmem:[%s4506_s18 + $0x148] sm:$0xff]  ;;  %v458_v48 = vld [vmem:[%s4506_s18 + $0x98] sm:$0xff] }
  0x29   : > { %4008 = vmatmul.msk.f32.gmra.mxu0 %vm492_vm0, %v440_v11  ;;  %4029 = vmatmul.msk.f32.gmra.mxu2 %vm492_vm0, %v461_v12  ;;  %v445_v45 = vld [vmem:[%s4506_s18 + $0x30] sm:$0xff]  ;;  %v412_v50 = vld [vmem:[%s7662_s1 + $0xa8] sm:$0xff]  ;;  %v411_v51 = vld [vmem:[%s7662_s1 + $0xa0] sm:$0xff] }
  0x2a   : > { %4043 = vmatmul.msk.f32.gmra.mxu3 %vm492_vm0, %v475_v13  ;;  %v413_v49 = vld [vmem:[%s7662_s1 + $0xb0] sm:$0xff]  ;;  %v446_v52 = vld [vmem:[%s4506_s18 + $0x38] sm:$0xff]  ;;  %v467_v53 = vld [vmem:[%s4506_s18 + $0xe0] sm:$0xff] }
  0x2b   : > { %v481_v54 = vld [vmem:[%s4506_s18 + $0x150] sm:$0xff]  ;;  %v459_v55 = vld [vmem:[%s4506_s18 + $0xa0] sm:$0xff]  ;;  %v416_v56 = vld [vmem:[%s7662_s1 + $0xc8] sm:$0xff] }
  0x2c   : > { %4023 = vmatmul.msk.f32.gmra.mxu1 %vm492_vm0, %v455_v27  ;;  %v415_v57 = vld [vmem:[%s7662_s1 + $0xc0] sm:$0xff]  ;;  %v414_v58 = vld [vmem:[%s7662_s1 + $0xb8] sm:$0xff]  ;;  %v468_v60 = vld [vmem:[%s4506_s18 + $0xe8] sm:$0xff] }
  0x2d   : > { %883 = vperm.xlu2 %4223, %v398_v14   ;;  %878 = vperm.xlu1 %4222, %v397_v15   ;;  %v447_v59 = vld [vmem:[%s4506_s18 + $0x40] sm:$0xff]  ;;  %v482_v61 = vld [vmem:[%s4506_s18 + $0x158] sm:$0xff]  ;;  %v4085_v63 = vld [vmem:[%s7665_s4 + $0x170] sm:$0xff] }
  0x2e   : > { %873 = vperm.xlu0 %4221, %v396_v16   ;;  %v4086_v62 = vld [vmem:[%s7665_s4 + $0x178] sm:$0xff]  ;;  %v419_v0 = vld [vmem:[%s7662_s1 + $0xe0] sm:$0xff]  ;;  %v417_v2 = vld [vmem:[%s7662_s1 + $0xd0] sm:$0xff] }
  0x2f   : > { %1702 = vmatpush.msrb.mxu3 %v4086_v62  ;;  %v418_v1 = vld [vmem:[%s7662_s1 + $0xd8] sm:$0xff]  ;;  %v448_v3 = vld [vmem:[%s4506_s18 + $0x48] sm:$0xff]  ;;  %v469_v4 = vld [vmem:[%s4506_s18 + $0xf0] sm:$0xff] }
  0x30   : > { %v483_v5 = vld [vmem:[%s4506_s18 + $0x160] sm:$0xff]  ;;  %v4084_v6 = vld [vmem:[%s7665_s4 + $0x168] sm:$0xff]  ;;  %v422_v8 = vld [vmem:[%s7662_s1 + $0xf8] sm:$0xff] }
  0x31   : > { %4009 = vmatmul.msk.f32.gmra.mxu0 %vm492_vm0, %v441_v17  ;;  %4030 = vmatmul.msk.f32.gmra.mxu2 %vm492_vm0, %v462_v18  ;;  %v4083_v7 = vld [vmem:[%s7665_s4 + $0x160] sm:$0xff]  ;;  %v4082_v9 = vld [vmem:[%s7665_s4 + $0x158] sm:$0xff]  ;;  %v421_v10 = vld [vmem:[%s7662_s1 + $0xf0] sm:$0xff] }
  0x32   : > { %4044 = vmatmul.msk.f32.gmra.mxu3 %vm492_vm0, %v476_v19  ;;  %v420_v11 = vld [vmem:[%s7662_s1 + $0xe8] sm:$0xff]  ;;  %v449_v12 = vld [vmem:[%s4506_s18 + $0x50] sm:$0xff]  ;;  %v470_v13 = vld [vmem:[%s4506_s18 + $0xf8] sm:$0xff] }
  0x33   : > { %1703 = vmatpush.msrb.mxu3 %v4085_v63  ;;  %v484_v14 = vld [vmem:[%s4506_s18 + $0x168] sm:$0xff]  ;;  %v4081_v15 = vld [vmem:[%s7665_s4 + $0x150] sm:$0xff]  ;;  %v4102_v16 = vld [vmem:[%s7665_s4 + $0x1f8] sm:$0xff] }
  0x34   : > { %4024 = vmatmul.msk.f32.gmra.mxu1 %vm492_vm0, %v456_v34  ;;  %2025 = vmatpush.msrb.mxu0 %v4102_v16  ;;  %v4080_v17 = vld [vmem:[%s7665_s4 + $0x148] sm:$0xff]  ;;  %v4101_v18 = vld [vmem:[%s7665_s4 + $0x1f0] sm:$0xff]  ;;  %v4099_v27 = vld [vmem:[%s7665_s4 + $0x1e0] sm:$0xff] }
  0x35   : > { %898 = vperm.xlu2 %4223, %v401_v21   ;;  %893 = vperm.xlu1 %4222, %v400_v22   ;;  %v4100_v19 = vld [vmem:[%s7665_s4 + $0x1e8] sm:$0xff]  ;;  %v425_v20 = vld [vmem:[%s7662_s1 + $0x110] sm:$0xff]  ;;  %v4079_v21 = vld [vmem:[%s7665_s4 + $0x140] sm:$0xff] }
  0x36   : > { %888 = vperm.xlu0 %4221, %v399_v23   ;;  %1704 = vmatpush.msrb.mxu3 %v4084_v6  ;;  %v424_v22 = vld [vmem:[%s7662_s1 + $0x108] sm:$0xff]  ;;  %v423_v23 = vld [vmem:[%s7662_s1 + $0x100] sm:$0xff]  ;;  %v437_v62 = vld [vmem:[%s7662_s1 + $0x170] sm:$0xff] }
  0x37   : > { %2026 = vmatpush.msrb.mxu0 %v4101_v18  ;;  %v427_v34 = vld [vmem:[%s7662_s1 + $0x120] sm:$0xff]  ;;  %v436_v63 = vld [vmem:[%s7662_s1 + $0x168] sm:$0xff] }
  0x38   : > { %1705 = vmatpush.msrb.mxu3 %v4083_v7 }
  0x39   : > { %4010 = vmatmul.msk.f32.gmra.mxu0 %vm492_vm0, %v442_v24  ;;  %4031 = vmatmul.msk.f32.gmra.mxu2 %vm492_vm0, %v463_v25  ;;  %v450_v24 = vld [vmem:[%s4506_s18 + $0x58] sm:$0xff]  ;;  %v471_v25 = vld [vmem:[%s4506_s18 + $0x100] sm:$0xff] }
  0x3a   : > { %4045 = vmatmul.msk.f32.gmra.mxu3 %vm492_vm0, %v477_v26  ;;  %2027 = vmatpush.msrb.mxu0 %v4100_v19  ;;  %v485_v26 = vld [vmem:[%s4506_s18 + $0x170] sm:$0xff] }
  0x3b   : > { %1706 = vmatpush.msrb.mxu3 %v4082_v9 }
  0x3c   : > { %4025 = vmatmul.msk.f32.gmra.mxu1 %vm492_vm0, %v457_v41  ;;  %2028 = vmatpush.msrb.mxu0 %v4099_v27  ;;  %v4095_v41 = vld [vmem:[%s7665_s4 + $0x1c0] sm:$0xff] }
  0x3d   : > { %913 = vperm.xlu2 %4223, %v404_v28   ;;  %908 = vperm.xlu1 %4222, %v403_v29   ;;  %v4078_v28 = vld [vmem:[%s7665_s4 + $0x138] sm:$0xff] }
  0x3e   : > { %903 = vperm.xlu0 %4221, %v402_v30   ;;  %1707 = vmatpush.msrb.mxu3 %v4081_v15  ;;  %v4098_v29 = vld [vmem:[%s7665_s4 + $0x1d8] sm:$0xff]  ;;  %v4077_v30 = vld [vmem:[%s7665_s4 + $0x130] sm:$0xff] }
  0x3f   : > { %2029 = vmatpush.msrb.mxu0 %v4098_v29 }
  0x40   : > { %1708 = vmatpush.msrb.mxu3 %v4080_v17 }
  0x41   : > { %4011 = vmatmul.msk.f32.gmra.mxu0 %vm492_vm0, %v443_v31  ;;  %4032 = vmatmul.msk.f32.gmra.mxu2 %vm492_vm0, %v464_v32  ;;  %v4097_v31 = vld [vmem:[%s7665_s4 + $0x1d0] sm:$0xff]  ;;  %v428_v32 = vld [vmem:[%s7662_s1 + $0x128] sm:$0xff] }
  0x42   : > { %4046 = vmatmul.msk.f32.gmra.mxu3 %vm492_vm0, %v478_v33  ;;  %v4076_v33 = vld [vmem:[%s7665_s4 + $0x128] sm:$0xff]  ;;  %2030 = vmatpush.msrb.mxu0 %v4097_v31 }
  0x43   : > { %1709 = vmatpush.msrb.mxu3 %v4079_v21 }
  0x44   : > { %4026 = vmatmul.msk.f32.gmra.mxu1 %vm492_vm0, %v458_v48  ;;  %v452_v48 = vld [vmem:[%s4506_s18 + $0x68] sm:$0xff] }
  0x45   : > { %928 = vperm.xlu2 %4223, %v407_v35   ;;  %923 = vperm.xlu1 %4222, %v406_v36   ;;  %v426_v35 = vld [vmem:[%s7662_s1 + $0x118] sm:$0xff]  ;;  %v451_v36 = vld [vmem:[%s4506_s18 + $0x60] sm:$0xff] }
  0x46   : > { %918 = vperm.xlu0 %4221, %v405_v37   ;;  %1710 = vmatpush.msrb.mxu3 %v4078_v28  ;;  %v472_v37 = vld [vmem:[%s4506_s18 + $0x108] sm:$0xff] }
  0x48   : > { %1711 = vmatpush.msrb.mxu3 %v4077_v30 }
  0x49   : > { %4012 = vmatmul.msk.f32.gmra.mxu0 %vm492_vm0, %v444_v38  ;;  %4033 = vmatmul.msk.f32.gmra.mxu2 %vm492_vm0, %v465_v39  ;;  %v486_v38 = vld [vmem:[%s4506_s18 + $0x178] sm:$0xff]  ;;  %v4096_v39 = vld [vmem:[%s7665_s4 + $0x1c8] sm:$0xff] }
  0x4a   : > { %4047 = vmatmul.msk.f32.gmra.mxu3 %vm492_vm0, %v479_v40  ;;  %v4075_v40 = vld [vmem:[%s7665_s4 + $0x120] sm:$0xff]  ;;  %2031 = vmatpush.msrb.mxu0 %v4096_v39 }
  0x4b   : > { %1712 = vmatpush.msrb.mxu3 %v4076_v33 }
  0x4c   : > { %4027 = vmatmul.msk.f32.gmra.mxu1 %vm492_vm0, %v459_v55  ;;  %2032 = vmatpush.msrb.mxu0 %v4095_v41  ;;  %v434_v55 = vld [vmem:[%s7662_s1 + $0x158] sm:$0xff] }
  0x4d   : > { %943 = vperm.xlu2 %4223, %v410_v42   ;;  %938 = vperm.xlu1 %4222, %v409_v43   ;;  %v4074_v42 = vld [vmem:[%s7665_s4 + $0x118] sm:$0xff] }
  0x4e   : > { %933 = vperm.xlu0 %4221, %v408_v44   ;;  %1713 = vmatpush.msrb.mxu3 %v4075_v40  ;;  %v4094_v43 = vld [vmem:[%s7665_s4 + $0x1b8] sm:$0xff]  ;;  %v431_v44 = vld [vmem:[%s7662_s1 + $0x140] sm:$0xff] }
  0x4f   : > { %2033 = vmatpush.msrb.mxu0 %v4094_v43  ;;  %v4069_v43 = vld [vmem:[%s7665_s4 + $0xf0] sm:$0xff] }
  0x50   : > { %1714 = vmatpush.msrb.mxu3 %v4074_v42  ;;  %v4070_v42 = vld [vmem:[%s7665_s4 + $0xf8] sm:$0xff] }
  0x51   : > { %4013 = vmatmul.msk.f32.gmra.mxu0 %vm492_vm0, %v445_v45  ;;  %4034 = vmatmul.msk.f32.gmra.mxu2 %vm492_vm0, %v466_v46  ;;  %v4073_v45 = vld [vmem:[%s7665_s4 + $0x110] sm:$0xff]  ;;  %v430_v46 = vld [vmem:[%s7662_s1 + $0x138] sm:$0xff] }
  0x52   : > { %4048 = vmatmul.msk.f32.gmra.mxu3 %vm492_vm0, %v480_v47  ;;  %v429_v47 = vld [vmem:[%s7662_s1 + $0x130] sm:$0xff]  ;;  %1363 = vmatpush.msrb.mxu1 %v4070_v42 }
  0x53   : > { %1715 = vmatpush.msrb.mxu3 %v4073_v45 }
  0x54   : > { %1364 = vmatpush.msrb.mxu1 %v4069_v43  ;;  %v1240_v43 = vld [vmem:[%s7665_s4 + $0x38] sm:$0xff] }
  0x55   : > { %958 = vperm.xlu2 %4223, %v413_v49   ;;  %953 = vperm.xlu1 %4222, %v412_v50   ;;  %v473_v49 = vld [vmem:[%s4506_s18 + $0x110] sm:$0xff]  ;;  %v4072_v50 = vld [vmem:[%s7665_s4 + $0x108] sm:$0xff] }
  0x56   : > { %948 = vperm.xlu0 %4221, %v411_v51   ;;  %v4093_v51 = vld [vmem:[%s7665_s4 + $0x1b0] sm:$0xff]  ;;  %1716 = vmatpush.msrb.mxu3 %v4072_v50  ;;  %v4068_v50 = vld [vmem:[%s7665_s4 + $0xe8] sm:$0xff] }
  0x57   : > { %2034 = vmatpush.msrb.mxu0 %v4093_v51  ;;  %1365 = vmatpush.msrb.mxu1 %v4068_v50  ;;  %v4059_v50 = vld [vmem:[%s7665_s4 + $0xa0] sm:$0xff] }
  0x59   : > { %4014 = vmatmul.msk.f32.gmra.mxu0 %vm492_vm0, %v446_v52  ;;  %4035 = vmatmul.msk.f32.gmra.mxu2 %vm492_vm0, %v467_v53  ;;  %v4071_v52 = vld [vmem:[%s7665_s4 + $0x100] sm:$0xff]  ;;  %v4092_v53 = vld [vmem:[%s7665_s4 + $0x1a8] sm:$0xff] }
  0x5a   : > { %4049 = vmatmul.msk.f32.gmra.mxu3 %vm492_vm0, %v481_v54  ;;  %v4091_v54 = vld [vmem:[%s7665_s4 + $0x1a0] sm:$0xff]  ;;  %2035 = vmatpush.msrb.mxu0 %v4092_v53 }
  0x5b   : > { %1717 = vmatpush.msrb.mxu3 %v4071_v52  ;;  %v4067_v53 = vld [vmem:[%s7665_s4 + $0xe0] sm:$0xff] }
  0x5c   : > { %2036 = vmatpush.msrb.mxu0 %v4091_v54  ;;  %v4066_v54 = vld [vmem:[%s7665_s4 + $0xd8] sm:$0xff]  ;;  %1366 = vmatpush.msrb.mxu1 %v4067_v53 }
  0x5d   : > { %973 = vperm.xlu2 %4223, %v416_v56   ;;  %968 = vperm.xlu1 %4222, %v415_v57   ;;  %v433_v56 = vld [vmem:[%s7662_s1 + $0x150] sm:$0xff]  ;;  %v432_v57 = vld [vmem:[%s7662_s1 + $0x148] sm:$0xff]  ;;  %v4058_v53 = vld [vmem:[%s7665_s4 + $0x98] sm:$0xff] }
  0x5e   : > { %963 = vperm.xlu0 %4221, %v414_v58   ;;  %v453_v58 = vld [vmem:[%s4506_s18 + $0x70] sm:$0xff]  ;;  %1367 = vmatpush.msrb.mxu1 %v4066_v54  ;;  %v1238_v54 = vld [vmem:[%s7665_s4 + $0x28] sm:$0xff]  ;;  %s381_s18 = sand.u32 1, %s4353_s14  }
  0x5f   : > { %s4005_s11 = sshll.u32 %s381_s18, 4  ;;  %s3899_s30 = scalar_lea.sflag [#allocation4], %s381_s18 }
  0x60   : > { %s7585_s12 = scalar_lea.vmem [#allocation7], %s4005_s11  ;;  %s4305_s11 = sshra.s32 %s3913_s17, 4  ;;  %s4306_s11 = int_to_ptr.hbm [resolvable:$true] %s4305_s11 }
  0x61   : > { %4015 = vmatmul.msk.f32.gmra.mxu0 %vm492_vm0, %v447_v59  ;;  %4036 = vmatmul.msk.f32.gmra.mxu2 %vm492_vm0, %v468_v60  ;;  %v4090_v59 = vld [vmem:[%s7665_s4 + $0x198] sm:$0xff]  ;;  %v4089_v60 = vld [vmem:[%s7665_s4 + $0x190] sm:$0xff]  ;;  %s3910_s29 = sshll.u32 %s7585_s12, 4  ;;  %s4307_s20 = scalar_lea.hbm %s4306_s11, 16  ;;  %s3911_s29 = int_to_ptr.vmem [resolvable:$true] %s3910_s29 }
  0x62   : > { %4050 = vmatmul.msk.f32.gmra.mxu3 %vm492_vm0, %v482_v61  ;;  %2037 = vmatpush.msrb.mxu0 %v4090_v59  ;;  %v4088_v61 = vld [vmem:[%s7665_s4 + $0x188] sm:$0xff]  ;;  %p4308_p0 = scmp.ne.s32.totalorder %s4306_s11, %s4307_s20  ;;  %p4312_p3 = scmp.lt.s32.totalorder %s4306_s11, %s7671_s10 }
  0x63   : > { %p4313_p4 = scmp.lt.s32.totalorder %s4311_s25, %s4307_s20 }
  0x64   : > { %2038 = vmatpush.msrb.mxu0 %v4089_v60  ;;  %v1248_v60 = vld [vmem:[%s7665_s4 + $0x78] sm:$0xff]  ;;  %p4309_p1 = pnand %p4308_p0, %p4461_p5 }
  0x65   : > { %988 = vperm.xlu2 %4223, %v419_v0   ;;  %983 = vperm.xlu1 %4222, %v418_v1   ;;  %v435_v0 = vld [vmem:[%s7662_s1 + $0x160] sm:$0xff]  ;;  %p4314_p7 = por %p4313_p4, %p4312_p3 }
  0x66   : > { %978 = vperm.xlu0 %4221, %v417_v2   ;;  %2039 = vmatpush.msrb.mxu0 %v4088_v61  ;;  %v4087_v1 = vld [vmem:[%s7665_s4 + $0x180] sm:$0xff]  ;;  %p4310_p2 = pneg %p4309_p1 }
  0x67   : > { %v4841_v2 = vld [vmem:[%s7664_s3] ss:$0 sm:$0xff]  ;;  %1524 = vmatpush.msrb.mxu2 %v1248_v60 }
  0x68   : > { %2040 = vmatpush.msrb.mxu0 %v4087_v1  ;;  %p4315_p8 = pnand %p4314_p7, %p4310_p2 }
  0x69   : > { %4016 = vmatmul.msk.f32.gmra.mxu0 %vm492_vm0, %v448_v3  ;;  %4037 = vmatmul.msk.f32.gmra.mxu2 %vm492_vm0, %v469_v4 }
  0x6a   : > { %4051 = vmatmul.msk.f32.gmra.mxu3 %vm492_vm0, %v483_v5 }
  0x6d   : > { %1003 = vperm.xlu2 %4223, %v422_v8   ;;  %998 = vperm.xlu1 %4222, %v421_v10   ;;  %v1182_v8 = vlaneseq }
  0x6e   : > { %993 = vperm.xlu0 %4221, %v420_v11  }
  0x71   : > { %4017 = vmatmul.msk.f32.gmra.mxu0 %vm492_vm0, %v449_v12  ;;  %4038 = vmatmul.msk.f32.gmra.mxu2 %vm492_vm0, %v470_v13  ;;  %v4855_v13 = vshrl.u32 %v1182_v8, 7 }
  0x72   : > { %4052 = vmatmul.msk.f32.gmra.mxu3 %vm492_vm0, %v484_v14 }
  0x73   : > { %vm1959_vm1 = vcmp.lt.s32.totalorder %v4855_v13, 7  ;;  %vm1297_vm2 = vcmp.lt.s32.totalorder %v4855_v13, 1  ;;  %vm1184_vm3 = vcmp.lt.s32.totalorder %v4855_v13, 2  ;;  %vm2282_vm4 = vcmp.lt.s32.totalorder %v4855_v13, 6 }
  0x75   : > { %1018 = vperm.xlu2 %4223, %v425_v20   ;;  %1013 = vperm.xlu1 %4222, %v424_v22  }
  0x76   : > { %1008 = vperm.xlu0 %4221, %v423_v23  }
  0x77   : > { %v4883_v30 = vpop.permute.xlu2 %863 }
  0x78   : > { %7848 = vst [vmem:[#allocation14_spill] sm:$0xff] %v4883_v30 }
  0x79   : > { %4018 = vmatmul.msk.f32.gmra.mxu0 %vm492_vm0, %v450_v24  ;;  %4039 = vmatmul.msk.f32.gmra.mxu2 %vm492_vm0, %v471_v25 }
  0x7a   : > { %4053 = vmatmul.msk.f32.gmra.mxu3 %vm492_vm0, %v485_v26 }
  0x7d   : > { %1033 = vperm.xlu2 %4223, %v428_v32   ;;  %1028 = vperm.xlu1 %4222, %v427_v34  }
  0x7e   : > { %1023 = vperm.xlu0 %4221, %v426_v35  }
  0x7f   : > { %v4897_v40 = vpop.permute.xlu2 %868 }
  0x80   : > { %7850 = vst [vmem:[#allocation16_spill] sm:$0xff] %v4897_v40 }
  0x81   : > { %4019 = vmatmul.msk.f32.gmra.mxu0 %vm492_vm0, %v451_v36  ;;  %4040 = vmatmul.msk.f32.gmra.mxu2 %vm492_vm0, %v472_v37 }
  0x82   : > { %4054 = vmatmul.msk.f32.gmra.mxu3 %vm492_vm0, %v486_v38 }
  0x85   : > { %1048 = vperm.xlu2 %4223, %v431_v44   ;;  %1043 = vperm.xlu1 %4222, %v430_v46  }
  0x86   : > { %1038 = vperm.xlu0 %4221, %v429_v47  }
  0x89   : > { %4020 = vmatmul.msk.f32.gmra.mxu0 %vm492_vm0, %v452_v48  ;;  %4041 = vmatmul.msk.f32.gmra.mxu2 %vm492_vm0, %v473_v49 }
  0x8d   : > { %1063 = vperm.xlu2 %4223, %v434_v55   ;;  %1058 = vperm.xlu1 %4222, %v433_v56  }
  0x8e   : > { %1053 = vperm.xlu0 %4221, %v432_v57  }
  0x8f   : > { %v4853_v12 = vpop.permute.xlu1 %853 }
  0x90   : > { %v4844_v6 = vpop.permute.xlu0 %848  ;;  %7846 = vst [vmem:[#allocation12_spill] sm:$0xff] %v4853_v12 }
  0x91   : > { %4021 = vmatmul.msk.f32.gmra.mxu0 %vm492_vm0, %v453_v58  ;;  %7845 = vst [vmem:[#allocation11_spill] sm:$0xff] %v4844_v6 }
  0x95   : > { %1078 = vperm.xlu2 %4223, %v437_v62   ;;  %1073 = vperm.xlu1 %4222, %v436_v63   ;;  %v4065_v62 = vld [vmem:[%s7665_s4 + $0xd0] sm:$0xff] }
  0x96   : > { %1068 = vperm.xlu0 %4221, %v435_v0   ;;  %v1247_v63 = vld [vmem:[%s7665_s4 + $0x70] sm:$0xff]  ;;  %1368 = vmatpush.msrb.mxu1 %v4065_v62  ;;  %v1236_v62 = vld [vmem:[%s7665_s4 + $0x18] sm:$0xff] }
  0x97   : > { %v4871_v23 = vpop.permute.xlu1 %858  ;;  %1525 = vmatpush.msrb.mxu2 %v1247_v63 }
  0x98   : > { %7847 = vst [vmem:[#allocation13_spill] sm:$0xff] %v4871_v23  ;;  %v4895_v38 = vpop.permute.xlu0 %1083 }
  0x99   : > { %7849 = vst [vmem:[#allocation15_spill] sm:$0xff] %v4895_v38 }
  0x9e   : > { %v654_v3 = vpop.f32.mrf.mxu0 }
  0x9f   : > { %v655_v4 = vadd.f32 %v4841_v2, %v654_v3  ;;  %v4945_v0 = vpop.permute.xlu1 %878  ;;  %v4064_v3 = vld [vmem:[%s7665_s4 + $0xc8] sm:$0xff] }
  0xa0   : > { %v4918_v51 = vpop.permute.xlu0 %873  ;;  %7852 = vst [vmem:[#allocation18_spill] sm:$0xff] %v4945_v0  ;;  %1369 = vmatpush.msrb.mxu1 %v4064_v3  ;;  %v4057_v3 = vld [vmem:[%s7665_s4 + $0x90] sm:$0xff] }
  0xa1   : > { %v798_v5 = vmax.f32 %v655_v4, 0.0  ;;  %7851 = vst [vmem:[#allocation17_spill] sm:$0xff] %v4918_v51  ;;  %v4063_v4 = vld [vmem:[%s7665_s4 + $0xc0] sm:$0xff] }
  0xa2   : > { %1370 = vmatpush.msrb.mxu1 %v4063_v4  ;;  %v1235_v4 = vld [vmem:[%s7665_s4 + $0x10] sm:$0xff] }
  0xa3   : > { %v4847_v7 = vmul.f32 %v4844_v6, %v798_v5  ;;  %v1246_v5 = vld [vmem:[%s7665_s4 + $0x68] sm:$0xff] }
  0xa4   : > { %1526 = vmatpush.msrb.mxu2 %v1246_v5 }
  0xa5   : > { %v4849_v9 = vpop.f32.mrf.mxu3  ;;  %1718 = vmatmul.f32.vlgmr.msrb.gmra.mxu3 %v4847_v7  ;;  %v7672_v16 = vrot.slane %v4847_v7, 1 }
  0xa6   : > { %v657_v10 = vpop.f32.mrf.mxu0 }
  0xa7   : > { %v658_v11 = vadd.f32 %v4841_v2, %v657_v10  ;;  %v5041_v5 = vpop.permute.xlu1 %893 }
  0xa8   : > { %7855 = vst [vmem:[#allocation21_spill] sm:$0xff] %v5041_v5 }
  0xa9   : > { %v799_v14 = vmax.f32 %v658_v11, 0.0  ;;  %v1245_v11 = vld [vmem:[%s7665_s4 + $0x60] sm:$0xff] }
  0xaa   : > { %1527 = vmatpush.msrb.mxu2 %v1245_v11  ;;  %v4056_v11 = vld [vmem:[%s7665_s4 + $0x88] sm:$0xff] }
  0xab   : > { %v4858_v15 = vmul.f32 %v4853_v12, %v799_v14 }
  0xad   : > { %v4862_v17 = vpop.f32.mrf.mxu3  ;;  %1721 = vmatmul.f32.gmra.mxu3 %v4858_v15  ;;  %v1912_v18 = vrot.slane %v4858_v15, 1 }
  0xae   : > { %v660_v19 = vpop.f32.mrf.mxu0 }
  0xaf   : > { %v661_v20 = vadd.f32 %v4841_v2, %v660_v19  ;;  %v2006_v21 = vsel %vm1959_vm1, %v7672_v16, %v1912_v18 }
  0xb0   : > { %2041 = vmatmul.f32.vlgmr.msrb.gmra.mxu0 %v2006_v21 }
  0xb1   : > { %v800_v22 = vmax.f32 %v661_v20, 0.0  ;;  %v1244_v20 = vld [vmem:[%s7665_s4 + $0x58] sm:$0xff] }
  0xb2   : > { %1528 = vmatpush.msrb.mxu2 %v1244_v20 }
  0xb3   : > { %v4874_v24 = vmul.f32 %v4871_v23, %v800_v22  ;;  %v1243_v22 = vld [vmem:[%s7665_s4 + $0x50] sm:$0xff] }
  0xb4   : > { %1529 = vmatpush.msrb.mxu2 %v1243_v22 }
  0xb5   : > { %v4876_v25 = vpop.f32.mrf.mxu3  ;;  %1724 = vmatmul.f32.gmra.mxu3 %v4874_v24  ;;  %v1913_v26 = vrot.slane %v4874_v24, 1 }
  0xb6   : > { %v663_v27 = vpop.f32.mrf.mxu0 }
  0xb7   : > { %v664_v28 = vadd.f32 %v4841_v2, %v663_v27  ;;  %v2005_v29 = vsel %vm1959_vm1, %v1912_v18, %v1913_v26 }
  0xb8   : > { %2044 = vmatmul.f32.gmra.mxu0 %v2005_v29  ;;  %v4061_v29 = vld [vmem:[%s7665_s4 + $0xb0] sm:$0xff] }
  0xb9   : > { %v801_v31 = vmax.f32 %v664_v28, 0.0  ;;  %v4062_v28 = vld [vmem:[%s7665_s4 + $0xb8] sm:$0xff] }
  0xba   : > { %1371 = vmatpush.msrb.mxu1 %v4062_v28 }
  0xbb   : > { %v4886_v32 = vmul.f32 %v4883_v30, %v801_v31  ;;  %v1242_v31 = vld [vmem:[%s7665_s4 + $0x48] sm:$0xff] }
  0xbc   : > { %1530 = vmatpush.msrb.mxu2 %v1242_v31  ;;  %1372 = vmatpush.msrb.mxu1 %v4061_v29 }
  0xbd   : > { %v4888_v33 = vpop.f32.mrf.mxu3  ;;  %1727 = vmatmul.f32.gmra.mxu3 %v4886_v32  ;;  %v1914_v34 = vrot.slane %v4886_v32, 1 }
  0xbe   : > { %v666_v35 = vpop.f32.mrf.mxu0 }
  0xbf   : > { %v667_v36 = vadd.f32 %v4841_v2, %v666_v35  ;;  %v2004_v37 = vsel %vm1959_vm1, %v1913_v26, %v1914_v34  ;;  %v4975_v26 = vpop.permute.xlu2 %883 }
  0xc0   : > { %2047 = vmatmul.f32.gmra.mxu0 %v2004_v37  ;;  %7853 = vst [vmem:[#allocation19_spill] sm:$0xff] %v4975_v26 }
  0xc1   : > { %v802_v39 = vmax.f32 %v667_v36, 0.0  ;;  %v1241_v36 = vld [vmem:[%s7665_s4 + $0x40] sm:$0xff] }
  0xc2   : > { %1531 = vmatpush.msrb.mxu2 %v1241_v36 }
  0xc3   : > { %v4900_v41 = vmul.f32 %v4897_v40, %v802_v39 }
  0xc4   : > { %1532 = vmatpush.msrb.mxu2 %v1240_v43 }
  0xc5   : > { %v4908_v44 = vpop.f32.mrf.mxu3  ;;  %1730 = vmatmul.f32.gmra.mxu3 %v4900_v41  ;;  %v1915_v45 = vrot.slane %v4900_v41, 1  ;;  %v1138_v40 = vrot.slane %v4900_v41, 6 }
  0xc6   : > { %v669_v46 = vpop.f32.mrf.mxu0 }
  0xc7   : > { %v670_v47 = vadd.f32 %v4841_v2, %v669_v46  ;;  %v2003_v48 = vsel %vm1959_vm1, %v1914_v34, %v1915_v45  ;;  %v4060_v46 = vld [vmem:[%s7665_s4 + $0xa8] sm:$0xff] }
  0xc8   : > { %2050 = vmatmul.f32.gmra.mxu0 %v2003_v48  ;;  %v5008_v48 = vpop.permute.xlu0 %888  ;;  %1373 = vmatpush.msrb.mxu1 %v4060_v46 }
  0xc9   : > { %v803_v49 = vmax.f32 %v670_v47, 0.0  ;;  %v1239_v47 = vld [vmem:[%s7665_s4 + $0x30] sm:$0xff]  ;;  %7854 = vst [vmem:[#allocation20_spill] sm:$0xff] %v5008_v48 }
  0xca   : > { %1533 = vmatpush.msrb.mxu2 %v1239_v47  ;;  %1374 = vmatpush.msrb.mxu1 %v4059_v50 }
  0xcb   : > { %v4921_v52 = vmul.f32 %v4918_v51, %v803_v49 }
  0xcc   : > { %1534 = vmatpush.msrb.mxu2 %v1238_v54  ;;  %1375 = vmatpush.msrb.mxu1 %v4058_v53 }
  0xcd   : > { %v4929_v55 = vpop.f32.mrf.mxu3  ;;  %1733 = vmatmul.f32.gmra.mxu3 %v4921_v52  ;;  %v1916_v56 = vrot.slane %v4921_v52, 1 }
  0xce   : > { %v672_v57 = vpop.f32.mrf.mxu0  ;;  %1376 = vmatpush.msrb.mxu1 %v4057_v3 }
  0xcf   : > { %v673_v58 = vadd.f32 %v4841_v2, %v672_v57  ;;  %v2002_v59 = vsel %vm1959_vm1, %v1915_v45, %v1916_v56 }
  0xd0   : > { %2053 = vmatmul.f32.gmra.mxu0 %v2002_v59  ;;  %1377 = vmatpush.msrb.mxu1 %v4056_v11  ;;  %v5080_v50 = vpop.permute.xlu0 %903 }
  0xd1   : > { %v804_v61 = vmax.f32 %v673_v58, 0.0  ;;  %v1237_v58 = vld [vmem:[%s7665_s4 + $0x20] sm:$0xff]  ;;  %7857 = vst [vmem:[#allocation23_spill] sm:$0xff] %v5080_v50 }
  0xd2   : > { %1535 = vmatpush.msrb.mxu2 %v1237_v58 }
  0xd3   : > { %v4948_v1 = vmul.f32 %v4945_v0, %v804_v61 }
  0xd4   : > { %1536 = vmatpush.msrb.mxu2 %v1236_v62  ;;  %v5092_v62 = vpop.permute.xlu1 %908 }
  0xd5   : > { %v4959_v8 = vpop.f32.mrf.mxu3  ;;  %1736 = vmatmul.f32.gmra.mxu3 %v4948_v1  ;;  %v1917_v10 = vrot.slane %v4948_v1, 1  ;;  %7858 = vst [vmem:[#allocation24_spill] sm:$0xff] %v5092_v62 }
  0xd6   : > { %v675_v14 = vpop.f32.mrf.mxu0  ;;  %1537 = vmatpush.msrb.mxu2 %v1235_v4 }
  0xd7   : > { %v676_v18 = vadd.f32 %v4841_v2, %v675_v14  ;;  %v2001_v19 = vsel %vm1959_vm1, %v1916_v56, %v1917_v10  ;;  %v4055_v14 = vld [vmem:[%s7665_s4 + $0x80] sm:$0xff] }
  0xd8   : > { %2056 = vmatmul.f32.gmra.mxu0 %v2001_v19  ;;  %1378 = vmatpush.msrb.mxu1 %v4055_v14 }
  0xd9   : > { %v805_v21 = vmax.f32 %v676_v18, 0.0  ;;  %v1234_v18 = vld [vmem:[%s7665_s4 + $0x8] sm:$0xff] }
  0xda   : > { %1538 = vmatpush.msrb.mxu2 %v1234_v18 }
  0xdb   : > { %v4978_v27 = vmul.f32 %v4975_v26, %v805_v21  ;;  %v1233_v21 = vld [vmem:[%s7665_s4] sm:$0xff] }
  0xdc   : > { %1539 = vmatpush.msrb.mxu2 %v1233_v21 }
  0xdd   : > { %v4989_v34 = vpop.f32.mrf.mxu3  ;;  %1739 = vmatmul.f32.gmra.mxu3 %v4978_v27  ;;  %v1918_v35 = vrot.slane %v4978_v27, 1 }
  0xde   : > { %v678_v37 = vpop.f32.mrf.mxu0 }
  0xdf   : > { %v679_v39 = vadd.f32 %v4841_v2, %v678_v37  ;;  %v2000_v42 = vsel %vm1959_vm1, %v1917_v10, %v1918_v35  ;;  %v4118_v37 = vld [vmem:[%s7665_s4 + $0x278] sm:$0xff] }
  0xe0   : > { %2059 = vmatmul.f32.gmra.mxu0 %v2000_v42  ;;  %2348 = vmatpush.msra.mxu1 %v4118_v37  ;;  %v4117_v37 = vld [vmem:[%s7665_s4 + $0x270] sm:$0xff] }
  0xe1   : > { %v806_v45 = vmax.f32 %v679_v39, 0.0 }
  0xe2   : > { %2349 = vmatpush.msra.mxu1 %v4117_v37 }
  0xe3   : > { %v5011_v49 = vmul.f32 %v5008_v48, %v806_v45 }
  0xe5   : > { %v5022_v56 = vpop.f32.mrf.mxu3  ;;  %1742 = vmatmul.f32.gmra.mxu3 %v5011_v49  ;;  %v1919_v57 = vrot.slane %v5011_v49, 1 }
  0xe6   : > { %v681_v59 = vpop.f32.mrf.mxu0 }
  0xe7   : > { %v682_v60 = vadd.f32 %v4841_v2, %v681_v59  ;;  %v1999_v61 = vsel %vm1959_vm1, %v1918_v35, %v1919_v57  ;;  %v5065_v35 = vpop.permute.xlu2 %898 }
  0xe8   : > { %2062 = vmatmul.f32.gmra.mxu0 %v1999_v61  ;;  %7856 = vst [vmem:[#allocation22_spill] sm:$0xff] %v5065_v35 }
  0xe9   : > { %v807_v63 = vmax.f32 %v682_v60, 0.0 }
  0xeb   : > { %v5044_v10 = vmul.f32 %v5041_v5, %v807_v63  ;;  %v699_v63 = vpop.f32.mrf.mxu1 }
  0xed   : > { %v5055_v19 = vpop.f32.mrf.mxu3  ;;  %1745 = vmatmul.f32.gmra.mxu3 %v5044_v10  ;;  %v1920_v20 = vrot.slane %v5044_v10, 1 }
  0xee   : > { %v684_v22 = vpop.f32.mrf.mxu0 }
  0xef   : > { %v685_v28 = vadd.f32 %v4841_v2, %v684_v22  ;;  %v1998_v29 = vsel %vm1959_vm1, %v1919_v57, %v1920_v20 }
  0xf0   : > { %2065 = vmatmul.f32.gmra.mxu0 %v1998_v29 }
  0xf1   : > { %v808_v31 = vmax.f32 %v685_v28, 0.0 }
  0xf3   : > { %v5068_v36 = vmul.f32 %v5065_v35, %v808_v31 }
  0xf5   : > { %v5073_v39 = vpop.f32.mrf.mxu3  ;;  %1748 = vmatmul.f32.gmra.mxu3 %v5068_v36  ;;  %v1921_v42 = vrot.slane %v5068_v36, 1 }
  0xf6   : > { %v687_v43 = vpop.f32.mrf.mxu0 }
  0xf7   : > { %v688_v45 = vadd.f32 %v4841_v2, %v687_v43  ;;  %v1997_v46 = vsel %vm1959_vm1, %v1920_v20, %v1921_v42  ;;  %v5118_v43 = vpop.f32.mrf.mxu2 }
  0xf8   : > { %2068 = vmatmul.f32.gmra.mxu0 %v1997_v46 }
  0xf9   : > { %v809_v47 = vmax.f32 %v688_v45, 0.0 }
  0xfb   : > { %v5083_v53 = vmul.f32 %v5080_v50, %v809_v47 }
  0xfd   : > { %v5085_v54 = vpop.f32.mrf.mxu3  ;;  %1751 = vmatmul.f32.gmra.mxu3 %v5083_v53  ;;  %v1922_v57 = vrot.slane %v5083_v53, 1  ;;  %v7674_v14 = vrot.slane %v5083_v53, 7  ;;  %v7673_v28 = vrot.slane %v5083_v53, 6 }
  0xfe   : > { %v690_v58 = vpop.f32.mrf.mxu0 }
  0xff   : > { %v691_v59 = vadd.f32 %v4841_v2, %v690_v58  ;;  %v1996_v60 = vsel %vm1959_vm1, %v1921_v42, %v1922_v57 }
 0x100   : > { %2071 = vmatmul.f32.gmra.mxu0 %v1996_v60  ;;  %v702_v60 = vpop.f32.mrf.mxu1 }
 0x101   : > { %v810_v61 = vmax.f32 %v691_v59, 0.0 }
 0x103   : > { %v5095_v3 = vmul.f32 %v5092_v62, %v810_v61  ;;  %v1249_v61 = vrot.slane %v4847_v7, 7 }
 0x105   : > { %v795_v4 = vpop.f32.mrf.mxu3  ;;  %1754 = vmatmul.f32.gmra.mxu3 %v5095_v3  ;;  %v1923_v11 = vrot.slane %v5095_v3, 1  ;;  %v1261_v18 = vrot.slane %v5095_v3, 7  ;;  %v1146_v20 = vrot.slane %v5095_v3, 6 }
 0x106   : > { %v796_v21 = vadd.f32 %v4841_v2, %v795_v4  ;;  %v693_v22 = vpop.f32.mrf.mxu0 }
 0x107   : > { %v694_v29 = vadd.f32 %v4841_v2, %v693_v22  ;;  %v1995_v31 = vsel %vm1959_vm1, %v1922_v57, %v1923_v11  ;;  %v5116_v42 = vsel %vm1297_vm2, %v7674_v14, %v1261_v18  ;;  %v5124_v46 = vsel %vm1184_vm3, %v7673_v28, %v1146_v20  ;;  %v5126_v57 = vpop.permute.xlu2 %913 }
 0x108   : > { %v845_v45 = vmax.f32 %v796_v21, 0.0  ;;  %2074 = vmatmul.f32.gmra.mxu0 %v1995_v31  ;;  %7859 = vst [vmem:[#allocation25_spill] sm:$0xff] %v5126_v57  ;;  %v1134_v21 = vrot.slane %v4847_v7, 6 }
 0x109   : > { %v811_v47 = vmax.f32 %v694_v29, 0.0 }
 0x10a   : > { %v5129_v58 = vmul.f32 %v4895_v38, %v845_v45 }
 0x10b   : > { %v5132_v59 = vmul.f32 %v5126_v57, %v811_v47  ;;  %v700_v57 = vadd.f32 %v4841_v2, %v699_v63 }
 0x10c   : > { %7860 = vst [vmem:[#allocation26_spill] sm:$0xff] %v5129_v58  ;;  %v7677_v4 = vrot.slane %v5129_v58, 7  ;;  %v7682_v22 = vrot.slane %v5129_v58, 6 }
 0x10d   : > { %1757 = vmatmul.f32.gmra.mxu3 %v5132_v59  ;;  %v1924_v29 = vrot.slane %v5132_v59, 1  ;;  %v1262_v31 = vrot.slane %v5132_v59, 7  ;;  %v1147_v37 = vrot.slane %v5132_v59, 6  ;;  %v2247_v6 = vrot.slane %v5132_v59, 2 }
 0x10e   : > { %v696_v45 = vpop.f32.mrf.mxu0  ;;  %v1345_v47 = vsel %vm1297_vm2, %v7677_v4, %v1249_v61  ;;  %v1232_v16 = vsel %vm1184_vm3, %v7682_v22, %v1134_v21  ;;  %v5162_v22 = vpop.f32.mrf.mxu2  ;;  %v1141_v59 = vrot.slane %v4978_v27, 6 }
 0x10f   : > { %v697_v28 = vadd.f32 %v4841_v2, %v696_v45  ;;  %1379 = vmatmul.f32.vlgmr.msrb.gmra.mxu1 %v1345_v47  ;;  %1540 = vmatmul.f32.vlgmr.msrb.gmra.mxu2 %v1232_v16  ;;  %v1994_v14 = vsel %vm1959_vm1, %v1923_v11, %v1924_v29  ;;  %v5155_v38 = vsel %vm1297_vm2, %v1261_v18, %v1262_v31  ;;  %v5164_v45 = vpop.permute.xlu0 %918  ;;  %v1250_v16 = vrot.slane %v4858_v15, 7 }
 0x110   : > { %2077 = vmatmul.f32.gmra.mxu0 %v1994_v14  ;;  %v5159_v4 = vsel %vm1184_vm3, %v1146_v20, %v1147_v37  ;;  %7861 = vst [vmem:[#allocation27_spill] sm:$0xff] %v5164_v45  ;;  %v1135_v11 = vrot.slane %v4858_v15, 6  ;;  %v813_v18 = vmax.f32 %v700_v57, 0.0 }
 0x111   : > { %v812_v62 = vmax.f32 %v697_v28, 0.0  ;;  %v705_v28 = vpop.f32.mrf.mxu1  ;;  %v1344_v50 = vsel %vm1297_vm2, %v1249_v61, %v1250_v16 }
 0x112   : > { %v1231_v35 = vsel %vm1184_vm3, %v1134_v21, %v1135_v11  ;;  %v1251_v21 = vrot.slane %v4874_v24, 7 }
 0x113   : > { %v5169_v47 = vmul.f32 %v5164_v45, %v812_v62  ;;  %v5187_v45 = vpop.permute.xlu1 %923 }
 0x114   : > { %7862 = vst [vmem:[#allocation28_spill] sm:$0xff] %v5187_v45 }
 0x115   : > { %1760 = vmatmul.f32.gmra.mxu3 %v5169_v47  ;;  %v1925_v14 = vrot.slane %v5169_v47, 1  ;;  %v7689_v20 = vrot.slane %v5169_v47, 7  ;;  %v7690_v63 = vrot.slane %v5169_v47, 6 }
 0x117   : > { %1382 = vmatmul.f32.gmra.mxu1 %v1344_v50  ;;  %1543 = vmatmul.f32.gmra.mxu2 %v1231_v35  ;;  %v1993_v62 = vsel %vm1959_vm1, %v1924_v29, %v1925_v14  ;;  %v5185_v57 = vsel %vm1297_vm2, %v1262_v31, %v7689_v20  ;;  %v5193_v61 = vsel %vm1184_vm3, %v1147_v37, %v7690_v63  ;;  %v1136_v29 = vrot.slane %v4874_v24, 6  ;;  %v5201_v31 = vpop.f32.mrf.mxu2  ;;  %v5226_v48 = vpop.permute.xlu0 %933 }
 0x118   : > { %2080 = vmatmul.f32.gmra.mxu0 %v1993_v62  ;;  %v5196_v35 = vmul.f32 %v5187_v45, %v813_v18  ;;  %v703_v50 = vadd.f32 %v4841_v2, %v702_v60  ;;  %v1343_v37 = vsel %vm1297_vm2, %v1250_v16, %v1251_v21  ;;  %v706_v63 = vadd.f32 %v4841_v2, %v705_v28  ;;  %v5215_v45 = vpop.permute.xlu2 %928 }
 0x119   : > { %v1230_v18 = vsel %vm1184_vm3, %v1135_v11, %v1136_v29  ;;  %7863 = vst [vmem:[#allocation29_spill] sm:$0xff] %v5215_v45  ;;  %v708_v5 = vpop.f32.mrf.mxu1  ;;  %v1252_v11 = vrot.slane %v4886_v32, 7  ;;  %v1137_v28 = vrot.slane %v4886_v32, 6 }
 0x11a   : > { %v814_v20 = vmax.f32 %v703_v50, 0.0  ;;  %v1926_v62 = vrot.slane %v5196_v35, 1  ;;  %v4116_v50 = vld [vmem:[%s7665_s4 + $0x268] sm:$0xff]  ;;  %7864 = vst [vmem:[#allocation30_spill] sm:$0xff] %v5226_v48 }
 0x11b   : > { %2350 = vmatpush.msra.mxu1 %v4116_v50 }
 0x11c   : > { %v1992_v60 = vsel %vm1959_vm1, %v1925_v14, %v1926_v62  ;;  %v5218_v16 = vmul.f32 %v5215_v45, %v814_v20  ;;  %v1229_v20 = vsel %vm1184_vm3, %v1136_v29, %v1137_v28  ;;  %v709_v45 = vadd.f32 %v4841_v2, %v708_v5  ;;  %v5242_v29 = vpop.permute.xlu1 %938 }
 0x11d   : > { %1763 = vmatmul.f32.gmra.mxu3 %v5196_v35  ;;  %7865 = vst [vmem:[#allocation31_spill] sm:$0xff] %v5242_v29 }
 0x11e   : > { %v1927_v14 = vrot.slane %v5218_v16, 1  ;;  %v816_v0 = vmax.f32 %v709_v45, 0.0 }
 0x11f   : > { %1385 = vmatmul.f32.gmra.mxu1 %v1343_v37  ;;  %1546 = vmatmul.f32.gmra.mxu2 %v1230_v18  ;;  %v815_v37 = vmax.f32 %v706_v63, 0.0  ;;  %v5224_v18 = vpop.f32.mrf.mxu2 }
 0x120   : > { %2083 = vmatmul.f32.gmra.mxu0 %v1992_v60  ;;  %v1342_v60 = vsel %vm1297_vm2, %v1251_v21, %v1252_v11  ;;  %v1991_v63 = vsel %vm1959_vm1, %v1926_v62, %v1927_v14  ;;  %v1253_v21 = vrot.slane %v4900_v41, 7  ;;  %v5249_v62 = vmul.f32 %v5242_v29, %v816_v0 }
 0x121   : > { %v5233_v50 = vmul.f32 %v5226_v48, %v815_v37  ;;  %v711_v26 = vpop.f32.mrf.mxu1  ;;  %v1228_v37 = vsel %vm1184_vm3, %v1137_v28, %v1138_v40 }
 0x122   : > { %v1341_v5 = vsel %vm1297_vm2, %v1252_v11, %v1253_v21  ;;  %7866 = vst [vmem:[#allocation32_spill] sm:$0xff] %v5249_v62  ;;  %v1139_v11 = vrot.slane %v4921_v52, 6  ;;  %v1929_v48 = vrot.slane %v5249_v62, 1 }
 0x123   : > { %v1928_v51 = vrot.slane %v5233_v50, 1 }
 0x125   : > { %1766 = vmatmul.f32.gmra.mxu3 %v5218_v16  ;;  %v1990_v45 = vsel %vm1959_vm1, %v1927_v14, %v1928_v51  ;;  %v1227_v14 = vsel %vm1184_vm3, %v1138_v40, %v1139_v11  ;;  %v5276_v40 = vpop.permute.xlu2 %943 }
 0x126   : > { %7868 = vst [vmem:[#allocation34_spill] sm:$0xff] %v5276_v40 }
 0x127   : > { %1388 = vmatmul.f32.gmra.mxu1 %v1342_v60  ;;  %1549 = vmatmul.f32.gmra.mxu2 %v1229_v20  ;;  %v5253_v60 = vpop.f32.mrf.mxu2  ;;  %v712_v20 = vadd.f32 %v4841_v2, %v711_v26  ;;  %v2245_v26 = vrot.slane %v5083_v53, 2 }
 0x128   : > { %2086 = vmatmul.f32.gmra.mxu0 %v1991_v63  ;;  %v1254_v63 = vrot.slane %v4921_v52, 7  ;;  %v5268_v29 = vpop.f32.mrf.mxu3 }
 0x129   : > { %v714_v28 = vpop.f32.mrf.mxu1  ;;  %v817_v30 = vmax.f32 %v712_v20, 0.0  ;;  %7867 = vst [vmem:[#allocation33_spill] sm:$0xff] %v5268_v29  ;;  %v1989_v20 = vsel %vm1959_vm1, %v1928_v51, %v1929_v48 }
 0x12a   : > { %v1340_v0 = vsel %vm1297_vm2, %v1253_v21, %v1254_v63  ;;  %v4115_v21 = vld [vmem:[%s7665_s4 + $0x260] sm:$0xff] }
 0x12b   : > { %2351 = vmatpush.msra.mxu1 %v4115_v21  ;;  %v5289_v51 = vmul.f32 %v5276_v40, %v817_v30  ;;  %v718_v40 = vadd.f32 %v4841_v2, %v5118_v43  ;;  %v2248_v43 = vrot.slane %v5169_v47, 2 }
 0x12d   : > { %1769 = vmatmul.f32.gmra.mxu3 %v5233_v50  ;;  %7871 = vst [vmem:[#allocation37_spill] sm:$0xff] %v5289_v51  ;;  %v1930_v23 = vrot.slane %v5289_v51, 1 }
 0x12f   : > { %1391 = vmatmul.f32.gmra.mxu1 %v1341_v5  ;;  %1552 = vmatmul.f32.gmra.mxu2 %v1228_v37  ;;  %v7715_v5 = vrot.slane %v5068_v36, 2  ;;  %v2246_v37 = vrot.slane %v5095_v3, 2 }
 0x130   : > { %2089 = vmatmul.f32.gmra.mxu0 %v1990_v45  ;;  %v715_v45 = vadd.f32 %v4841_v2, %v714_v28  ;;  %v5311_v29 = vpop.f32.mrf.mxu3 }
 0x131   : > { %v5282_v3 = vsel %vm2282_vm4, %v7715_v5, %v2245_v26  ;;  %v5286_v28 = vsel %vm2282_vm4, %v2245_v26, %v2246_v37  ;;  %v5297_v5 = vpop.permute.xlu0 %948  ;;  %7873 = vst [vmem:[#allocation39_spill] sm:$0xff] %v5311_v29 }
 0x132   : > { %7869 = vst [vmem:[#allocation35_spill] sm:$0xff] %v5282_v3  ;;  %v818_v21 = vmax.f32 %v715_v45, 0.0  ;;  %v1988_v45 = vsel %vm1959_vm1, %v1929_v48, %v1930_v23  ;;  %v1256_v48 = vrot.slane %v4978_v27, 7 }
 0x133   : > { %7870 = vst [vmem:[#allocation36_spill] sm:$0xff] %v5286_v28  ;;  %v730_v28 = vadd.f32 %v4841_v2, %v5253_v60 }
 0x134   : > { %7872 = vst [vmem:[#allocation38_spill] sm:$0xff] %v5297_v5  ;;  %v5306_v12 = vmul.f32 %v5297_v5, %v818_v21  ;;  %v7724_v21 = vrot.slane %v5196_v35, 2 }
 0x135   : > { %1772 = vmatmul.f32.gmra.mxu3 %v5249_v62  ;;  %v823_v3 = vmax.f32 %v730_v28, 0.0 }
 0x137   : > { %1394 = vmatmul.f32.gmra.mxu1 %v1340_v0  ;;  %1555 = vmatmul.f32.gmra.mxu2 %v1227_v14  ;;  %v5291_v0 = vpop.f32.mrf.mxu2  ;;  %v1255_v14 = vrot.slane %v4948_v1, 7 }
 0x138   : > { %2092 = vmatmul.f32.gmra.mxu0 %v1989_v20  ;;  %v1140_v20 = vrot.slane %v4948_v1, 6  ;;  %v733_v60 = vadd.f32 %v4841_v2, %v5291_v0 }
 0x139   : > { %v1339_v26 = vsel %vm1297_vm2, %v1254_v63, %v1255_v14  ;;  %v5313_v63 = vpop.f32.mrf.mxu0  ;;  %v1338_v29 = vsel %vm1297_vm2, %v1255_v14, %v1256_v48  ;;  %v5352_v14 = vpop.f32.mrf.mxu3 }
 0x13a   : > { %v1226_v30 = vsel %vm1184_vm3, %v1139_v11, %v1140_v20  ;;  %7874 = vst [vmem:[#allocation40_spill] sm:$0xff] %v5313_v63  ;;  %v5317_v11 = vsel %vm2282_vm4, %v2246_v37, %v2247_v6  ;;  %v5334_v37 = vsel %vm2282_vm4, %v2248_v43, %v7724_v21  ;;  %v1225_v63 = vsel %vm1184_vm3, %v1140_v20, %v1141_v59 }
 0x13b   : > { %7875 = vst [vmem:[#allocation41_spill] sm:$0xff] %v5317_v11  ;;  %v1257_v21 = vrot.slane %v5011_v49, 7  ;;  %v824_v0 = vmax.f32 %v733_v60, 0.0 }
 0x13c   : > { %7877 = vst [vmem:[#allocation43_spill] sm:$0xff] %v5334_v37  ;;  %v1142_v37 = vrot.slane %v5011_v49, 6 }
 0x13d   : > { %1775 = vmatmul.f32.gmra.mxu3 %v5289_v51  ;;  %7880 = vst [vmem:[#allocation46_spill] sm:$0xff] %v5352_v14  ;;  %v7731_v14 = vrot.slane %v4847_v7, 2 }
 0x13f   : > { %1397 = vmatmul.f32.gmra.mxu1 %v1339_v26  ;;  %1558 = vmatmul.f32.gmra.mxu2 %v1226_v30  ;;  %v819_v26 = vmax.f32 %v718_v40, 0.0  ;;  %v1931_v30 = vrot.slane %v5306_v12, 1  ;;  %v5322_v5 = vpop.f32.mrf.mxu2  ;;  %v5337_v40 = vpop.permute.xlu1 %953 }
 0x140   : > { %2095 = vmatmul.f32.gmra.mxu0 %v1988_v45  ;;  %v5328_v45 = vsel %vm2282_vm4, %v2247_v6, %v2248_v43  ;;  %7878 = vst [vmem:[#allocation44_spill] sm:$0xff] %v5337_v40  ;;  %v721_v43 = vadd.f32 %v4841_v2, %v5162_v22  ;;  %v1224_v22 = vsel %vm1184_vm3, %v1141_v59, %v1142_v37  ;;  %v1258_v59 = vrot.slane %v5044_v10, 7 }
 0x141   : > { %7876 = vst [vmem:[#allocation42_spill] sm:$0xff] %v5328_v45  ;;  %v5344_v11 = vmul.f32 %v5337_v40, %v819_v26  ;;  %v1987_v6 = vsel %vm1959_vm1, %v1930_v23, %v1931_v30  ;;  %v5355_v45 = vpop.f32.mrf.mxu0  ;;  %v1337_v23 = vsel %vm1297_vm2, %v1256_v48, %v1257_v21  ;;  %v5371_v40 = vpop.permute.xlu2 %958 }
 0x142   : > { %7881 = vst [vmem:[#allocation47_spill] sm:$0xff] %v5355_v45  ;;  %v820_v26 = vmax.f32 %v721_v43, 0.0  ;;  %v4114_v43 = vld [vmem:[%s7665_s4 + $0x258] sm:$0xff] }
 0x143   : > { %7879 = vst [vmem:[#allocation45_spill] sm:$0xff] %v5344_v11  ;;  %v1932_v20 = vrot.slane %v5344_v11, 1  ;;  %2352 = vmatpush.msra.mxu1 %v4114_v43 }
 0x144   : > { %7882 = vst [vmem:[#allocation48_spill] sm:$0xff] %v5371_v40  ;;  %v5374_v48 = vmul.f32 %v5371_v40, %v820_v26  ;;  %v5386_v26 = vpop.permute.xlu0 %963 }
 0x145   : > { %1778 = vmatmul.f32.gmra.mxu3 %v5306_v12  ;;  %7884 = vst [vmem:[#allocation50_spill] sm:$0xff] %v5386_v26 }
 0x147   : > { %1400 = vmatmul.f32.gmra.mxu1 %v1338_v29  ;;  %1561 = vmatmul.f32.gmra.mxu2 %v1225_v63  ;;  %v5358_v29 = vpop.f32.mrf.mxu2  ;;  %v724_v63 = vadd.f32 %v4841_v2, %v5201_v31  ;;  %v1143_v31 = vrot.slane %v5044_v10, 6 }
 0x148   : > { %2098 = vmatmul.f32.gmra.mxu0 %v1987_v6  ;;  %v1986_v6 = vsel %vm1959_vm1, %v1931_v30, %v1932_v20  ;;  %v1933_v30 = vrot.slane %v5374_v48, 1 }
 0x149   : > { %v5388_v43 = vpop.f32.mrf.mxu0  ;;  %v1223_v40 = vsel %vm1184_vm3, %v1142_v37, %v1143_v31 }
 0x14a   : > { %7885 = vst [vmem:[#allocation51_spill] sm:$0xff] %v5388_v43  ;;  %v1985_v45 = vsel %vm1959_vm1, %v1932_v20, %v1933_v30  ;;  %v5413_v20 = vpop.permute.xlu1 %968 }
 0x14b   : > { %7889 = vst [vmem:[#allocation54_spill] sm:$0xff] %v5413_v20 }
 0x14d   : > { %1781 = vmatmul.f32.gmra.mxu3 %v5344_v11 }
 0x14f   : > { %1403 = vmatmul.f32.gmra.mxu1 %v1337_v23  ;;  %1564 = vmatmul.f32.gmra.mxu2 %v1224_v22  ;;  %v821_v23 = vmax.f32 %v724_v63, 0.0  ;;  %v5378_v22 = vpop.f32.mrf.mxu3  ;;  %v1336_v63 = vsel %vm1297_vm2, %v1257_v21, %v1258_v59  ;;  %v5407_v21 = vpop.f32.mrf.mxu2 }
 0x150   : > { %2101 = vmatmul.f32.gmra.mxu0 %v1986_v6  ;;  %7883 = vst [vmem:[#allocation49_spill] sm:$0xff] %v5378_v22  ;;  %v727_v6 = vadd.f32 %v4841_v2, %v5224_v18  ;;  %v7887_v18 = vrot.slane %v5129_v58, 2 }
 0x151   : > { %v5395_v22 = vmul.f32 %v5386_v26, %v821_v23 }
 0x152   : > { %v5405_v43 = vsel %vm2282_vm4, %v7887_v18, %v7731_v14  ;;  %v822_v37 = vmax.f32 %v727_v6, 0.0 }
 0x153   : > { %7886 = vst [vmem:[#allocation52_spill] sm:$0xff] %v5395_v22  ;;  %v1934_v23 = vrot.slane %v5395_v22, 1 }
 0x154   : > { %7888 = vst [vmem:[#allocation53_spill] sm:$0xff] %v5405_v43  ;;  %v5420_v14 = vmul.f32 %v5413_v20, %v822_v37  ;;  %v5426_v43 = vpop.f32.mrf.mxu0  ;;  %v7892_v37 = vrot.slane %v5083_v53, 7  ;;  %v5449_v20 = vpop.permute.xlu2 %973 }
 0x155   : > { %1784 = vmatmul.f32.gmra.mxu3 %v5374_v48  ;;  %v1984_v6 = vsel %vm1959_vm1, %v1933_v30, %v1934_v23  ;;  %7891 = vst [vmem:[#allocation56_spill] sm:$0xff] %v5426_v43  ;;  %v7893_v30 = vrot.slane %v5083_v53, 6  ;;  %v5452_v53 = vmul.f32 %v5449_v20, %v823_v3 }
 0x156   : > { %7894 = vst [vmem:[#allocation57_spill] sm:$0xff] %v5449_v20 }
 0x157   : > { %1406 = vmatmul.f32.gmra.mxu1 %v1336_v63  ;;  %1567 = vmatmul.f32.gmra.mxu2 %v1223_v40  ;;  %v1259_v63 = vrot.slane %v5068_v36, 7  ;;  %v1144_v40 = vrot.slane %v5068_v36, 6  ;;  %7895 = vst [vmem:[#allocation58_spill] sm:$0xff] %v5452_v53 }
 0x158   : > { %2104 = vmatmul.f32.gmra.mxu0 %v1985_v45  ;;  %v5422_v45 = vpop.f32.mrf.mxu3 }
 0x159   : > { %v1335_v26 = vsel %vm1297_vm2, %v1258_v59, %v1259_v63  ;;  %v1222_v18 = vsel %vm1184_vm3, %v1143_v31, %v1144_v40  ;;  %7890 = vst [vmem:[#allocation55_spill] sm:$0xff] %v5422_v45  ;;  %v5430_v59 = vpop.f32.mrf.mxu2  ;;  %v1935_v31 = vrot.slane %v5420_v14, 1 }
 0x15b   : > { %v1983_v28 = vsel %vm1959_vm1, %v1934_v23, %v1935_v31  ;;  %v1936_v23 = vrot.slane %v5452_v53, 1 }
 0x15d   : > { %1787 = vmatmul.f32.gmra.mxu3 %v5395_v22  ;;  %v1982_v3 = vsel %vm1959_vm1, %v1935_v31, %v1936_v23  ;;  %v739_v31 = vadd.f32 %v4841_v2, %v5358_v29  ;;  %v4112_v29 = vld [vmem:[%s7665_s4 + $0x248] sm:$0xff] }
 0x15f   : > { %1409 = vmatmul.f32.gmra.mxu1 %v1335_v26  ;;  %1570 = vmatmul.f32.gmra.mxu2 %v1222_v18  ;;  %v1334_v26 = vsel %vm1297_vm2, %v1259_v63, %v7892_v37  ;;  %v1221_v18 = vsel %vm1184_vm3, %v1144_v40, %v7893_v30  ;;  %v5456_v40 = vpop.f32.mrf.mxu0  ;;  %v736_v30 = vadd.f32 %v4841_v2, %v5322_v5  ;;  %v5479_v5 = vpop.permute.xlu1 %983 }
 0x160   : > { %2107 = vmatmul.f32.gmra.mxu0 %v1984_v6  ;;  %v4113_v6 = vld [vmem:[%s7665_s4 + $0x250] sm:$0xff]  ;;  %v5454_v63 = vpop.f32.mrf.mxu3  ;;  %7897 = vst [vmem:[#allocation60_spill] sm:$0xff] %v5456_v40 }
 0x161   : > { %2353 = vmatpush.msra.mxu1 %v4113_v6  ;;  %7896 = vst [vmem:[#allocation59_spill] sm:$0xff] %v5454_v63  ;;  %v5458_v37 = vpop.f32.mrf.mxu2  ;;  %v825_v60 = vmax.f32 %v736_v30, 0.0  ;;  %v1267_v63 = vrot.slane %v5249_v62, 7 }
 0x162   : > { %7902 = vst [vmem:[#allocation65_spill] sm:$0xff] %v5479_v5 }
 0x163   : > { %2354 = vmatpush.msra.mxu1 %v4112_v29  ;;  %v7910_v29 = vrot.slane %v5169_v47, 6 }
 0x165   : > { %1790 = vmatmul.f32.gmra.mxu3 %v5420_v14 }
 0x167   : > { %1412 = vmatmul.f32.gmra.mxu1 %v1334_v26  ;;  %1573 = vmatmul.f32.gmra.mxu2 %v1221_v18  ;;  %v5462_v26 = vpop.permute.xlu0 %978  ;;  %v5476_v20 = vpop.f32.mrf.mxu0 }
 0x168   : > { %2110 = vmatmul.f32.gmra.mxu0 %v1983_v28  ;;  %7898 = vst [vmem:[#allocation61_spill] sm:$0xff] %v5462_v26  ;;  %v5467_v18 = vmul.f32 %v5462_v26, %v824_v0  ;;  %v5473_v28 = vpop.f32.mrf.mxu3 }
 0x169   : > { %7900 = vst [vmem:[#allocation63_spill] sm:$0xff] %v5473_v28  ;;  %v5481_v0 = vpop.f32.mrf.mxu2 }
 0x16a   : > { %7899 = vst [vmem:[#allocation62_spill] sm:$0xff] %v5467_v18  ;;  %v1937_v6 = vrot.slane %v5467_v18, 1 }
 0x16b   : > { %7901 = vst [vmem:[#allocation64_spill] sm:$0xff] %v5476_v20 }
 0x16d   : > { %1793 = vmatmul.f32.gmra.mxu3 %v5452_v53 }
 0x16f   : > { %1415 = vmatmul.f32.gmra.mxu1 %v5116_v42  ;;  %1576 = vmatmul.f32.gmra.mxu2 %v5124_v46  ;;  %v5484_v42 = vmul.f32 %v5479_v5, %v825_v60  ;;  %v1981_v46 = vsel %vm1959_vm1, %v1936_v23, %v1937_v6  ;;  %v5496_v60 = vpop.f32.mrf.mxu0  ;;  %v5507_v23 = vpop.permute.xlu2 %988 }
 0x170   : > { %2113 = vmatmul.f32.gmra.mxu0 %v1982_v3  ;;  %v826_v3 = vmax.f32 %v739_v31, 0.0  ;;  %v5493_v26 = vpop.f32.mrf.mxu3  ;;  %7905 = vst [vmem:[#allocation68_spill] sm:$0xff] %v5496_v60  ;;  %v5518_v5 = vpop.permute.xlu0 %993 }
 0x171   : > { %7903 = vst [vmem:[#allocation66_spill] sm:$0xff] %v5484_v42  ;;  %v1938_v30 = vrot.slane %v5484_v42, 1 }
 0x172   : > { %7904 = vst [vmem:[#allocation67_spill] sm:$0xff] %v5493_v26  ;;  %v5512_v31 = vmul.f32 %v5507_v23, %v826_v3  ;;  %v7909_v26 = vrot.slane %v5169_v47, 7 }
 0x173   : > { %7906 = vst [vmem:[#allocation69_spill] sm:$0xff] %v5507_v23  ;;  %v745_v23 = vadd.f32 %v4841_v2, %v5430_v59  ;;  %v5545_v59 = vpop.permute.xlu1 %998 }
 0x174   : > { %7907 = vst [vmem:[#allocation70_spill] sm:$0xff] %v5512_v31 }
 0x175   : > { %1796 = vmatmul.f32.gmra.mxu3 %v5467_v18  ;;  %7908 = vst [vmem:[#allocation71_spill] sm:$0xff] %v5518_v5 }
 0x176   : > { %7914 = vst [vmem:[#allocation75_spill] sm:$0xff] %v5545_v59 }
 0x177   : > { %1418 = vmatmul.f32.gmra.mxu1 %v5155_v38  ;;  %1579 = vmatmul.f32.gmra.mxu2 %v5159_v4  ;;  %v742_v38 = vadd.f32 %v4841_v2, %v5407_v21  ;;  %v1980_v4 = vsel %vm1959_vm1, %v1937_v6, %v1938_v30  ;;  %v1939_v6 = vrot.slane %v5512_v31, 1  ;;  %v5537_v20 = vpop.f32.mrf.mxu0  ;;  %v1150_v2 = vrot.slane %v5218_v16, 6 }
 0x178   : > { %2116 = vmatmul.f32.gmra.mxu0 %v1981_v46  ;;  %v5509_v46 = vpop.f32.mrf.mxu2  ;;  %v5533_v60 = vpop.f32.mrf.mxu3  ;;  %7913 = vst [vmem:[#allocation74_spill] sm:$0xff] %v5537_v20 }
 0x179   : > { %v827_v21 = vmax.f32 %v742_v38, 0.0  ;;  %7912 = vst [vmem:[#allocation73_spill] sm:$0xff] %v5533_v60  ;;  %v1979_v28 = vsel %vm1959_vm1, %v1938_v30, %v1939_v6 }
 0x17b   : > { %v5529_v38 = vmul.f32 %v5518_v5, %v827_v21  ;;  %v1265_v5 = vrot.slane %v5218_v16, 7 }
 0x17d   : > { %1799 = vmatmul.f32.gmra.mxu3 %v5484_v42  ;;  %7911 = vst [vmem:[#allocation72_spill] sm:$0xff] %v5529_v38 }
 0x17f   : > { %1421 = vmatmul.f32.gmra.mxu1 %v5185_v57  ;;  %1582 = vmatmul.f32.gmra.mxu2 %v5193_v61  ;;  %v1264_v57 = vrot.slane %v5196_v35, 7  ;;  %v1149_v61 = vrot.slane %v5196_v35, 6 }
 0x180   : > { %2119 = vmatmul.f32.gmra.mxu0 %v1980_v4  ;;  %v5539_v47 = vpop.f32.mrf.mxu2  ;;  %v5563_v60 = vpop.f32.mrf.mxu3 }
 0x181   : > { %v1330_v4 = vsel %vm1297_vm2, %v7909_v26, %v1264_v57  ;;  %v1217_v3 = vsel %vm1184_vm3, %v7910_v29, %v1149_v61  ;;  %v828_v26 = vmax.f32 %v745_v23, 0.0  ;;  %v1940_v29 = vrot.slane %v5529_v38, 1  ;;  %7916 = vst [vmem:[#allocation77_spill] sm:$0xff] %v5563_v60 }
 0x182   : > { %v1329_v30 = vsel %vm1297_vm2, %v1264_v57, %v1265_v5 }
 0x183   : > { %v1978_v23 = vsel %vm1959_vm1, %v1939_v6, %v1940_v29 }
 0x185   : > { %1802 = vmatmul.f32.gmra.mxu3 %v5512_v31 }
 0x187   : > { %1424 = vmatmul.f32.gmra.mxu1 %v1330_v4  ;;  %1585 = vmatmul.f32.gmra.mxu2 %v1217_v3  ;;  %v5552_v4 = vmul.f32 %v5545_v59, %v828_v26  ;;  %v5559_v3 = vld [vmem:[%s7664_s3] ss:$0 sm:$0xff] }
 0x188   : > { %2122 = vmatmul.f32.gmra.mxu0 %v1979_v28  ;;  %v1216_v28 = vsel %vm1184_vm3, %v1149_v61, %v1150_v2  ;;  %v748_v57 = vadd.f32 %v5559_v3, %v5458_v37  ;;  %v5565_v61 = vpop.f32.mrf.mxu0 }
 0x189   : > { %7915 = vst [vmem:[#allocation76_spill] sm:$0xff] %v5552_v4  ;;  %v1941_v6 = vrot.slane %v5552_v4, 1 }
 0x18a   : > { %7917 = vst [vmem:[#allocation78_spill] sm:$0xff] %v5565_v61  ;;  %v829_v20 = vmax.f32 %v748_v57, 0.0  ;;  %v751_v61 = vadd.f32 %v5559_v3, %v5481_v0  ;;  %v4111_v57 = vld [vmem:[%s7665_s4 + $0x240] sm:$0xff]  ;;  %v1152_v0 = vrot.slane %v5249_v62, 6 }
 0x18b   : > { %2355 = vmatpush.msra.mxu1 %v4111_v57  ;;  %v5599_v57 = vpop.permute.xlu0 %1008 }
 0x18c   : > { %v1380_v21 = vpop.f32.mrf.mxu1  ;;  %7922 = vst [vmem:[#allocation83_spill] sm:$0xff] %v5599_v57 }
 0x18d   : > { %1805 = vmatmul.f32.gmra.mxu3 %v5529_v38 }
 0x18f   : > { %1427 = vmatmul.f32.gmra.mxu1 %v1329_v30  ;;  %1588 = vmatmul.f32.gmra.mxu2 %v1216_v28  ;;  %v1266_v30 = vrot.slane %v5233_v50, 7  ;;  %v1151_v28 = vrot.slane %v5233_v50, 6 }
 0x190   : > { %2125 = vmatmul.f32.gmra.mxu0 %v1978_v23  ;;  %v5595_v40 = vpop.f32.mrf.mxu0 }
 0x191   : > { %v1328_v37 = vsel %vm1297_vm2, %v1265_v5, %v1266_v30  ;;  %v1215_v60 = vsel %vm1184_vm3, %v1150_v2, %v1151_v28  ;;  %7921 = vst [vmem:[#allocation82_spill] sm:$0xff] %v5595_v40 }
 0x192   : > { %v1541_v26 = vpop.f32.mrf.mxu2 }
 0x193   : > { %v5569_v59 = vadd.f32 %v1541_v26, %v1380_v21  ;;  %v1977_v21 = vsel %vm1959_vm1, %v1940_v29, %v1941_v6  ;;  %v5584_v26 = vpop.permute.xlu2 %1003 }
 0x194   : > { %v1383_v23 = vpop.f32.mrf.mxu1  ;;  %7918 = vst [vmem:[#allocation79_spill] sm:$0xff] %v5584_v26  ;;  %v5587_v5 = vmul.f32 %v5584_v26, %v829_v20  ;;  %v1327_v20 = vsel %vm1297_vm2, %v1266_v30, %v1267_v63  ;;  %v1214_v26 = vsel %vm1184_vm3, %v1151_v28, %v1152_v0  ;;  %v1268_v28 = vrot.slane %v5289_v51, 7 }
 0x195   : > { %1808 = vmatmul.f32.gmra.mxu3 %v5552_v4 }
 0x196   : > { %7919 = vst [vmem:[#allocation80_spill] sm:$0xff] %v5587_v5 }
 0x197   : > { %1430 = vmatmul.f32.gmra.mxu1 %v1328_v37  ;;  %1591 = vmatmul.f32.gmra.mxu2 %v1215_v60  ;;  %v830_v60 = vmax.f32 %v751_v61, 0.0  ;;  %v5591_v37 = vpop.f32.mrf.mxu3 }
 0x198   : > { %2128 = vmatmul.f32.gmra.mxu0 %v1977_v21  ;;  %7920 = vst [vmem:[#allocation81_spill] sm:$0xff] %v5591_v37  ;;  %v1942_v21 = vrot.slane %v5587_v5, 1 }
 0x199   : > { %v5606_v61 = vmul.f32 %v5599_v57, %v830_v60  ;;  %v1153_v60 = vrot.slane %v5289_v51, 6 }
 0x19a   : > { %v1544_v2 = vpop.f32.mrf.mxu2 }
 0x19b   : > { %v5593_v29 = vadd.f32 %v1544_v2, %v1383_v23  ;;  %v754_v23 = vadd.f32 %v5559_v3, %v5509_v46  ;;  %v1976_v2 = vsel %vm1959_vm1, %v1941_v6, %v1942_v21  ;;  %v1943_v30 = vrot.slane %v5606_v61, 1  ;;  %v5620_v46 = vpop.permute.xlu1 %1013 }
 0x19c   : > { %v1386_v45 = vpop.f32.mrf.mxu1  ;;  %7924 = vst [vmem:[#allocation85_spill] sm:$0xff] %v5620_v46  ;;  %v1326_v6 = vsel %vm1297_vm2, %v1267_v63, %v1268_v28  ;;  %v1154_v63 = vrot.slane %v5306_v12, 6 }
 0x19d   : > { %1811 = vmatmul.f32.gmra.mxu3 %v5587_v5  ;;  %v831_v40 = vmax.f32 %v754_v23, 0.0  ;;  %v1975_v23 = vsel %vm1959_vm1, %v1942_v21, %v1943_v30 }
 0x19e   : > { %v1212_v21 = vsel %vm1184_vm3, %v1153_v60, %v1154_v63 }
 0x19f   : > { %1433 = vmatmul.f32.gmra.mxu1 %v1327_v20  ;;  %1594 = vmatmul.f32.gmra.mxu2 %v1214_v26  ;;  %v5617_v57 = vpop.f32.mrf.mxu3  ;;  %v5622_v26 = vpop.f32.mrf.mxu0  ;;  %v757_v20 = vadd.f32 %v5559_v3, %v5539_v47 }
 0x1a0   : > { %2131 = vmatmul.f32.gmra.mxu0 %v1976_v2  ;;  %7923 = vst [vmem:[#allocation84_spill] sm:$0xff] %v5617_v57  ;;  %v1269_v57 = vrot.slane %v5306_v12, 7  ;;  %v5641_v47 = vpop.permute.xlu2 %1018 }
 0x1a1   : > { %7925 = vst [vmem:[#allocation86_spill] sm:$0xff] %v5622_v26  ;;  %v832_v26 = vmax.f32 %v757_v20, 0.0  ;;  %v4110_v20 = vld [vmem:[%s7665_s4 + $0x238] sm:$0xff] }
 0x1a2   : > { %v1547_v37 = vpop.f32.mrf.mxu2  ;;  %7927 = vst [vmem:[#allocation88_spill] sm:$0xff] %v5641_v47  ;;  %2356 = vmatpush.msra.mxu1 %v4110_v20 }
 0x1a3   : > { %v5612_v43 = vadd.f32 %v1547_v37, %v1386_v45  ;;  %v1213_v45 = vsel %vm1184_vm3, %v1152_v0, %v1153_v60  ;;  %v5629_v37 = vmul.f32 %v5620_v46, %v831_v40  ;;  %v1270_v60 = vrot.slane %v5344_v11, 7  ;;  %v5667_v46 = vpop.permute.xlu0 %1023 }
 0x1a4   : > { %v1389_v62 = vpop.f32.mrf.mxu1  ;;  %7931 = vst [vmem:[#allocation92_spill] sm:$0xff] %v5667_v46 }
 0x1a5   : > { %1814 = vmatmul.f32.gmra.mxu3 %v5606_v61  ;;  %7926 = vst [vmem:[#allocation87_spill] sm:$0xff] %v5629_v37  ;;  %v1944_v40 = vrot.slane %v5629_v37, 1 }
 0x1a7   : > { %1436 = vmatmul.f32.gmra.mxu1 %v1326_v6  ;;  %1597 = vmatmul.f32.gmra.mxu2 %v1213_v45  ;;  %v1325_v6 = vsel %vm1297_vm2, %v1268_v28, %v1269_v57  ;;  %v5648_v45 = vmul.f32 %v5641_v47, %v832_v26  ;;  %v1155_v26 = vrot.slane %v5344_v11, 6 }
 0x1a8   : > { %2134 = vmatmul.f32.gmra.mxu0 %v1975_v23  ;;  %v5650_v23 = vpop.f32.mrf.mxu3 }
 0x1a9   : > { %7928 = vst [vmem:[#allocation89_spill] sm:$0xff] %v5650_v23  ;;  %v1211_v20 = vsel %vm1184_vm3, %v1154_v63, %v1155_v26  ;;  %v5686_v63 = vpop.permute.xlu1 %1028 }
 0x1aa   : > { %v1550_v2 = vpop.f32.mrf.mxu2  ;;  %7935 = vst [vmem:[#allocation96_spill] sm:$0xff] %v5686_v63 }
 0x1ab   : > { %v5637_v51 = vadd.f32 %v1550_v2, %v1389_v62  ;;  %v1974_v62 = vsel %vm1959_vm1, %v1943_v30, %v1944_v40  ;;  %v5657_v2 = vpop.f32.mrf.mxu0  ;;  %v1945_v30 = vrot.slane %v5648_v45, 1 }
 0x1ac   : > { %v1392_v0 = vpop.f32.mrf.mxu1  ;;  %7929 = vst [vmem:[#allocation90_spill] sm:$0xff] %v5657_v2 }
 0x1ad   : > { %1817 = vmatmul.f32.gmra.mxu3 %v5629_v37 }
 0x1af   : > { %1439 = vmatmul.f32.gmra.mxu1 %v1325_v6  ;;  %1600 = vmatmul.f32.gmra.mxu2 %v1212_v21  ;;  %v760_v6 = vadd.f32 %v5559_v3, %v4849_v9  ;;  %v1973_v9 = vsel %vm1959_vm1, %v1944_v40, %v1945_v30  ;;  %v1156_v40 = vrot.slane %v5374_v48, 6 }
 0x1b0   : > { %2137 = vmatmul.f32.gmra.mxu0 %v1974_v62  ;;  %v1324_v62 = vsel %vm1297_vm2, %v1269_v57, %v1270_v60  ;;  %v5680_v2 = vpop.f32.mrf.mxu3 }
 0x1b1   : > { %v833_v23 = vmax.f32 %v760_v6, 0.0  ;;  %7933 = vst [vmem:[#allocation94_spill] sm:$0xff] %v5680_v2  ;;  %v1157_v2 = vrot.slane %v5395_v22, 6 }
 0x1b2   : > { %v1553_v28 = vpop.f32.mrf.mxu2 }
 0x1b3   : > { %v5663_v21 = vadd.f32 %v1553_v28, %v1392_v0  ;;  %v763_v0 = vadd.f32 %v5559_v3, %v4862_v17  ;;  %v5678_v28 = vmul.f32 %v5667_v46, %v833_v23  ;;  %v5682_v11 = vpop.f32.mrf.mxu0  ;;  %v1272_v46 = vrot.slane %v5395_v22, 7 }
 0x1b4   : > { %v1395_v47 = vpop.f32.mrf.mxu1  ;;  %7934 = vst [vmem:[#allocation95_spill] sm:$0xff] %v5682_v11 }
 0x1b5   : > { %7930 = vst [vmem:[#allocation91_spill] sm:$0xff] %v5663_v21  ;;  %1820 = vmatmul.f32.gmra.mxu3 %v5648_v45  ;;  %v1946_v17 = vrot.slane %v5678_v28, 1 }
 0x1b6   : > { %7932 = vst [vmem:[#allocation93_spill] sm:$0xff] %v5678_v28 }
 0x1b7   : > { %1442 = vmatmul.f32.gmra.mxu1 %v1324_v62  ;;  %1603 = vmatmul.f32.gmra.mxu2 %v1211_v20  ;;  %v1271_v62 = vrot.slane %v5374_v48, 7  ;;  %v834_v20 = vmax.f32 %v763_v0, 0.0 }
 0x1b8   : > { %2140 = vmatmul.f32.gmra.mxu0 %v1973_v9  ;;  %v1210_v9 = vsel %vm1184_vm3, %v1155_v26, %v1156_v40  ;;  %v5705_v11 = vpop.f32.mrf.mxu3 }
 0x1b9   : > { %v1323_v23 = vsel %vm1297_vm2, %v1270_v60, %v1271_v62  ;;  %v766_v60 = vadd.f32 %v5559_v3, %v4876_v25  ;;  %7936 = vst [vmem:[#allocation97_spill] sm:$0xff] %v5705_v11  ;;  %v769_v11 = vadd.f32 %v5559_v3, %v4888_v33 }
 0x1ba   : > { %v1556_v57 = vpop.f32.mrf.mxu2 }
 0x1bb   : > { %v5684_v21 = vadd.f32 %v1556_v57, %v1395_v47  ;;  %v5697_v47 = vmul.f32 %v5686_v63, %v834_v20  ;;  %v1972_v57 = vsel %vm1959_vm1, %v1945_v30, %v1946_v17  ;;  %v5713_v30 = vpop.permute.xlu2 %1033  ;;  %v1209_v63 = vsel %vm1184_vm3, %v1156_v40, %v1157_v2 }
 0x1bc   : > { %v1398_v6 = vpop.f32.mrf.mxu1  ;;  %7939 = vst [vmem:[#allocation100_spill] sm:$0xff] %v5713_v30  ;;  %v835_v25 = vmax.f32 %v766_v60, 0.0  ;;  %v1273_v40 = vrot.slane %v5420_v14, 7  ;;  %v836_v22 = vmax.f32 %v769_v11, 0.0 }
 0x1bd   : > { %1823 = vmatmul.f32.gmra.mxu3 %v5678_v28  ;;  %v1947_v20 = vrot.slane %v5697_v47, 1 }
 0x1bf   : > { %1445 = vmatmul.f32.gmra.mxu1 %v1323_v23  ;;  %1606 = vmatmul.f32.gmra.mxu2 %v1210_v9  ;;  %v5710_v23 = vpop.f32.mrf.mxu0 }
 0x1c0   : > { %2143 = vmatmul.f32.gmra.mxu0 %v1972_v57  ;;  %7938 = vst [vmem:[#allocation99_spill] sm:$0xff] %v5710_v23  ;;  %v1322_v57 = vsel %vm1297_vm2, %v1271_v62, %v1272_v46  ;;  %v5727_v62 = vmul.f32 %v5713_v30, %v835_v25  ;;  %v1321_v25 = vsel %vm1297_vm2, %v1272_v46, %v1273_v40 }
 0x1c2   : > { %v1559_v0 = vpop.f32.mrf.mxu2  ;;  %7940 = vst [vmem:[#allocation101_spill] sm:$0xff] %v5727_v62  ;;  %v1948_v33 = vrot.slane %v5727_v62, 1 }
 0x1c3   : > { %v5707_v26 = vadd.f32 %v1559_v0, %v1398_v6  ;;  %v1971_v6 = vsel %vm1959_vm1, %v1946_v17, %v1947_v20  ;;  %v4109_v0 = vld [vmem:[%s7665_s4 + $0x230] sm:$0xff]  ;;  %v5733_v17 = vpop.permute.xlu0 %1038 }
 0x1c4   : > { %v1401_v9 = vpop.f32.mrf.mxu1  ;;  %2357 = vmatpush.msra.mxu1 %v4109_v0  ;;  %7941 = vst [vmem:[#allocation102_spill] sm:$0xff] %v5733_v17  ;;  %v1970_v11 = vsel %vm1959_vm1, %v1947_v20, %v1948_v33 }
 0x1c5   : > { %7937 = vst [vmem:[#allocation98_spill] sm:$0xff] %v5707_v26  ;;  %1826 = vmatmul.f32.gmra.mxu3 %v5697_v47  ;;  %v5735_v26 = vpop.f32.mrf.mxu3 }
 0x1c6   : > { %7942 = vst [vmem:[#allocation103_spill] sm:$0xff] %v5735_v26 }
 0x1c7   : > { %1448 = vmatmul.f32.gmra.mxu1 %v1322_v57  ;;  %1609 = vmatmul.f32.gmra.mxu2 %v1209_v63  ;;  %v1158_v63 = vrot.slane %v5420_v14, 6 }
 0x1c8   : > { %2146 = vmatmul.f32.gmra.mxu0 %v1971_v6  ;;  %v5739_v6 = vpop.f32.mrf.mxu0 }
 0x1c9   : > { %7943 = vst [vmem:[#allocation104_spill] sm:$0xff] %v5739_v6  ;;  %v1208_v0 = vsel %vm1184_vm3, %v1157_v2, %v1158_v63  ;;  %v5755_v6 = vpop.permute.xlu1 %1043 }
 0x1ca   : > { %v1562_v23 = vpop.f32.mrf.mxu2  ;;  %7945 = vst [vmem:[#allocation106_spill] sm:$0xff] %v5755_v6 }
 0x1cb   : > { %v5731_v60 = vadd.f32 %v1562_v23, %v1401_v9  ;;  %v5746_v23 = vmul.f32 %v5733_v17, %v836_v22  ;;  %v772_v9 = vadd.f32 %v5559_v3, %v4908_v44  ;;  %v1274_v22 = vrot.slane %v5452_v53, 7 }
 0x1cc   : > { %v1404_v57 = vpop.f32.mrf.mxu1 }
 0x1cd   : > { %1829 = vmatmul.f32.gmra.mxu3 %v5727_v62  ;;  %7944 = vst [vmem:[#allocation105_spill] sm:$0xff] %v5746_v23  ;;  %v1949_v46 = vrot.slane %v5746_v23, 1  ;;  %v1320_v20 = vsel %vm1297_vm2, %v1273_v40, %v1274_v22  ;;  %v1160_v40 = vrot.slane %v5467_v18, 6 }
 0x1cf   : > { %1451 = vmatmul.f32.gmra.mxu1 %v1321_v25  ;;  %1612 = vmatmul.f32.gmra.mxu2 %v1208_v0  ;;  %v1159_v25 = vrot.slane %v5452_v53, 6  ;;  %v837_v0 = vmax.f32 %v772_v9, 0.0  ;;  %v1275_v53 = vrot.slane %v5467_v18, 7  ;;  %v5805_v18 = vpop.permute.xlu0 %1053 }
 0x1d0   : > { %2149 = vmatmul.f32.gmra.mxu0 %v1970_v11  ;;  %v1969_v11 = vsel %vm1959_vm1, %v1948_v33, %v1949_v46  ;;  %v5771_v17 = vpop.f32.mrf.mxu0  ;;  %7952 = vst [vmem:[#allocation113_spill] sm:$0xff] %v5805_v18 }
 0x1d1   : > { %v1207_v44 = vsel %vm1184_vm3, %v1158_v63, %v1159_v25  ;;  %7948 = vst [vmem:[#allocation109_spill] sm:$0xff] %v5771_v17  ;;  %v775_v63 = vadd.f32 %v5559_v3, %v4929_v55  ;;  %v1319_v33 = vsel %vm1297_vm2, %v1274_v22, %v1275_v53 }
 0x1d2   : > { %v1565_v30 = vpop.f32.mrf.mxu2 }
 0x1d3   : > { %v5752_v26 = vadd.f32 %v1565_v30, %v1404_v57  ;;  %v5765_v30 = vmul.f32 %v5755_v6, %v837_v0  ;;  %v5767_v57 = vpop.f32.mrf.mxu3 }
 0x1d4   : > { %v1407_v2 = vpop.f32.mrf.mxu1  ;;  %7947 = vst [vmem:[#allocation108_spill] sm:$0xff] %v5767_v57  ;;  %v838_v57 = vmax.f32 %v775_v63, 0.0 }
 0x1d5   : > { %1832 = vmatmul.f32.gmra.mxu3 %v5746_v23  ;;  %7946 = vst [vmem:[#allocation107_spill] sm:$0xff] %v5765_v30  ;;  %v1950_v6 = vrot.slane %v5765_v30, 1 }
 0x1d7   : > { %1454 = vmatmul.f32.gmra.mxu1 %v1320_v20  ;;  %1615 = vmatmul.f32.gmra.mxu2 %v1207_v44  ;;  %v5781_v44 = vpop.permute.xlu2 %1048  ;;  %v1968_v55 = vsel %vm1959_vm1, %v1949_v46, %v1950_v6  ;;  %v1161_v46 = vrot.slane %v5484_v42, 6 }
 0x1d8   : > { %2152 = vmatmul.f32.gmra.mxu0 %v1969_v11  ;;  %7949 = vst [vmem:[#allocation110_spill] sm:$0xff] %v5781_v44  ;;  %v1206_v11 = vsel %vm1184_vm3, %v1159_v25, %v1160_v40  ;;  %v5795_v22 = vmul.f32 %v5781_v44, %v838_v57  ;;  %v5799_v25 = vpop.f32.mrf.mxu0 }
 0x1d9   : > { %7951 = vst [vmem:[#allocation112_spill] sm:$0xff] %v5799_v25  ;;  %v1205_v44 = vsel %vm1184_vm3, %v1160_v40, %v1161_v46  ;;  %v5820_v25 = vpop.permute.xlu1 %1058 }
 0x1da   : > { %v1568_v9 = vpop.f32.mrf.mxu2  ;;  %7953 = vst [vmem:[#allocation114_spill] sm:$0xff] %v5820_v25 }
 0x1db   : > { %v5777_v0 = vadd.f32 %v1568_v9, %v1407_v2  ;;  %v4108_v2 = vld [vmem:[%s7665_s4 + $0x228] sm:$0xff]  ;;  %v778_v9 = vadd.f32 %v5559_v3, %v4959_v8  ;;  %v5797_v17 = vpop.f32.mrf.mxu3  ;;  %v1951_v8 = vrot.slane %v5795_v22, 1 }
 0x1dc   : > { %v1410_v20 = vpop.f32.mrf.mxu1  ;;  %2358 = vmatpush.msra.mxu1 %v4108_v2  ;;  %7950 = vst [vmem:[#allocation111_spill] sm:$0xff] %v5797_v17 }
 0x1dd   : > { %1835 = vmatmul.f32.gmra.mxu3 %v5765_v30  ;;  %v839_v2 = vmax.f32 %v778_v9, 0.0  ;;  %v781_v9 = vadd.f32 %v5559_v3, %v4989_v34 }
 0x1df   : > { %1457 = vmatmul.f32.gmra.mxu1 %v1319_v33  ;;  %1618 = vmatmul.f32.gmra.mxu2 %v1206_v11  ;;  %v1276_v33 = vrot.slane %v5484_v42, 7  ;;  %v5814_v17 = vmul.f32 %v5805_v18, %v839_v2 }
 0x1e0   : > { %2155 = vmatmul.f32.gmra.mxu0 %v1968_v55  ;;  %v5827_v2 = vpop.f32.mrf.mxu0 }
 0x1e1   : > { %v1318_v57 = vsel %vm1297_vm2, %v1275_v53, %v1276_v33  ;;  %v1952_v40 = vrot.slane %v5814_v17, 1  ;;  %7955 = vst [vmem:[#allocation116_spill] sm:$0xff] %v5827_v2  ;;  %v1163_v2 = vrot.slane %v5529_v38, 6 }
 0x1e2   : > { %v1571_v63 = vpop.f32.mrf.mxu2 }
 0x1e3   : > { %v5803_v11 = vadd.f32 %v1571_v63, %v1410_v20  ;;  %v1967_v20 = vsel %vm1959_vm1, %v1950_v6, %v1951_v8  ;;  %v5822_v42 = vpop.f32.mrf.mxu3  ;;  %v1162_v6 = vrot.slane %v5512_v31, 6 }
 0x1e4   : > { %v1413_v55 = vpop.f32.mrf.mxu1  ;;  %7954 = vst [vmem:[#allocation115_spill] sm:$0xff] %v5822_v42 }
 0x1e5   : > { %1838 = vmatmul.f32.gmra.mxu3 %v5795_v22  ;;  %v1204_v18 = vsel %vm1184_vm3, %v1161_v46, %v1162_v6 }
 0x1e7   : > { %1460 = vmatmul.f32.gmra.mxu1 %v1318_v57  ;;  %1621 = vmatmul.f32.gmra.mxu2 %v1205_v44  ;;  %v1277_v44 = vrot.slane %v5512_v31, 7 }
 0x1e8   : > { %2158 = vmatmul.f32.gmra.mxu0 %v1967_v20  ;;  %v840_v20 = vmax.f32 %v781_v9, 0.0  ;;  %v1278_v9 = vrot.slane %v5529_v38, 7 }
 0x1e9   : > { %v1317_v34 = vsel %vm1297_vm2, %v1276_v33, %v1277_v44  ;;  %v784_v33 = vadd.f32 %v5559_v3, %v5022_v56 }
 0x1ea   : > { %v1574_v63 = vpop.f32.mrf.mxu2 }
 0x1eb   : > { %v5824_v53 = vadd.f32 %v1574_v63, %v1413_v55  ;;  %v5837_v55 = vmul.f32 %v5820_v25, %v840_v20  ;;  %v1966_v63 = vsel %vm1959_vm1, %v1951_v8, %v1952_v40  ;;  %v5848_v25 = vpop.f32.mrf.mxu3  ;;  %v5853_v8 = vpop.f32.mrf.mxu0  ;;  %v841_v56 = vmax.f32 %v784_v33, 0.0 }
 0x1ec   : > { %v1416_v57 = vpop.f32.mrf.mxu1  ;;  %7956 = vst [vmem:[#allocation117_spill] sm:$0xff] %v5848_v25  ;;  %v1164_v33 = vrot.slane %v5552_v4, 6 }
 0x1ed   : > { %1841 = vmatmul.f32.gmra.mxu3 %v5814_v17  ;;  %v1953_v46 = vrot.slane %v5837_v55, 1  ;;  %7958 = vst [vmem:[#allocation119_spill] sm:$0xff] %v5853_v8 }
 0x1ef   : > { %1463 = vmatmul.f32.gmra.mxu1 %v1317_v34  ;;  %1624 = vmatmul.f32.gmra.mxu2 %v1204_v18  ;;  %v5851_v18 = vpop.permute.xlu2 %1063  ;;  %v1316_v34 = vsel %vm1297_vm2, %v1277_v44, %v1278_v9  ;;  %v787_v44 = vadd.f32 %v5559_v3, %v5055_v19  ;;  %v1202_v19 = vsel %vm1184_vm3, %v1163_v2, %v1164_v33 }
 0x1f0   : > { %2161 = vmatmul.f32.gmra.mxu0 %v1966_v63  ;;  %7957 = vst [vmem:[#allocation118_spill] sm:$0xff] %v5851_v18  ;;  %v1203_v63 = vsel %vm1184_vm3, %v1162_v6, %v1163_v2  ;;  %v5865_v25 = vmul.f32 %v5851_v18, %v841_v56  ;;  %v1279_v6 = vrot.slane %v5552_v4, 7 }
 0x1f1   : > { %v842_v38 = vmax.f32 %v787_v44, 0.0  ;;  %v790_v44 = vadd.f32 %v5559_v3, %v5073_v39 }
 0x1f2   : > { %v1577_v42 = vpop.f32.mrf.mxu2  ;;  %7959 = vst [vmem:[#allocation120_spill] sm:$0xff] %v5865_v25  ;;  %v1315_v56 = vsel %vm1297_vm2, %v1278_v9, %v1279_v6 }
 0x1f3   : > { %v5845_v31 = vadd.f32 %v1577_v42, %v1416_v57  ;;  %v1965_v42 = vsel %vm1959_vm1, %v1952_v40, %v1953_v46  ;;  %v4107_v57 = vld [vmem:[%s7665_s4 + $0x220] sm:$0xff]  ;;  %v5873_v40 = vpop.permute.xlu0 %1068  ;;  %v5884_v18 = vpop.f32.mrf.mxu3 }
 0x1f4   : > { %v1419_v20 = vpop.f32.mrf.mxu1  ;;  %2359 = vmatpush.msra.mxu1 %v4107_v57  ;;  %7960 = vst [vmem:[#allocation121_spill] sm:$0xff] %v5873_v40  ;;  %v5882_v57 = vmul.f32 %v5873_v40, %v842_v38  ;;  %v5895_v38 = vpop.permute.xlu1 %1073 }
 0x1f5   : > { %1844 = vmatmul.f32.gmra.mxu3 %v5837_v55  ;;  %7961 = vst [vmem:[#allocation122_spill] sm:$0xff] %v5884_v18  ;;  %v843_v18 = vmax.f32 %v790_v44, 0.0  ;;  %v793_v44 = vadd.f32 %v5559_v3, %v5085_v54 }
 0x1f6   : > { %v1955_v2 = vrot.slane %v5882_v57, 1  ;;  %7963 = vst [vmem:[#allocation124_spill] sm:$0xff] %v5895_v38 }
 0x1f7   : > { %1466 = vmatmul.f32.gmra.mxu1 %v1316_v34  ;;  %1627 = vmatmul.f32.gmra.mxu2 %v1203_v63 }
 0x1f8   : > { %2164 = vmatmul.f32.gmra.mxu0 %v1965_v42  ;;  %v1954_v42 = vrot.slane %v5865_v25, 1 }
 0x1fa   : > { %v1580_v8 = vpop.f32.mrf.mxu2 }
 0x1fb   : > { %v5871_v34 = vadd.f32 %v1580_v8, %v1419_v20  ;;  %v1964_v20 = vsel %vm1959_vm1, %v1953_v46, %v1954_v42  ;;  %v5888_v8 = vpop.f32.mrf.mxu0 }
 0x1fc   : > { %v1422_v63 = vpop.f32.mrf.mxu1  ;;  %7962 = vst [vmem:[#allocation123_spill] sm:$0xff] %v5888_v8 }
 0x1fd   : > { %1847 = vmatmul.f32.gmra.mxu3 %v5865_v25 }
 0x1ff   : > { %1469 = vmatmul.f32.gmra.mxu1 %v1315_v56  ;;  %1630 = vmatmul.f32.gmra.mxu2 %v1202_v19  ;;  %v1280_v56 = vrot.slane %v5587_v5, 7  ;;  %v1165_v19 = vrot.slane %v5587_v5, 6  ;;  %v1281_v5 = vrot.slane %v5606_v61, 7 }
 0x200   : > { %2167 = vmatmul.f32.gmra.mxu0 %v1964_v20  ;;  %v1963_v20 = vsel %vm1959_vm1, %v1954_v42, %v1955_v2  ;;  %v5921_v42 = vpop.permute.xlu2 %1078 }
 0x201   : > { %v1314_v46 = vsel %vm1297_vm2, %v1279_v6, %v1280_v56  ;;  %v1201_v39 = vsel %vm1184_vm3, %v1164_v33, %v1165_v19  ;;  %v1166_v33 = vrot.slane %v5606_v61, 6  ;;  %7966 = vst [vmem:[#allocation127_spill] sm:$0xff] %v5921_v42  ;;  %v1313_v54 = vsel %vm1297_vm2, %v1280_v56, %v1281_v5 }
 0x202   : > { %v1583_v9 = vpop.f32.mrf.mxu2  ;;  %v1282_v56 = vrot.slane %v5629_v37, 7 }
 0x203   : > { %v5892_v4 = vadd.f32 %v1583_v9, %v1422_v63  ;;  %v5905_v63 = vmul.f32 %v5895_v38, %v843_v18  ;;  %v5911_v9 = vpop.f32.mrf.mxu3  ;;  %v5913_v8 = vpop.f32.mrf.mxu0  ;;  %v844_v38 = vmax.f32 %v793_v44, 0.0  ;;  %v1200_v3 = vsel %vm1184_vm3, %v1165_v19, %v1166_v33 }
 0x204   : > { %v1425_v40 = vpop.f32.mrf.mxu1  ;;  %7964 = vst [vmem:[#allocation125_spill] sm:$0xff] %v5911_v9  ;;  %v1167_v9 = vrot.slane %v5629_v37, 6 }
 0x205   : > { %1850 = vmatmul.f32.gmra.mxu3 %v5882_v57  ;;  %7965 = vst [vmem:[#allocation126_spill] sm:$0xff] %v5913_v8  ;;  %v5933_v44 = vmul.f32 %v5921_v42, %v844_v38  ;;  %v1312_v38 = vsel %vm1297_vm2, %v1281_v5, %v1282_v56  ;;  %v1958_v8 = vrot.slane %v5129_v58, 1 }
 0x207   : > { %1472 = vmatmul.f32.gmra.mxu1 %v1314_v46  ;;  %1633 = vmatmul.f32.gmra.mxu2 %v1201_v39  ;;  %v1956_v46 = vrot.slane %v5905_v63, 1  ;;  %7967 = vst [vmem:[#allocation128_spill] sm:$0xff] %v5933_v44 }
 0x208   : > { %2170 = vmatmul.f32.gmra.mxu0 %v1963_v20  ;;  %v4106_v20 = vld [vmem:[%s7665_s4 + $0x218] sm:$0xff] }
 0x209   : > { %2360 = vmatpush.msra.mxu1 %v4106_v20  ;;  %v1199_v20 = vsel %vm1184_vm3, %v1166_v33, %v1167_v9 }
 0x20a   : > { %v1586_v6 = vpop.f32.mrf.mxu2 }
 0x20b   : > { %v5917_v18 = vadd.f32 %v1586_v6, %v1425_v40  ;;  %v1962_v40 = vsel %vm1959_vm1, %v1955_v2, %v1956_v46  ;;  %v5937_v19 = vpop.f32.mrf.mxu3 }
 0x20c   : > { %v1428_v39 = vpop.f32.mrf.mxu1  ;;  %7968 = vst [vmem:[#allocation129_spill] sm:$0xff] %v5937_v19  ;;  %v1168_v19 = vrot.slane %v5648_v45, 6 }
 0x20d   : > { %1853 = vmatmul.f32.gmra.mxu3 %v5905_v63 }
 0x20f   : > { %1475 = vmatmul.f32.gmra.mxu1 %v1313_v54  ;;  %1636 = vmatmul.f32.gmra.mxu2 %v1200_v3  ;;  %v5941_v3 = vpop.f32.mrf.mxu0 }
 0x210   : > { %2173 = vmatmul.f32.gmra.mxu0 %v1962_v40  ;;  %7969 = vst [vmem:[#allocation130_spill] sm:$0xff] %v5941_v3  ;;  %v1957_v40 = vrot.slane %v5933_v44, 1 }
 0x212   : > { %v1589_v6 = vpop.f32.mrf.mxu2  ;;  %v1961_v42 = vsel %vm1959_vm1, %v1956_v46, %v1957_v40 }
 0x213   : > { %v5939_v54 = vadd.f32 %v1589_v6, %v1428_v39  ;;  %v1283_v6 = vrot.slane %v5648_v45, 7  ;;  %v5956_v5 = vpop.f32.mrf.mxu3 }
 0x214   : > { %v1431_v2 = vpop.f32.mrf.mxu1  ;;  %7970 = vst [vmem:[#allocation131_spill] sm:$0xff] %v5956_v5  ;;  %v1284_v5 = vrot.slane %v5678_v28, 7 }
 0x215   : > { %1856 = vmatmul.f32.gmra.mxu3 %v5933_v44  ;;  %v1311_v46 = vsel %vm1297_vm2, %v1282_v56, %v1283_v6 }
 0x216   : > { %v1310_v56 = vsel %vm1297_vm2, %v1283_v6, %v1284_v5  ;;  %v1285_v6 = vrot.slane %v5697_v47, 7 }
 0x217   : > { %1478 = vmatmul.f32.gmra.mxu1 %v1312_v38  ;;  %1639 = vmatmul.f32.gmra.mxu2 %v1199_v20  ;;  %v5959_v33 = vpop.f32.mrf.mxu0 }
 0x218   : > { %2176 = vmatmul.f32.gmra.mxu0 %v1961_v42  ;;  %7971 = vst [vmem:[#allocation132_spill] sm:$0xff] %v5959_v33  ;;  %v1198_v42 = vsel %vm1184_vm3, %v1167_v9, %v1168_v19  ;;  %v1169_v33 = vrot.slane %v5678_v28, 6  ;;  %v1171_v28 = vrot.slane %v5727_v62, 6 }
 0x21a   : > { %v1592_v39 = vpop.f32.mrf.mxu2  ;;  %v1197_v9 = vsel %vm1184_vm3, %v1168_v19, %v1169_v33  ;;  %v1170_v19 = vrot.slane %v5697_v47, 6 }
 0x21b   : > { %v5953_v3 = vadd.f32 %v1592_v39, %v1431_v2  ;;  %v1960_v2 = vsel %vm1959_vm1, %v1957_v40, %v1958_v8 }
 0x21c   : > { %v1434_v37 = vpop.f32.mrf.mxu1 }
 0x21d   : > { %1859 = vmatmul.f32.gmra.mxu3 %v5129_v58 }
 0x21f   : > { %1481 = vmatmul.f32.gmra.mxu1 %v1311_v46  ;;  %1642 = vmatmul.f32.gmra.mxu2 %v1198_v42  ;;  %v7972_v46 = vrot.slane %v4847_v7, 1  ;;  %v5982_v42 = vpop.f32.mrf.mxu0 }
 0x220   : > { %2179 = vmatmul.f32.gmra.mxu0 %v1960_v2  ;;  %7973 = vst [vmem:[#allocation133_spill] sm:$0xff] %v5982_v42 }
 0x221   : > { %v2007_v40 = vsel %vm1959_vm1, %v1958_v8, %v7972_v46  ;;  %v1196_v8 = vsel %vm1184_vm3, %v1169_v33, %v1170_v19  ;;  %v1287_v33 = vrot.slane %v5746_v23, 7 }
 0x222   : > { %v1595_v38 = vpop.f32.mrf.mxu2 }
 0x223   : > { %v5967_v20 = vadd.f32 %v1595_v38, %v1434_v37  ;;  %v4105_v37 = vld [vmem:[%s7665_s4 + $0x210] sm:$0xff] }
 0x224   : > { %v1437_v39 = vpop.f32.mrf.mxu1  ;;  %2361 = vmatpush.msra.mxu1 %v4105_v37  ;;  %v1286_v37 = vrot.slane %v5727_v62, 7 }
 0x227   : > { %1484 = vmatmul.f32.gmra.mxu1 %v1310_v56  ;;  %1645 = vmatmul.f32.gmra.mxu2 %v1197_v9  ;;  %v1309_v9 = vsel %vm1297_vm2, %v1284_v5, %v1285_v6 }
 0x228   : > { %2182 = vmatmul.f32.gmra.mxu0 %v2007_v40 }
 0x22a   : > { %v1598_v2 = vpop.f32.mrf.mxu2 }
 0x22b   : > { %v5986_v38 = vadd.f32 %v1598_v2, %v1437_v39  ;;  %v1308_v39 = vsel %vm1297_vm2, %v1285_v6, %v1286_v37  ;;  %v1195_v2 = vsel %vm1184_vm3, %v1170_v19, %v1171_v28  ;;  %v4104_v6 = vld [vmem:[%s7665_s4 + $0x208] sm:$0xff] }
 0x22c   : > { %v1440_v56 = vpop.f32.mrf.mxu1  ;;  %2362 = vmatpush.msra.mxu1 %v4104_v6 }
 0x22f   : > { %1487 = vmatmul.f32.gmra.mxu1 %v1309_v9  ;;  %1648 = vmatmul.f32.gmra.mxu2 %v1196_v8  ;;  %v1172_v9 = vrot.slane %v5746_v23, 6  ;;  %v1289_v23 = vrot.slane %v5795_v22, 7 }
 0x231   : > { %v1194_v62 = vsel %vm1184_vm3, %v1171_v28, %v1172_v9 }
 0x232   : > { %v1601_v46 = vpop.f32.mrf.mxu2 }
 0x233   : > { %v5992_v42 = vadd.f32 %v1601_v46, %v1440_v56  ;;  %v1307_v46 = vsel %vm1297_vm2, %v1286_v37, %v1287_v33 }
 0x234   : > { %v1443_v40 = vpop.f32.mrf.mxu1 }
 0x237   : > { %1490 = vmatmul.f32.gmra.mxu1 %v1308_v39  ;;  %1651 = vmatmul.f32.gmra.mxu2 %v1195_v2  ;;  %v1288_v39 = vrot.slane %v5765_v30, 7 }
 0x239   : > { %v1306_v37 = vsel %vm1297_vm2, %v1287_v33, %v1288_v39 }
 0x23a   : > { %v1604_v5 = vpop.f32.mrf.mxu2 }
 0x23b   : > { %v6002_v56 = vadd.f32 %v1604_v5, %v1443_v40  ;;  %v1173_v40 = vrot.slane %v5765_v30, 6  ;;  %v1174_v30 = vrot.slane %v5795_v22, 6 }
 0x23c   : > { %v1446_v8 = vpop.f32.mrf.mxu1 }
 0x23d   : > { %v1193_v28 = vsel %vm1184_vm3, %v1172_v9, %v1173_v40  ;;  %v1192_v33 = vsel %vm1184_vm3, %v1173_v40, %v1174_v30  ;;  %v1290_v9 = vrot.slane %v5814_v17, 7  ;;  %v1291_v40 = vrot.slane %v5837_v55, 7 }
 0x23f   : > { %1493 = vmatmul.f32.gmra.mxu1 %v1307_v46  ;;  %1654 = vmatmul.f32.gmra.mxu2 %v1194_v62 }
 0x242   : > { %v1607_v19 = vpop.f32.mrf.mxu2 }
 0x243   : > { %v6013_v2 = vadd.f32 %v1607_v19, %v1446_v8  ;;  %v1305_v8 = vsel %vm1297_vm2, %v1288_v39, %v1289_v23  ;;  %v1175_v19 = vrot.slane %v5814_v17, 6  ;;  %v4103_v39 = vld [vmem:[%s7665_s4 + $0x200] sm:$0xff] }
 0x244   : > { %v1449_v5 = vpop.f32.mrf.mxu1  ;;  %2363 = vmatpush.msra.mxu1 %v4103_v39 }
 0x247   : > { %1496 = vmatmul.f32.gmra.mxu1 %v1306_v37  ;;  %1657 = vmatmul.f32.gmra.mxu2 %v1193_v28  ;;  %v1304_v37 = vsel %vm1297_vm2, %v1289_v23, %v1290_v9  ;;  %v1191_v28 = vsel %vm1184_vm3, %v1174_v30, %v1175_v19 }
 0x24a   : > { %v1610_v62 = vpop.f32.mrf.mxu2 }
 0x24b   : > { %v6019_v46 = vadd.f32 %v1610_v62, %v1449_v5  ;;  %v1176_v62 = vrot.slane %v5837_v55, 6 }
 0x24c   : > { %v6021_v6 = vpop.f32.mrf.mxu1 }
 0x24d   : > { %v1190_v23 = vsel %vm1184_vm3, %v1175_v19, %v1176_v62  ;;  %v1178_v19 = vrot.slane %v5882_v57, 6 }
 0x24f   : > { %1499 = vmatmul.f32.gmra.mxu1 %v1305_v8  ;;  %1660 = vmatmul.f32.gmra.mxu2 %v1192_v33  ;;  %v1303_v33 = vsel %vm1297_vm2, %v1290_v9, %v1291_v40  ;;  %v1293_v9 = vrot.slane %v5882_v57, 7 }
 0x254   : > { %v6031_v5 = vpop.f32.mrf.mxu1 }
 0x257   : > { %1502 = vmatmul.f32.gmra.mxu1 %v1304_v37  ;;  %1663 = vmatmul.f32.gmra.mxu2 %v1191_v28  ;;  %v1292_v37 = vrot.slane %v5865_v25, 7  ;;  %v1177_v28 = vrot.slane %v5865_v25, 6 }
 0x259   : > { %v1302_v39 = vsel %vm1297_vm2, %v1291_v40, %v1292_v37  ;;  %v1188_v25 = vsel %vm1184_vm3, %v1177_v28, %v1178_v19  ;;  %v1294_v40 = vrot.slane %v5905_v63, 7 }
 0x25c   : > { %v6042_v8 = vpop.f32.mrf.mxu1 }
 0x25d   : > { %7974 = vst [vmem:[#allocation134_spill] sm:$0xff] %v6042_v8  ;;  %v1189_v8 = vsel %vm1184_vm3, %v1176_v62, %v1177_v28  ;;  %v1179_v62 = vrot.slane %v5905_v63, 6  ;;  %v1295_v28 = vrot.slane %v5933_v44, 7 }
 0x25f   : > { %1505 = vmatmul.f32.gmra.mxu1 %v1303_v33  ;;  %1666 = vmatmul.f32.gmra.mxu2 %v1190_v23  ;;  %v1301_v23 = vsel %vm1297_vm2, %v1292_v37, %v1293_v9 }
 0x264   : > { %v6048_v30 = vpop.f32.mrf.mxu1 }
 0x267   : > { %1508 = vmatmul.f32.gmra.mxu1 %v1302_v39  ;;  %1669 = vmatmul.f32.gmra.mxu2 %v1189_v8  ;;  %v1300_v8 = vsel %vm1297_vm2, %v1293_v9, %v1294_v40 }
 0x26c   : > { %v6058_v33 = vpop.f32.mrf.mxu1 }
 0x26d   : > { %7975 = vst [vmem:[#allocation135_spill] sm:$0xff] %v6058_v33  ;;  %v1187_v33 = vsel %vm1184_vm3, %v1178_v19, %v1179_v62  ;;  %v7979_v19 = vrot.slane %v5129_v58, 7 }
 0x26f   : > { %1511 = vmatmul.f32.gmra.mxu1 %v1301_v23  ;;  %1672 = vmatmul.f32.gmra.mxu2 %v1188_v25  ;;  %v1180_v25 = vrot.slane %v5933_v44, 6  ;;  %v1299_v23 = vsel %vm1297_vm2, %v1294_v40, %v1295_v28  ;;  %v2235_v40 = vrot.slane %v4858_v15, 2 }
 0x274   : > { %v6066_v39 = vpop.f32.mrf.mxu1 }
 0x275   : > { %7976 = vst [vmem:[#allocation136_spill] sm:$0xff] %v6066_v39  ;;  %v1186_v39 = vsel %vm1184_vm3, %v1179_v62, %v1180_v25  ;;  %v7982_v62 = vrot.slane %v4847_v7, 2 }
 0x277   : > { %1514 = vmatmul.f32.gmra.mxu1 %v1300_v8  ;;  %1675 = vmatmul.f32.gmra.mxu2 %v1187_v33  ;;  %v1298_v33 = vsel %vm1297_vm2, %v1295_v28, %v7979_v19  ;;  %v7980_v8 = vrot.slane %v5129_v58, 6 }
 0x279   : > { %v1185_v44 = vsel %vm1184_vm3, %v1180_v25, %v7980_v8  ;;  %v2239_v8 = vrot.slane %v4921_v52, 2  ;;  %v2241_v52 = vrot.slane %v4978_v27, 2 }
 0x27c   : > { %v6072_v37 = vpop.f32.mrf.mxu1 }
 0x27d   : > { %7977 = vst [vmem:[#allocation137_spill] sm:$0xff] %v6072_v37 }
 0x27f   : > { %1517 = vmatmul.f32.gmra.mxu1 %v1299_v23  ;;  %1678 = vmatmul.f32.gmra.mxu2 %v1186_v39  ;;  %v2329_v39 = vsel %vm2282_vm4, %v7982_v62, %v2235_v40  ;;  %v2236_v23 = vrot.slane %v4874_v24, 2  ;;  %v2240_v62 = vrot.slane %v4948_v1, 2  ;;  %v6132_v1 = vpop.f32.mrf.mxu0 }
 0x281   : > { %v2328_v19 = vsel %vm2282_vm4, %v2235_v40, %v2236_v23 }
 0x284   : > { %v6080_v9 = vpop.f32.mrf.mxu1 }
 0x285   : > { %7978 = vst [vmem:[#allocation138_spill] sm:$0xff] %v6080_v9 }
 0x287   : > { %1520 = vmatmul.f32.gmra.mxu1 %v1298_v33  ;;  %1681 = vmatmul.f32.gmra.mxu2 %v1185_v44  ;;  %v2237_v44 = vrot.slane %v4886_v32, 2  ;;  %v2238_v33 = vrot.slane %v4900_v41, 2  ;;  %v6122_v41 = vpop.f32.mrf.mxu2 }
 0x289   : > { %v2327_v15 = vsel %vm2282_vm4, %v2236_v23, %v2237_v44  ;;  %v2326_v24 = vsel %vm2282_vm4, %v2237_v44, %v2238_v33  ;;  %v2325_v32 = vsel %vm2282_vm4, %v2238_v33, %v2239_v8  ;;  %v2324_v23 = vsel %vm2282_vm4, %v2239_v8, %v2240_v62 }
 0x28a   : > { %v2323_v44 = vsel %vm2282_vm4, %v2240_v62, %v2241_v52  ;;  %v6143_v62 = vpop.f32.mrf.mxu0 }
 0x28c   : > { %v6091_v37 = vpop.f32.mrf.mxu1 }
 0x28d   : > { %7981 = vst [vmem:[#allocation139_spill] sm:$0xff] %v6091_v37  ;;  %v8006_v37 = vld [vmem:[#allocation43_spill] sm:$0xff] }
 0x28f   : > { %2364 = vmatmul.f32.vlgmr.msra.gmra.mxu1 %v2329_v39  ;;  %v6130_v33 = vpop.f32.mrf.mxu2 }
 0x294   : > { %v6098_v28 = vpop.f32.mrf.mxu1 }
 0x295   : > { %7983 = vst [vmem:[#allocation140_spill] sm:$0xff] %v6098_v28  ;;  %v4141_v28 = vld [vmem:[%s7667_s6 + $0x130] sm:$0xff] }
 0x297   : > { %2367 = vmatmul.f32.gmra.mxu1 %v2328_v19  ;;  %v6141_v27 = vpop.f32.mrf.mxu2 }
 0x29c   : > { %v6103_v25 = vpop.f32.mrf.mxu1 }
 0x29d   : > { %7984 = vst [vmem:[#allocation141_spill] sm:$0xff] %v6103_v25  ;;  %v4120_v25 = vld [vmem:[%s7667_s6 + $0x88] sm:$0xff] }
 0x29f   : > { %2370 = vmatmul.f32.gmra.mxu1 %v2327_v15  ;;  %v2242_v15 = vrot.slane %v5011_v49, 2 }
 0x2a1   : > { %v2322_v8 = vsel %vm2282_vm4, %v2241_v52, %v2242_v15  ;;  %v7992_v52 = vrot.slane %v5068_v36, 2  ;;  %v4132_v36 = vld [vmem:[%s7667_s6 + $0xe8] sm:$0xff] }
 0x2a4   : > { %v6107_v7 = vpop.f32.mrf.mxu1 }
 0x2a5   : > { %7985 = vst [vmem:[#allocation142_spill] sm:$0xff] %v6107_v7  ;;  %v4121_v7 = vld [vmem:[%s7667_s6 + $0x90] sm:$0xff] }
 0x2a7   : > { %2373 = vmatmul.f32.gmra.mxu1 %v2326_v24 }
 0x2ac   : > { %v6113_v40 = vpop.f32.mrf.mxu1 }
 0x2ad   : > { %7986 = vst [vmem:[#allocation143_spill] sm:$0xff] %v6113_v40 }
 0x2af   : > { %2376 = vmatmul.f32.gmra.mxu1 %v2325_v32  ;;  %v2243_v32 = vrot.slane %v5044_v10, 2 }
 0x2b1   : > { %v2321_v49 = vsel %vm2282_vm4, %v2242_v15, %v2243_v32  ;;  %v2320_v10 = vsel %vm2282_vm4, %v2243_v32, %v7992_v52  ;;  %v4133_v15 = vld [vmem:[%s7667_s6 + $0xf0] sm:$0xff]  ;;  %v4130_v52 = vld [vmem:[%s7667_s6 + $0xd8] sm:$0xff] }
 0x2b2   : > { %v7994_v32 = vld [vmem:[#allocation35_spill] sm:$0xff] }
 0x2b4   : > { %v6118_v39 = vpop.f32.mrf.mxu1 }
 0x2b5   : > { %7987 = vst [vmem:[#allocation144_spill] sm:$0xff] %v6118_v39 }
 0x2b7   : > { %2379 = vmatmul.f32.gmra.mxu1 %v2324_v23 }
 0x2bc   : > { %v6124_v19 = vpop.f32.mrf.mxu1 }
 0x2bd   : > { %7988 = vst [vmem:[#allocation145_spill] sm:$0xff] %v6124_v19  ;;  %v4147_v19 = vld [vmem:[%s7667_s6 + $0x160] sm:$0xff] }
 0x2bf   : > { %2382 = vmatmul.f32.gmra.mxu1 %v2323_v44 }
 0x2c4   : > { %v6134_v24 = vpop.f32.mrf.mxu1 }
 0x2c5   : > { %7989 = vst [vmem:[#allocation146_spill] sm:$0xff] %v6134_v24  ;;  %v4134_v24 = vld [vmem:[%s7667_s6 + $0xf8] sm:$0xff] }
 0x2c6   : > { %2834 = vmatpush.msra.mxu2 %v4134_v24  ;;  %v4131_v24 = vld [vmem:[%s7667_s6 + $0xe0] sm:$0xff] }
 0x2c7   : > { %2385 = vmatmul.f32.gmra.mxu1 %v2322_v8  ;;  %v6156_v8 = vpop.f32.mrf.mxu2 }
 0x2c8   : > { %2835 = vmatpush.msra.mxu2 %v4133_v15 }
 0x2ca   : > { %2836 = vmatpush.msra.mxu2 %v4132_v36 }
 0x2cc   : > { %v6139_v23 = vpop.f32.mrf.mxu1  ;;  %2837 = vmatpush.msra.mxu2 %v4131_v24  ;;  %v4149_v24 = vld [vmem:[%s7667_s6 + $0x170] sm:$0xff] }
 0x2cd   : > { %7990 = vst [vmem:[#allocation147_spill] sm:$0xff] %v6139_v23 }
 0x2ce   : > { %2838 = vmatpush.msra.mxu2 %v4130_v52  ;;  %v4148_v52 = vld [vmem:[%s7667_s6 + $0x168] sm:$0xff] }
 0x2cf   : > { %2388 = vmatmul.f32.gmra.mxu1 %v2321_v49  ;;  %v6161_v49 = vpop.f32.mrf.mxu0  ;;  %v6178_v15 = vpop.f32.mrf.mxu2 }
 0x2d4   : > { %v6147_v44 = vpop.f32.mrf.mxu1 }
 0x2d5   : > { %7991 = vst [vmem:[#allocation148_spill] sm:$0xff] %v6147_v44 }
 0x2d7   : > { %2391 = vmatmul.f32.gmra.mxu1 %v2320_v10  ;;  %v4150_v10 = vld [vmem:[%s7667_s6 + $0x178] sm:$0xff]  ;;  %v6183_v23 = vpop.f32.mrf.mxu0 }
 0x2d8   : > { %3269 = vmatpush.msra.mxu0 %v4150_v10  ;;  %v4127_v10 = vld [vmem:[%s7667_s6 + $0xc0] sm:$0xff] }
 0x2da   : > { %3270 = vmatpush.msra.mxu0 %v4149_v24  ;;  %v4146_v24 = vld [vmem:[%s7667_s6 + $0x158] sm:$0xff] }
 0x2dc   : > { %v6163_v44 = vpop.f32.mrf.mxu1  ;;  %3271 = vmatpush.msra.mxu0 %v4148_v52  ;;  %v4145_v52 = vld [vmem:[%s7667_s6 + $0x150] sm:$0xff] }
 0x2dd   : > { %7993 = vst [vmem:[#allocation149_spill] sm:$0xff] %v6163_v44  ;;  %v4129_v44 = vld [vmem:[%s7667_s6 + $0xd0] sm:$0xff] }
 0x2de   : > { %2839 = vmatpush.msra.mxu2 %v4129_v44  ;;  %v4126_v44 = vld [vmem:[%s7667_s6 + $0xb8] sm:$0xff]  ;;  %3272 = vmatpush.msra.mxu0 %v4147_v19  ;;  %v4123_v19 = vld [vmem:[%s7667_s6 + $0xa0] sm:$0xff] }
 0x2df   : > { %2394 = vmatmul.f32.gmra.mxu1 %v7994_v32  ;;  %v4128_v32 = vld [vmem:[%s7667_s6 + $0xc8] sm:$0xff]  ;;  %v6214_v39 = vpop.f32.mrf.mxu0 }
 0x2e0   : > { %2840 = vmatpush.msra.mxu2 %v4128_v32  ;;  %v4125_v32 = vld [vmem:[%s7667_s6 + $0xb0] sm:$0xff]  ;;  %3273 = vmatpush.msra.mxu0 %v4146_v24  ;;  %v4122_v24 = vld [vmem:[%s7667_s6 + $0x98] sm:$0xff] }
 0x2e2   : > { %2841 = vmatpush.msra.mxu2 %v4127_v10  ;;  %v4124_v10 = vld [vmem:[%s7667_s6 + $0xa8] sm:$0xff]  ;;  %3274 = vmatpush.msra.mxu0 %v4145_v52  ;;  %v2816_v52 = vld [vmem:[%s7667_s6 + $0x78] sm:$0xff] }
 0x2e3   : > { %2995 = vmatpush.msra.mxu3 %v2816_v52  ;;  %v4119_v52 = vld [vmem:[%s7667_s6 + $0x80] sm:$0xff] }
 0x2e4   : > { %v6185_v36 = vpop.f32.mrf.mxu1  ;;  %2842 = vmatpush.msra.mxu2 %v4126_v44  ;;  %v7999_v44 = vld [vmem:[#allocation41_spill] sm:$0xff] }
 0x2e5   : > { %7995 = vst [vmem:[#allocation35_spill] sm:$0xff] %v6185_v36  ;;  %v7996_v36 = vld [vmem:[#allocation36_spill] sm:$0xff] }
 0x2e6   : > { %7997 = vst [vmem:[#allocation36_spill] sm:$0xff] %v6214_v39  ;;  %2843 = vmatpush.msra.mxu2 %v4125_v32  ;;  %v4144_v32 = vld [vmem:[%s7667_s6 + $0x148] sm:$0xff] }
 0x2e7   : > { %2397 = vmatmul.f32.gmra.mxu1 %v7996_v36  ;;  %v6212_v36 = vpop.f32.mrf.mxu2  ;;  %3275 = vmatpush.msra.mxu0 %v4144_v32  ;;  %v6250_v32 = vpop.f32.mrf.mxu0 }
 0x2e8   : > { %2844 = vmatpush.msra.mxu2 %v4124_v10  ;;  %v4143_v10 = vld [vmem:[%s7667_s6 + $0x140] sm:$0xff]  ;;  %8002 = vst [vmem:[#allocation152_spill] sm:$0xff] %v6250_v32 }
 0x2e9   : > { %3276 = vmatpush.msra.mxu0 %v4143_v10 }
 0x2ea   : > { %2845 = vmatpush.msra.mxu2 %v4123_v19  ;;  %v4142_v19 = vld [vmem:[%s7667_s6 + $0x138] sm:$0xff] }
 0x2eb   : > { %3277 = vmatpush.msra.mxu0 %v4142_v19 }
 0x2ec   : > { %v6216_v40 = vpop.f32.mrf.mxu1  ;;  %2846 = vmatpush.msra.mxu2 %v4122_v24  ;;  %v4140_v24 = vld [vmem:[%s7667_s6 + $0x128] sm:$0xff] }
 0x2ed   : > { %7998 = vst [vmem:[#allocation150_spill] sm:$0xff] %v6216_v40  ;;  %3278 = vmatpush.msra.mxu0 %v4141_v28  ;;  %v4137_v28 = vld [vmem:[%s7667_s6 + $0x110] sm:$0xff] }
 0x2ee   : > { %2847 = vmatpush.msra.mxu2 %v4121_v7  ;;  %v4138_v7 = vld [vmem:[%s7667_s6 + $0x118] sm:$0xff] }
 0x2ef   : > { %2400 = vmatmul.f32.gmra.mxu1 %v7999_v44  ;;  %v6242_v44 = vpop.f32.mrf.mxu2  ;;  %3279 = vmatpush.msra.mxu0 %v4140_v24  ;;  %v4135_v24 = vld [vmem:[%s7667_s6 + $0x100] sm:$0xff] }
 0x2f0   : > { %8001 = vst [vmem:[#allocation151_spill] sm:$0xff] %v6242_v44  ;;  %2848 = vmatpush.msra.mxu2 %v4120_v25  ;;  %v6279_v25 = vpop.f32.mrf.mxu0  ;;  %v8019_v44 = vld [vmem:[#allocation47_spill] sm:$0xff] }
 0x2f1   : > { %8007 = vst [vmem:[#allocation43_spill] sm:$0xff] %v6279_v25 }
 0x2f2   : > { %2849 = vmatpush.msra.mxu2 %v4119_v52  ;;  %v4136_v52 = vld [vmem:[%s7667_s6 + $0x108] sm:$0xff] }
 0x2f4   : > { %v6234_v40 = vpop.f32.mrf.mxu1 }
 0x2f5   : > { %8000 = vst [vmem:[#allocation41_spill] sm:$0xff] %v6234_v40  ;;  %v8003_v40 = vld [vmem:[#allocation42_spill] sm:$0xff] }
 0x2f7   : > { %2403 = vmatmul.f32.gmra.mxu1 %v8003_v40  ;;  %v4139_v40 = vld [vmem:[%s7667_s6 + $0x120] sm:$0xff]  ;;  %v6273_v19 = vpop.f32.mrf.mxu2 }
 0x2f8   : > { %3280 = vmatpush.msra.mxu0 %v4139_v40  ;;  %8005 = vst [vmem:[#allocation153_spill] sm:$0xff] %v6273_v19  ;;  %v2815_v19 = vld [vmem:[%s7667_s6 + $0x70] sm:$0xff] }
 0x2f9   : > { %2996 = vmatpush.msra.mxu3 %v2815_v19  ;;  %v8015_v19 = vld [vmem:[#allocation32_spill] sm:$0xff] }
 0x2fa   : > { %3281 = vmatpush.msra.mxu0 %v4138_v7  ;;  %v8010_v7 = vld [vmem:[#allocation33_spill] sm:$0xff]  ;;  %v2252_v9 = vrot.slane %v8015_v19, 2 }
 0x2fb   : > { %v1863_v25 = vadd.f32 %v8010_v7, %v5569_v59  ;;  %v8014_v7 = vld [vmem:[#allocation39_spill] sm:$0xff] }
 0x2fc   : > { %v6268_v10 = vpop.f32.mrf.mxu1  ;;  %3282 = vmatpush.msra.mxu0 %v4137_v28 }
 0x2fd   : > { %8004 = vst [vmem:[#allocation42_spill] sm:$0xff] %v6268_v10  ;;  %v8009_v10 = vrot.slane %v5196_v35, 2  ;;  %v8013_v35 = vld [vmem:[#allocation40_spill] sm:$0xff] }
 0x2fe   : > { %3283 = vmatpush.msra.mxu0 %v4136_v52  ;;  %v2186_v52 = vadd.f32 %v8013_v35, %v1863_v25  ;;  %v8017_v35 = vld [vmem:[#allocation11_spill] sm:$0xff] }
 0x2ff   : > { %2406 = vmatmul.f32.gmra.mxu1 %v8006_v37  ;;  %v2250_v37 = vrot.slane %v5218_v16, 2  ;;  %v6296_v28 = vpop.f32.mrf.mxu2  ;;  %v2251_v16 = vrot.slane %v5233_v50, 2 }
 0x300   : > { %3284 = vmatpush.msra.mxu0 %v4135_v24  ;;  %8011 = vst [vmem:[#allocation33_spill] sm:$0xff] %v6296_v28  ;;  %v1864_v28 = vadd.f32 %v8014_v7, %v5593_v29 }
 0x301   : > { %v2314_v58 = vsel %vm2282_vm4, %v8009_v10, %v2250_v37  ;;  %v6308_v10 = vld [vmem:[%s7666_s5] ss:$0 sm:$0xff]  ;;  %v2313_v24 = vsel %vm2282_vm4, %v2250_v37, %v2251_v16  ;;  %v2312_v29 = vsel %vm2282_vm4, %v2251_v16, %v2252_v9 }
 0x302   : > { %v2187_v39 = vadd.f32 %v8019_v44, %v1864_v28 }
 0x304   : > { %v6287_v40 = vpop.f32.mrf.mxu1 }
 0x305   : > { %8008 = vst [vmem:[#allocation154_spill] sm:$0xff] %v6287_v40  ;;  %v6301_v40 = vpop.f32.mrf.mxu0 }
 0x306   : > { %8012 = vst [vmem:[#allocation155_spill] sm:$0xff] %v6301_v40 }
 0x307   : > { %2409 = vmatmul.f32.gmra.mxu1 %v2314_v58  ;;  %v6316_v25 = vpop.f32.mrf.mxu2 }
 0x308   : > { %8016 = vst [vmem:[#allocation40_spill] sm:$0xff] %v6316_v25 }
 0x30c   : > { %v2365_v59 = vpop.f32.mrf.mxu1 }
 0x30d   : > { %v2509_v58 = vadd.f32 %v2365_v59, %v2186_v52  ;;  %v6322_v52 = vpop.f32.mrf.mxu0 }
 0x30e   : > { %8020 = vst [vmem:[#allocation32_spill] sm:$0xff] %v6322_v52  ;;  %v8025_v52 = vld [vmem:[#allocation37_spill] sm:$0xff] }
 0x30f   : > { %v2561_v40 = vadd.f32 %v6308_v10, %v2509_v58  ;;  %2412 = vmatmul.f32.gmra.mxu1 %v2313_v24 }
 0x311   : > { %v2609_v50 = vmax.f32 %v2561_v40, 0.0  ;;  %v8021_v40 = vld [vmem:[#allocation46_spill] sm:$0xff] }
 0x312   : > { %v1865_v58 = vadd.f32 %v8021_v40, %v5612_v43  ;;  %v8026_v40 = vld [vmem:[#allocation49_spill] sm:$0xff] }
 0x313   : > { %v6319_v32 = vmul.f32 %v2609_v50, %v8017_v35  ;;  %v8022_v50 = vld [vmem:[#allocation51_spill] sm:$0xff]  ;;  %v8023_v35 = vld [vmem:[#allocation12_spill] sm:$0xff] }
 0x314   : > { %v2368_v59 = vpop.f32.mrf.mxu1  ;;  %v2188_v19 = vadd.f32 %v8022_v50, %v1865_v58  ;;  %v1866_v58 = vadd.f32 %v8026_v40, %v5637_v51  ;;  %v2814_v50 = vld [vmem:[%s7667_s6 + $0x68] sm:$0xff]  ;;  %v8028_v51 = vld [vmem:[#allocation13_spill] sm:$0xff] }
 0x315   : > { %8018 = vst [vmem:[#allocation39_spill] sm:$0xff] %v6319_v32  ;;  %v2510_v37 = vadd.f32 %v2368_v59, %v2187_v39  ;;  %2850 = vmatmul.f32.vlgmr.msra.gmra.mxu2 %v6319_v32  ;;  %v2253_v39 = vrot.slane %v8025_v52, 2  ;;  %v6335_v59 = vpop.f32.mrf.mxu2  ;;  %v7797_v43 = vrot.slane %v6319_v32, 1  ;;  %2997 = vmatpush.msra.mxu3 %v2814_v50 }
 0x317   : > { %v2562_v24 = vadd.f32 %v6308_v10, %v2510_v37  ;;  %2415 = vmatmul.f32.gmra.mxu1 %v2312_v29  ;;  %v6340_v37 = vpop.f32.mrf.mxu0  ;;  %v2311_v29 = vsel %vm2282_vm4, %v2252_v9, %v2253_v39  ;;  %v8027_v9 = vld [vmem:[#allocation56_spill] sm:$0xff] }
 0x319   : > { %v2610_v7 = vmax.f32 %v2562_v24, 0.0 }
 0x31b   : > { %v6332_v44 = vmul.f32 %v2610_v7, %v8023_v35  ;;  %v8031_v35 = vld [vmem:[#allocation55_spill] sm:$0xff] }
 0x31c   : > { %v2371_v28 = vpop.f32.mrf.mxu1 }
 0x31d   : > { %8024 = vst [vmem:[#allocation47_spill] sm:$0xff] %v6332_v44  ;;  %v2511_v25 = vadd.f32 %v2371_v28, %v2188_v19  ;;  %2853 = vmatmul.f32.gmra.mxu2 %v6332_v44  ;;  %v3157_v16 = vrot.slane %v6332_v44, 1  ;;  %v2254_v19 = vrot.slane %v5306_v12, 2  ;;  %v2189_v28 = vadd.f32 %v8027_v9, %v1866_v58  ;;  %v6365_v32 = vpop.f32.mrf.mxu2  ;;  %v8032_v9 = vld [vmem:[#allocation45_spill] sm:$0xff] }
 0x31f   : > { %v2563_v24 = vadd.f32 %v6308_v10, %v2511_v25  ;;  %2418 = vmatmul.f32.gmra.mxu1 %v2311_v29  ;;  %v3250_v52 = vsel %vm1959_vm1, %v7797_v43, %v3157_v16 }
 0x320   : > { %3285 = vmatmul.f32.vlgmr.msra.gmra.mxu0 %v3250_v52  ;;  %v8030_v52 = vld [vmem:[#allocation91_spill] sm:$0xff] }
 0x321   : > { %v2611_v7 = vmax.f32 %v2563_v24, 0.0  ;;  %v2310_v24 = vsel %vm2282_vm4, %v2253_v39, %v2254_v19  ;;  %v1867_v44 = vadd.f32 %v8031_v35, %v8030_v52  ;;  %v8034_v39 = vld [vmem:[#allocation14_spill] sm:$0xff] }
 0x323   : > { %v6357_v40 = vmul.f32 %v2611_v7, %v8028_v51  ;;  %v6370_v7 = vpop.f32.mrf.mxu0 }
 0x324   : > { %v2374_v25 = vpop.f32.mrf.mxu1 }
 0x325   : > { %8029 = vst [vmem:[#allocation46_spill] sm:$0xff] %v6357_v40  ;;  %v2512_v29 = vadd.f32 %v2374_v25, %v2189_v28  ;;  %2856 = vmatmul.f32.gmra.mxu2 %v6357_v40  ;;  %v3158_v43 = vrot.slane %v6357_v40, 1  ;;  %v2255_v28 = vrot.slane %v8032_v9, 2  ;;  %v8033_v25 = vld [vmem:[#allocation60_spill] sm:$0xff] }
 0x326   : > { %v2190_v51 = vadd.f32 %v8033_v25, %v1867_v44  ;;  %v8038_v25 = vld [vmem:[#allocation64_spill] sm:$0xff] }
 0x327   : > { %v2564_v12 = vadd.f32 %v6308_v10, %v2512_v29  ;;  %2421 = vmatmul.f32.gmra.mxu1 %v2310_v24  ;;  %v3249_v58 = vsel %vm1959_vm1, %v3157_v16, %v3158_v43  ;;  %v2309_v16 = vsel %vm2282_vm4, %v2254_v19, %v2255_v28  ;;  %v8036_v24 = vld [vmem:[#allocation59_spill] sm:$0xff] }
 0x328   : > { %3288 = vmatmul.f32.gmra.mxu0 %v3249_v58  ;;  %v1868_v58 = vadd.f32 %v8036_v24, %v5684_v21  ;;  %v2256_v21 = vrot.slane %v5374_v48, 2  ;;  %v2813_v48 = vld [vmem:[%s7667_s6 + $0x60] sm:$0xff] }
 0x329   : > { %v2612_v50 = vmax.f32 %v2564_v12, 0.0  ;;  %2998 = vmatpush.msra.mxu3 %v2813_v48  ;;  %v8049_v48 = vld [vmem:[#allocation67_spill] sm:$0xff] }
 0x32b   : > { %v6375_v40 = vmul.f32 %v2612_v50, %v8034_v39  ;;  %v6386_v50 = vpop.f32.mrf.mxu2  ;;  %v6388_v9 = vpop.f32.mrf.mxu0  ;;  %v8039_v39 = vld [vmem:[#allocation16_spill] sm:$0xff] }
 0x32c   : > { %v2377_v35 = vpop.f32.mrf.mxu1  ;;  %8037 = vst [vmem:[#allocation37_spill] sm:$0xff] %v6388_v9 }
 0x32d   : > { %8035 = vst [vmem:[#allocation51_spill] sm:$0xff] %v6375_v40  ;;  %v2513_v52 = vadd.f32 %v2377_v35, %v2190_v51  ;;  %2859 = vmatmul.f32.gmra.mxu2 %v6375_v40  ;;  %v3159_v29 = vrot.slane %v6375_v40, 1  ;;  %v2191_v35 = vadd.f32 %v8038_v25, %v1868_v58  ;;  %v8043_v25 = vld [vmem:[#allocation52_spill] sm:$0xff] }
 0x32f   : > { %v2565_v12 = vadd.f32 %v6308_v10, %v2513_v52  ;;  %2424 = vmatmul.f32.gmra.mxu1 %v2309_v16  ;;  %v3248_v44 = vsel %vm1959_vm1, %v3158_v43, %v3159_v29  ;;  %v2308_v43 = vsel %vm2282_vm4, %v2255_v28, %v2256_v21  ;;  %v8041_v16 = vld [vmem:[#allocation98_spill] sm:$0xff]  ;;  %v8045_v28 = vld [vmem:[#allocation68_spill] sm:$0xff] }
 0x330   : > { %3291 = vmatmul.f32.gmra.mxu0 %v3248_v44 }
 0x331   : > { %v2613_v51 = vmax.f32 %v2565_v12, 0.0  ;;  %v8042_v12 = vld [vmem:[#allocation63_spill] sm:$0xff] }
 0x332   : > { %v1869_v44 = vadd.f32 %v8042_v12, %v8041_v16  ;;  %v8046_v16 = vld [vmem:[#allocation17_spill] sm:$0xff] }
 0x333   : > { %v6392_v40 = vmul.f32 %v2613_v51, %v8039_v39 }
 0x334   : > { %v2380_v19 = vpop.f32.mrf.mxu1  ;;  %v2192_v39 = vadd.f32 %v8045_v28, %v1869_v44  ;;  %v8050_v28 = vld [vmem:[#allocation74_spill] sm:$0xff] }
 0x335   : > { %8040 = vst [vmem:[#allocation49_spill] sm:$0xff] %v6392_v40  ;;  %v2514_v24 = vadd.f32 %v2380_v19, %v2191_v35  ;;  %2862 = vmatmul.f32.gmra.mxu2 %v6392_v40  ;;  %v3160_v52 = vrot.slane %v6392_v40, 1  ;;  %v2257_v35 = vrot.slane %v8043_v25, 2  ;;  %v6408_v19 = vpop.f32.mrf.mxu2  ;;  %v1870_v25 = vadd.f32 %v8049_v48, %v5731_v60 }
 0x336   : > { %8044 = vst [vmem:[#allocation56_spill] sm:$0xff] %v6408_v19 }
 0x337   : > { %v2566_v9 = vadd.f32 %v6308_v10, %v2514_v24  ;;  %2427 = vmatmul.f32.gmra.mxu1 %v2308_v43  ;;  %v3247_v58 = vsel %vm1959_vm1, %v3159_v29, %v3160_v52  ;;  %v6414_v24 = vpop.f32.mrf.mxu0 }
 0x338   : > { %3294 = vmatmul.f32.gmra.mxu0 %v3247_v58  ;;  %8048 = vst [vmem:[#allocation55_spill] sm:$0xff] %v6414_v24  ;;  %v2307_v58 = vsel %vm2282_vm4, %v2256_v21, %v2257_v35 }
 0x339   : > { %v2614_v51 = vmax.f32 %v2566_v9, 0.0 }
 0x33b   : > { %v6412_v12 = vmul.f32 %v2614_v51, %v8046_v16  ;;  %v8051_v16 = vld [vmem:[#allocation18_spill] sm:$0xff] }
 0x33c   : > { %v2383_v43 = vpop.f32.mrf.mxu1 }
 0x33d   : > { %8047 = vst [vmem:[#allocation91_spill] sm:$0xff] %v6412_v12  ;;  %v2515_v29 = vadd.f32 %v2383_v43, %v2192_v39  ;;  %2865 = vmatmul.f32.gmra.mxu2 %v6412_v12  ;;  %v3161_v9 = vrot.slane %v6412_v12, 1  ;;  %v2258_v39 = vrot.slane %v5420_v14, 2  ;;  %v2193_v43 = vadd.f32 %v8050_v28, %v1870_v25  ;;  %v6430_v21 = vpop.f32.mrf.mxu2  ;;  %v8053_v14 = vld [vmem:[#allocation73_spill] sm:$0xff]  ;;  %v8054_v25 = vld [vmem:[#allocation78_spill] sm:$0xff] }
 0x33f   : > { %v2567_v40 = vadd.f32 %v6308_v10, %v2515_v29  ;;  %2430 = vmatmul.f32.gmra.mxu1 %v2307_v58  ;;  %v3246_v44 = vsel %vm1959_vm1, %v3160_v52, %v3161_v9  ;;  %v6434_v29 = vpop.f32.mrf.mxu0  ;;  %v1871_v52 = vadd.f32 %v8053_v14, %v5752_v26 }
 0x340   : > { %3297 = vmatmul.f32.gmra.mxu0 %v3246_v44 }
 0x341   : > { %v2615_v51 = vmax.f32 %v2567_v40, 0.0  ;;  %v2306_v40 = vsel %vm2282_vm4, %v2257_v35, %v2258_v39  ;;  %v2194_v44 = vadd.f32 %v8054_v25, %v1871_v52 }
 0x343   : > { %v6428_v12 = vmul.f32 %v2615_v51, %v8051_v16  ;;  %v8055_v51 = vld [vmem:[#allocation19_spill] sm:$0xff]  ;;  %v8057_v16 = vld [vmem:[#allocation58_spill] sm:$0xff] }
 0x344   : > { %v2386_v24 = vpop.f32.mrf.mxu1 }
 0x345   : > { %8052 = vst [vmem:[#allocation45_spill] sm:$0xff] %v6428_v12  ;;  %v2516_v19 = vadd.f32 %v2386_v24, %v2193_v43  ;;  %2868 = vmatmul.f32.gmra.mxu2 %v6428_v12  ;;  %v3162_v60 = vrot.slane %v6428_v12, 1  ;;  %v2259_v12 = vrot.slane %v8057_v16, 2  ;;  %v6454_v14 = vpop.f32.mrf.mxu2 }
 0x347   : > { %v2568_v58 = vadd.f32 %v6308_v10, %v2516_v19  ;;  %2433 = vmatmul.f32.gmra.mxu1 %v2306_v40  ;;  %v3245_v48 = vsel %vm1959_vm1, %v3161_v9, %v3162_v60  ;;  %v2305_v19 = vsel %vm2282_vm4, %v2258_v39, %v2259_v12  ;;  %v8058_v9 = vld [vmem:[#allocation77_spill] sm:$0xff]  ;;  %v6459_v16 = vpop.f32.mrf.mxu0  ;;  %v8059_v39 = vld [vmem:[#allocation62_spill] sm:$0xff] }
 0x348   : > { %3300 = vmatmul.f32.gmra.mxu0 %v3245_v48  ;;  %v1872_v40 = vadd.f32 %v8058_v9, %v5777_v0  ;;  %v2260_v25 = vrot.slane %v8059_v39, 2  ;;  %v8060_v0 = vld [vmem:[#allocation82_spill] sm:$0xff] }
 0x349   : > { %v2616_v24 = vmax.f32 %v2568_v58, 0.0 }
 0x34b   : > { %v6445_v28 = vmul.f32 %v2616_v24, %v8055_v51  ;;  %v2812_v24 = vld [vmem:[%s7667_s6 + $0x58] sm:$0xff] }
 0x34c   : > { %v2389_v43 = vpop.f32.mrf.mxu1  ;;  %2999 = vmatpush.msra.mxu3 %v2812_v24 }
 0x34d   : > { %8056 = vst [vmem:[#allocation60_spill] sm:$0xff] %v6445_v28  ;;  %v2517_v35 = vadd.f32 %v2389_v43, %v2194_v44  ;;  %2871 = vmatmul.f32.gmra.mxu2 %v6445_v28  ;;  %v3163_v26 = vrot.slane %v6445_v28, 1  ;;  %v2195_v44 = vadd.f32 %v8060_v0, %v1872_v40  ;;  %v8061_v43 = vld [vmem:[#allocation20_spill] sm:$0xff] }
 0x34f   : > { %v2569_v52 = vadd.f32 %v6308_v10, %v2517_v35  ;;  %2436 = vmatmul.f32.gmra.mxu1 %v2305_v19  ;;  %v3244_v58 = vsel %vm1959_vm1, %v3162_v60, %v3163_v26  ;;  %v6480_v0 = vpop.f32.mrf.mxu0 }
 0x350   : > { %3303 = vmatmul.f32.gmra.mxu0 %v3244_v58  ;;  %v8063_v58 = vld [vmem:[#allocation81_spill] sm:$0xff]  ;;  %8064 = vst [vmem:[#allocation64_spill] sm:$0xff] %v6480_v0  ;;  %v8073_v0 = vld [vmem:[#allocation70_spill] sm:$0xff] }
 0x351   : > { %v2617_v48 = vmax.f32 %v2569_v52, 0.0  ;;  %v2304_v52 = vsel %vm2282_vm4, %v2259_v12, %v2260_v25  ;;  %v1873_v51 = vadd.f32 %v8063_v58, %v5803_v11  ;;  %v8067_v12 = vld [vmem:[#allocation21_spill] sm:$0xff] }
 0x353   : > { %v6467_v9 = vmul.f32 %v2617_v48, %v8061_v43  ;;  %v6478_v48 = vpop.f32.mrf.mxu2  ;;  %v8066_v43 = vld [vmem:[#allocation86_spill] sm:$0xff] }
 0x354   : > { %v2392_v35 = vpop.f32.mrf.mxu1 }
 0x355   : > { %8062 = vst [vmem:[#allocation59_spill] sm:$0xff] %v6467_v9  ;;  %v2518_v19 = vadd.f32 %v2392_v35, %v2195_v44  ;;  %2874 = vmatmul.f32.gmra.mxu2 %v6467_v9  ;;  %v3164_v60 = vrot.slane %v6467_v9, 1  ;;  %v8065_v44 = vld [vmem:[#allocation66_spill] sm:$0xff]  ;;  %v2196_v9 = vadd.f32 %v8066_v43, %v1873_v51 }
 0x356   : > { %v2261_v35 = vrot.slane %v8065_v44, 2 }
 0x357   : > { %v2570_v39 = vadd.f32 %v6308_v10, %v2518_v19  ;;  %2439 = vmatmul.f32.gmra.mxu1 %v2304_v52  ;;  %v3243_v40 = vsel %vm1959_vm1, %v3163_v26, %v3164_v60  ;;  %v8069_v52 = vld [vmem:[#allocation84_spill] sm:$0xff] }
 0x358   : > { %3306 = vmatmul.f32.gmra.mxu0 %v3243_v40  ;;  %v2303_v26 = vsel %vm2282_vm4, %v2260_v25, %v2261_v35 }
 0x359   : > { %v2618_v24 = vmax.f32 %v2570_v39, 0.0  ;;  %v1874_v39 = vadd.f32 %v8069_v52, %v5824_v53  ;;  %v2262_v53 = vrot.slane %v8073_v0, 2  ;;  %v2811_v0 = vld [vmem:[%s7667_s6 + $0x50] sm:$0xff] }
 0x35a   : > { %3000 = vmatpush.msra.mxu3 %v2811_v0 }
 0x35b   : > { %v6485_v28 = vmul.f32 %v2618_v24, %v8067_v12  ;;  %v6496_v24 = vpop.f32.mrf.mxu2 }
 0x35c   : > { %v2395_v11 = vpop.f32.mrf.mxu1 }
 0x35d   : > { %8068 = vst [vmem:[#allocation98_spill] sm:$0xff] %v6485_v28  ;;  %v2519_v58 = vadd.f32 %v2395_v11, %v2196_v9  ;;  %2877 = vmatmul.f32.gmra.mxu2 %v6485_v28  ;;  %v3165_v19 = vrot.slane %v6485_v28, 1  ;;  %v8070_v9 = vld [vmem:[#allocation90_spill] sm:$0xff]  ;;  %v6502_v28 = vpop.f32.mrf.mxu0 }
 0x35e   : > { %v2197_v44 = vadd.f32 %v8070_v9, %v1874_v39  ;;  %v8071_v11 = vld [vmem:[#allocation22_spill] sm:$0xff]  ;;  %v8075_v9 = vld [vmem:[#allocation72_spill] sm:$0xff] }
 0x35f   : > { %v2571_v40 = vadd.f32 %v6308_v10, %v2519_v58  ;;  %2442 = vmatmul.f32.gmra.mxu1 %v2303_v26  ;;  %v3242_v51 = vsel %vm1959_vm1, %v3164_v60, %v3165_v19  ;;  %v2302_v60 = vsel %vm2282_vm4, %v2261_v35, %v2262_v53  ;;  %v8074_v26 = vld [vmem:[#allocation89_spill] sm:$0xff] }
 0x360   : > { %3309 = vmatmul.f32.gmra.mxu0 %v3242_v51 }
 0x361   : > { %v2619_v43 = vmax.f32 %v2571_v40, 0.0  ;;  %v1875_v40 = vadd.f32 %v8074_v26, %v5845_v31 }
 0x363   : > { %v6500_v12 = vmul.f32 %v2619_v43, %v8071_v11  ;;  %v8077_v11 = vld [vmem:[#allocation23_spill] sm:$0xff] }
 0x364   : > { %v2398_v25 = vpop.f32.mrf.mxu1 }
 0x365   : > { %8072 = vst [vmem:[#allocation63_spill] sm:$0xff] %v6500_v12  ;;  %v2520_v52 = vadd.f32 %v2398_v25, %v2197_v44  ;;  %2880 = vmatmul.f32.gmra.mxu2 %v6500_v12  ;;  %v3166_v58 = vrot.slane %v6500_v12, 1  ;;  %v2263_v44 = vrot.slane %v8075_v9, 2  ;;  %v8076_v25 = vld [vmem:[#allocation95_spill] sm:$0xff]  ;;  %v6526_v26 = vpop.f32.mrf.mxu0 }
 0x366   : > { %v2198_v35 = vadd.f32 %v8076_v25, %v1875_v40  ;;  %8080 = vst [vmem:[#allocation67_spill] sm:$0xff] %v6526_v26  ;;  %v8082_v25 = vld [vmem:[#allocation76_spill] sm:$0xff] }
 0x367   : > { %v2572_v39 = vadd.f32 %v6308_v10, %v2520_v52  ;;  %2445 = vmatmul.f32.gmra.mxu1 %v2302_v60  ;;  %v3241_v51 = vsel %vm1959_vm1, %v3165_v19, %v3166_v58  ;;  %v6522_v52 = vpop.f32.mrf.mxu2 }
 0x368   : > { %3312 = vmatmul.f32.gmra.mxu0 %v3241_v51  ;;  %8079 = vst [vmem:[#allocation68_spill] sm:$0xff] %v6522_v52  ;;  %v8081_v51 = vld [vmem:[#allocation94_spill] sm:$0xff] }
 0x369   : > { %v2620_v43 = vmax.f32 %v2572_v39, 0.0  ;;  %v2301_v39 = vsel %vm2282_vm4, %v2262_v53, %v2263_v44  ;;  %v1876_v0 = vadd.f32 %v8081_v51, %v5871_v34 }
 0x36b   : > { %v6520_v12 = vmul.f32 %v2620_v43, %v8077_v11 }
 0x36c   : > { %v2401_v31 = vpop.f32.mrf.mxu1 }
 0x36d   : > { %8078 = vst [vmem:[#allocation52_spill] sm:$0xff] %v6520_v12  ;;  %v2521_v60 = vadd.f32 %v2401_v31, %v2198_v35  ;;  %2883 = vmatmul.f32.gmra.mxu2 %v6520_v12  ;;  %v3167_v19 = vrot.slane %v6520_v12, 1  ;;  %v2264_v35 = vrot.slane %v8082_v25, 2  ;;  %v8083_v31 = vld [vmem:[#allocation99_spill] sm:$0xff]  ;;  %v8084_v12 = vld [vmem:[#allocation24_spill] sm:$0xff]  ;;  %v8088_v25 = vld [vmem:[#allocation25_spill] sm:$0xff] }
 0x36e   : > { %v2199_v11 = vadd.f32 %v8083_v31, %v1876_v0 }
 0x36f   : > { %v2573_v40 = vadd.f32 %v6308_v10, %v2521_v60  ;;  %2448 = vmatmul.f32.gmra.mxu1 %v2301_v39  ;;  %v3240_v43 = vsel %vm1959_vm1, %v3166_v58, %v3167_v19  ;;  %v2300_v60 = vsel %vm2282_vm4, %v2263_v44, %v2264_v35  ;;  %v8086_v58 = vld [vmem:[#allocation97_spill] sm:$0xff]  ;;  %v6546_v51 = vpop.f32.mrf.mxu2 }
 0x370   : > { %3315 = vmatmul.f32.gmra.mxu0 %v3240_v43  ;;  %v1877_v39 = vadd.f32 %v8086_v58, %v5892_v4  ;;  %v6551_v43 = vpop.f32.mrf.mxu0 }
 0x371   : > { %v2621_v9 = vmax.f32 %v2573_v40, 0.0 }
 0x373   : > { %v6538_v26 = vmul.f32 %v2621_v9, %v8084_v12  ;;  %v8090_v12 = vld [vmem:[#allocation80_spill] sm:$0xff] }
 0x374   : > { %v2404_v52 = vpop.f32.mrf.mxu1  ;;  %v2265_v4 = vrot.slane %v8090_v12, 2 }
 0x375   : > { %8085 = vst [vmem:[#allocation74_spill] sm:$0xff] %v6538_v26  ;;  %v2522_v53 = vadd.f32 %v2404_v52, %v2199_v11  ;;  %2886 = vmatmul.f32.gmra.mxu2 %v6538_v26  ;;  %v3168_v34 = vrot.slane %v6538_v26, 1  ;;  %v8087_v52 = vld [vmem:[#allocation104_spill] sm:$0xff] }
 0x376   : > { %v2200_v9 = vadd.f32 %v8087_v52, %v1877_v39  ;;  %v2810_v52 = vld [vmem:[%s7667_s6 + $0x48] sm:$0xff] }
 0x377   : > { %v2574_v40 = vadd.f32 %v6308_v10, %v2522_v53  ;;  %2451 = vmatmul.f32.gmra.mxu1 %v2300_v60  ;;  %v3239_v0 = vsel %vm1959_vm1, %v3167_v19, %v3168_v34  ;;  %v2299_v19 = vsel %vm2282_vm4, %v2264_v35, %v2265_v4  ;;  %v8091_v60 = vld [vmem:[#allocation103_spill] sm:$0xff]  ;;  %v2266_v35 = vrot.slane %v5606_v61, 2  ;;  %3001 = vmatpush.msra.mxu3 %v2810_v52 }
 0x378   : > { %3318 = vmatmul.f32.gmra.mxu0 %v3239_v0  ;;  %v1878_v0 = vadd.f32 %v8091_v60, %v5917_v18  ;;  %v8092_v18 = vld [vmem:[#allocation109_spill] sm:$0xff]  ;;  %v8096_v52 = vld [vmem:[#allocation87_spill] sm:$0xff] }
 0x379   : > { %v2622_v11 = vmax.f32 %v2574_v40, 0.0 }
 0x37b   : > { %v6555_v31 = vmul.f32 %v2622_v11, %v8088_v25  ;;  %v6567_v11 = vpop.f32.mrf.mxu2  ;;  %v8095_v25 = vld [vmem:[#allocation108_spill] sm:$0xff] }
 0x37c   : > { %v2407_v44 = vpop.f32.mrf.mxu1 }
 0x37d   : > { %8089 = vst [vmem:[#allocation73_spill] sm:$0xff] %v6555_v31  ;;  %v2523_v58 = vadd.f32 %v2407_v44, %v2200_v9  ;;  %2889 = vmatmul.f32.gmra.mxu2 %v6555_v31  ;;  %v3169_v53 = vrot.slane %v6555_v31, 1  ;;  %v6572_v9 = vpop.f32.mrf.mxu0  ;;  %v2201_v44 = vadd.f32 %v8092_v18, %v1878_v0  ;;  %v1879_v31 = vadd.f32 %v8095_v25, %v5939_v54 }
 0x37e   : > { %v2267_v18 = vrot.slane %v8096_v52, 2  ;;  %v8102_v52 = vld [vmem:[#allocation116_spill] sm:$0xff] }
 0x37f   : > { %v2575_v40 = vadd.f32 %v6308_v10, %v2523_v58  ;;  %2454 = vmatmul.f32.gmra.mxu1 %v2299_v19  ;;  %v3238_v39 = vsel %vm1959_vm1, %v3168_v34, %v3169_v53  ;;  %v8093_v58 = vld [vmem:[#allocation27_spill] sm:$0xff] }
 0x380   : > { %3321 = vmatmul.f32.gmra.mxu0 %v3238_v39  ;;  %v2298_v39 = vsel %vm2282_vm4, %v2265_v4, %v2266_v35 }
 0x381   : > { %v2623_v12 = vmax.f32 %v2575_v40, 0.0 }
 0x383   : > { %v6577_v19 = vmul.f32 %v2623_v12, %v8093_v58 }
 0x384   : > { %v2410_v60 = vpop.f32.mrf.mxu1 }
 0x385   : > { %8094 = vst [vmem:[#allocation78_spill] sm:$0xff] %v6577_v19  ;;  %v2524_v34 = vadd.f32 %v2410_v60, %v2201_v44  ;;  %2892 = vmatmul.f32.gmra.mxu2 %v6577_v19  ;;  %v3170_v40 = vrot.slane %v6577_v19, 1  ;;  %v6589_v44 = vpop.f32.mrf.mxu2  ;;  %v8097_v60 = vld [vmem:[#allocation112_spill] sm:$0xff]  ;;  %v6595_v4 = vpop.f32.mrf.mxu0 }
 0x386   : > { %v2202_v58 = vadd.f32 %v8097_v60, %v1879_v31  ;;  %v8098_v19 = vld [vmem:[#allocation28_spill] sm:$0xff]  ;;  %8100 = vst [vmem:[#allocation77_spill] sm:$0xff] %v6595_v4 }
 0x387   : > { %v2576_v61 = vadd.f32 %v6308_v10, %v2524_v34  ;;  %2457 = vmatmul.f32.gmra.mxu1 %v2298_v39  ;;  %v3237_v0 = vsel %vm1959_vm1, %v3169_v53, %v3170_v40  ;;  %v2297_v53 = vsel %vm2282_vm4, %v2266_v35, %v2267_v18  ;;  %v8101_v39 = vld [vmem:[#allocation111_spill] sm:$0xff] }
 0x388   : > { %3324 = vmatmul.f32.gmra.mxu0 %v3237_v0 }
 0x389   : > { %v2624_v12 = vmax.f32 %v2576_v61, 0.0  ;;  %v1880_v61 = vadd.f32 %v8101_v39, %v5953_v3 }
 0x38b   : > { %v6593_v26 = vmul.f32 %v2624_v12, %v8098_v19  ;;  %v2203_v60 = vadd.f32 %v8102_v52, %v1880_v61  ;;  %v8107_v52 = vld [vmem:[#allocation30_spill] sm:$0xff] }
 0x38c   : > { %v2413_v54 = vpop.f32.mrf.mxu1 }
 0x38d   : > { %8099 = vst [vmem:[#allocation58_spill] sm:$0xff] %v6593_v26  ;;  %v2525_v25 = vadd.f32 %v2413_v54, %v2202_v58  ;;  %2895 = vmatmul.f32.gmra.mxu2 %v6593_v26  ;;  %v3171_v34 = vrot.slane %v6593_v26, 1  ;;  %v2268_v58 = vrot.slane %v5648_v45, 2  ;;  %v8103_v54 = vld [vmem:[#allocation29_spill] sm:$0xff]  ;;  %v6611_v35 = vpop.f32.mrf.mxu2  ;;  %v8105_v45 = vld [vmem:[#allocation115_spill] sm:$0xff] }
 0x38f   : > { %v2577_v0 = vadd.f32 %v6308_v10, %v2525_v25  ;;  %2460 = vmatmul.f32.gmra.mxu1 %v2297_v53  ;;  %v3236_v31 = vsel %vm1959_vm1, %v3170_v40, %v3171_v34  ;;  %v6615_v25 = vpop.f32.mrf.mxu0  ;;  %v2296_v40 = vsel %vm2282_vm4, %v2267_v18, %v2268_v58  ;;  %v1881_v53 = vadd.f32 %v8105_v45, %v5967_v20 }
 0x390   : > { %3327 = vmatmul.f32.gmra.mxu0 %v3236_v31  ;;  %v2809_v31 = vld [vmem:[%s7667_s6 + $0x40] sm:$0xff] }
 0x391   : > { %v2625_v12 = vmax.f32 %v2577_v0, 0.0  ;;  %v6624_v0 = vpop.f32.mrf.mxu3  ;;  %3002 = vmatpush.msra.mxu3 %v2809_v31 }
 0x393   : > { %v6609_v19 = vmul.f32 %v2625_v12, %v8103_v54  ;;  %v8106_v12 = vld [vmem:[#allocation119_spill] sm:$0xff] }
 0x394   : > { %v2416_v26 = vpop.f32.mrf.mxu1  ;;  %v2204_v18 = vadd.f32 %v8106_v12, %v1881_v53 }
 0x395   : > { %8104 = vst [vmem:[#allocation62_spill] sm:$0xff] %v6609_v19  ;;  %v2526_v4 = vadd.f32 %v2416_v26, %v2203_v60  ;;  %2898 = vmatmul.f32.gmra.mxu2 %v6609_v19  ;;  %v3172_v3 = vrot.slane %v6609_v19, 1  ;;  %v6640_v31 = vpop.f32.mrf.mxu2 }
 0x397   : > { %v2578_v39 = vadd.f32 %v6308_v10, %v2526_v4  ;;  %2463 = vmatmul.f32.gmra.mxu1 %v2296_v40  ;;  %v3235_v61 = vsel %vm1959_vm1, %v3171_v34, %v3172_v3  ;;  %v8109_v4 = vld [vmem:[#allocation93_spill] sm:$0xff]  ;;  %v6645_v12 = vpop.f32.mrf.mxu0 }
 0x398   : > { %3330 = vmatmul.f32.gmra.mxu0 %v3235_v61  ;;  %v2269_v40 = vrot.slane %v8109_v4, 2  ;;  %v8110_v61 = vld [vmem:[#allocation117_spill] sm:$0xff]  ;;  %8111 = vst [vmem:[#allocation81_spill] sm:$0xff] %v6645_v12  ;;  %v2270_v4 = vrot.slane %v5697_v47, 2 }
 0x399   : > { %v2626_v26 = vmax.f32 %v2578_v39, 0.0  ;;  %v1882_v54 = vadd.f32 %v8110_v61, %v5986_v38 }
 0x39a   : > { %v2295_v39 = vsel %vm2282_vm4, %v2268_v58, %v2269_v40  ;;  %v8112_v58 = vld [vmem:[#allocation123_spill] sm:$0xff] }
 0x39b   : > { %v6631_v60 = vmul.f32 %v2626_v26, %v8107_v52  ;;  %v2205_v52 = vadd.f32 %v8112_v58, %v1882_v54  ;;  %v8118_v58 = vld [vmem:[#allocation126_spill] sm:$0xff] }
 0x39c   : > { %v2419_v20 = vpop.f32.mrf.mxu1 }
 0x39d   : > { %8108 = vst [vmem:[#allocation82_spill] sm:$0xff] %v6631_v60  ;;  %v2527_v45 = vadd.f32 %v2419_v20, %v2204_v18  ;;  %2901 = vmatmul.f32.gmra.mxu2 %v6631_v60  ;;  %v3173_v34 = vrot.slane %v6631_v60, 1  ;;  %v6647_v20 = vpop.f32.mrf.mxu3  ;;  %v8113_v60 = vld [vmem:[#allocation31_spill] sm:$0xff] }
 0x39f   : > { %v2579_v53 = vadd.f32 %v6308_v10, %v2527_v45  ;;  %2466 = vmatmul.f32.gmra.mxu1 %v2295_v39  ;;  %v3234_v26 = vsel %vm1959_vm1, %v3172_v3, %v3173_v34  ;;  %v2294_v3 = vsel %vm2282_vm4, %v2269_v40, %v2270_v4  ;;  %v8115_v39 = vld [vmem:[#allocation122_spill] sm:$0xff] }
 0x3a0   : > { %3333 = vmatmul.f32.gmra.mxu0 %v3234_v26  ;;  %v6660_v26 = vpop.f32.mrf.mxu2 }
 0x3a1   : > { %v2627_v18 = vmax.f32 %v2579_v53, 0.0  ;;  %v1883_v53 = vadd.f32 %v8115_v39, %v5992_v42  ;;  %8116 = vst [vmem:[#allocation86_spill] sm:$0xff] %v6660_v26  ;;  %v8121_v39 = vld [vmem:[#allocation101_spill] sm:$0xff] }
 0x3a2   : > { %v2271_v26 = vrot.slane %v8121_v39, 2 }
 0x3a3   : > { %v6652_v38 = vmul.f32 %v2627_v18, %v8113_v60  ;;  %v6665_v18 = vpop.f32.mrf.mxu0  ;;  %v8119_v60 = vld [vmem:[#allocation34_spill] sm:$0xff] }
 0x3a4   : > { %v2422_v61 = vpop.f32.mrf.mxu1  ;;  %8117 = vst [vmem:[#allocation84_spill] sm:$0xff] %v6665_v18 }
 0x3a5   : > { %8114 = vst [vmem:[#allocation66_spill] sm:$0xff] %v6652_v38  ;;  %v2528_v19 = vadd.f32 %v2422_v61, %v2205_v52  ;;  %2904 = vmatmul.f32.gmra.mxu2 %v6652_v38  ;;  %v3174_v45 = vrot.slane %v6652_v38, 1  ;;  %v2206_v61 = vadd.f32 %v8118_v58, %v1883_v53  ;;  %v6671_v40 = vpop.f32.mrf.mxu3 }
 0x3a7   : > { %v2580_v47 = vadd.f32 %v6308_v10, %v2528_v19  ;;  %2469 = vmatmul.f32.gmra.mxu1 %v2294_v3  ;;  %v3233_v54 = vsel %vm1959_vm1, %v3173_v34, %v3174_v45  ;;  %v2293_v34 = vsel %vm2282_vm4, %v2270_v4, %v2271_v26  ;;  %v8122_v3 = vld [vmem:[#allocation125_spill] sm:$0xff] }
 0x3a8   : > { %3336 = vmatmul.f32.gmra.mxu0 %v3233_v54  ;;  %v8125_v4 = vld [vmem:[#allocation105_spill] sm:$0xff] }
 0x3a9   : > { %v2628_v52 = vmax.f32 %v2580_v47, 0.0  ;;  %v1884_v47 = vadd.f32 %v8122_v3, %v6002_v56  ;;  %v2272_v39 = vrot.slane %v8125_v4, 2  ;;  %v8126_v56 = vld [vmem:[#allocation130_spill] sm:$0xff] }
 0x3ab   : > { %v6669_v38 = vmul.f32 %v2628_v52, %v8119_v60  ;;  %v6683_v52 = vpop.f32.mrf.mxu2  ;;  %v2207_v3 = vadd.f32 %v8126_v56, %v1884_v47 }
 0x3ac   : > { %v2425_v42 = vpop.f32.mrf.mxu1  ;;  %8123 = vst [vmem:[#allocation70_spill] sm:$0xff] %v6683_v52  ;;  %v8129_v52 = vld [vmem:[#allocation129_spill] sm:$0xff] }
 0x3ad   : > { %8120 = vst [vmem:[#allocation90_spill] sm:$0xff] %v6669_v38  ;;  %v2529_v12 = vadd.f32 %v2425_v42, %v2206_v61  ;;  %2907 = vmatmul.f32.gmra.mxu2 %v6669_v38  ;;  %v3175_v19 = vrot.slane %v6669_v38, 1  ;;  %v2808_v61 = vld [vmem:[%s7667_s6 + $0x38] sm:$0xff]  ;;  %v6688_v42 = vpop.f32.mrf.mxu0  ;;  %v2292_v38 = vsel %vm2282_vm4, %v2271_v26, %v2272_v39  ;;  %v1885_v4 = vadd.f32 %v8129_v52, %v6013_v2 }
 0x3ae   : > { %8124 = vst [vmem:[#allocation89_spill] sm:$0xff] %v6688_v42  ;;  %3003 = vmatpush.msra.mxu3 %v2808_v61  ;;  %v8132_v42 = vld [vmem:[#allocation44_spill] sm:$0xff] }
 0x3af   : > { %v2581_v53 = vadd.f32 %v6308_v10, %v2529_v12  ;;  %2472 = vmatmul.f32.gmra.mxu1 %v2293_v34  ;;  %v3232_v54 = vsel %vm1959_vm1, %v3174_v45, %v3175_v19  ;;  %v8127_v12 = vld [vmem:[#allocation38_spill] sm:$0xff] }
 0x3b0   : > { %3339 = vmatmul.f32.gmra.mxu0 %v3232_v54  ;;  %v6697_v54 = vpop.f32.mrf.mxu3 }
 0x3b1   : > { %v2629_v58 = vmax.f32 %v2581_v53, 0.0 }
 0x3b3   : > { %v6693_v34 = vmul.f32 %v2629_v58, %v8127_v12  ;;  %v8130_v58 = vld [vmem:[#allocation107_spill] sm:$0xff]  ;;  %v8131_v12 = vld [vmem:[#allocation132_spill] sm:$0xff] }
 0x3b4   : > { %v2428_v60 = vpop.f32.mrf.mxu1  ;;  %v2273_v56 = vrot.slane %v8130_v58, 2  ;;  %v8135_v58 = vld [vmem:[#allocation133_spill] sm:$0xff] }
 0x3b5   : > { %8128 = vst [vmem:[#allocation72_spill] sm:$0xff] %v6693_v34  ;;  %v2530_v45 = vadd.f32 %v2428_v60, %v2207_v3  ;;  %2910 = vmatmul.f32.gmra.mxu2 %v6693_v34  ;;  %v3176_v53 = vrot.slane %v6693_v34, 1  ;;  %v6707_v3 = vpop.f32.mrf.mxu2  ;;  %v2208_v34 = vadd.f32 %v8131_v12, %v1885_v4  ;;  %v6713_v26 = vpop.f32.mrf.mxu0 }
 0x3b7   : > { %v2582_v61 = vadd.f32 %v6308_v10, %v2530_v45  ;;  %2475 = vmatmul.f32.gmra.mxu1 %v2292_v38  ;;  %v3231_v47 = vsel %vm1959_vm1, %v3175_v19, %v3176_v53  ;;  %v2291_v19 = vsel %vm2282_vm4, %v2272_v39, %v2273_v56  ;;  %v8134_v45 = vld [vmem:[#allocation131_spill] sm:$0xff] }
 0x3b8   : > { %3342 = vmatmul.f32.gmra.mxu0 %v3231_v47  ;;  %v6724_v4 = vpop.f32.mrf.mxu3 }
 0x3b9   : > { %v2630_v60 = vmax.f32 %v2582_v61, 0.0  ;;  %v1886_v61 = vadd.f32 %v8134_v45, %v6019_v46  ;;  %v2274_v46 = vrot.slane %v5795_v22, 2 }
 0x3bb   : > { %v6711_v18 = vmul.f32 %v2630_v60, %v8132_v42  ;;  %v1614_v60 = vadd.f32 %v6122_v41, %v6021_v6  ;;  %v8136_v42 = vld [vmem:[#allocation48_spill] sm:$0xff]  ;;  %v2290_v6 = vsel %vm2282_vm4, %v2273_v56, %v2274_v46 }
 0x3bc   : > { %v2431_v2 = vpop.f32.mrf.mxu1 }
 0x3bd   : > { %8133 = vst [vmem:[#allocation95_spill] sm:$0xff] %v6711_v18  ;;  %v2531_v52 = vadd.f32 %v2431_v2, %v2208_v34  ;;  %2913 = vmatmul.f32.gmra.mxu2 %v6711_v18  ;;  %v3177_v38 = vrot.slane %v6711_v18, 1  ;;  %v2209_v2 = vadd.f32 %v8135_v58, %v1886_v61  ;;  %v6737_v45 = vpop.f32.mrf.mxu0  ;;  %v1887_v41 = vadd.f32 %v6624_v0, %v1614_v60  ;;  %v8137_v60 = vld [vmem:[#allocation50_spill] sm:$0xff] }
 0x3be   : > { %v1617_v0 = vadd.f32 %v6130_v33, %v6031_v5 }
 0x3bf   : > { %v2583_v47 = vadd.f32 %v6308_v10, %v2531_v52  ;;  %2478 = vmatmul.f32.gmra.mxu1 %v2291_v19  ;;  %v3230_v12 = vsel %vm1959_vm1, %v3176_v53, %v3177_v38  ;;  %v6733_v52 = vpop.f32.mrf.mxu2  ;;  %v2210_v56 = vadd.f32 %v6132_v1, %v1887_v41 }
 0x3c0   : > { %3345 = vmatmul.f32.gmra.mxu0 %v3230_v12  ;;  %v6748_v12 = vpop.f32.mrf.mxu3 }
 0x3c1   : > { %v2631_v34 = vmax.f32 %v2583_v47, 0.0 }
 0x3c3   : > { %v6730_v39 = vmul.f32 %v2631_v34, %v8136_v42  ;;  %v2275_v34 = vrot.slane %v5814_v17, 2  ;;  %v1888_v17 = vadd.f32 %v6647_v20, %v1617_v0  ;;  %v8139_v20 = vld [vmem:[#allocation54_spill] sm:$0xff]  ;;  %v8153_v42 = vld [vmem:[#allocation128_spill] sm:$0xff] }
 0x3c4   : > { %v2434_v18 = vpop.f32.mrf.mxu1 }
 0x3c5   : > { %v2532_v19 = vadd.f32 %v2434_v18, %v2209_v2  ;;  %2916 = vmatmul.f32.gmra.mxu2 %v6730_v39  ;;  %v3178_v53 = vrot.slane %v6730_v39, 1  ;;  %v2807_v18 = vld [vmem:[%s7667_s6 + $0x30] sm:$0xff]  ;;  %v6767_v1 = vpop.f32.mrf.mxu0 }
 0x3c6   : > { %3004 = vmatpush.msra.mxu3 %v2807_v18 }
 0x3c7   : > { %v2584_v61 = vadd.f32 %v6308_v10, %v2532_v19  ;;  %2481 = vmatmul.f32.gmra.mxu1 %v2290_v6  ;;  %v3229_v22 = vsel %vm1959_vm1, %v3177_v38, %v3178_v53  ;;  %v2289_v6 = vsel %vm2282_vm4, %v2274_v46, %v2275_v34  ;;  %v2211_v46 = vadd.f32 %v6143_v62, %v1888_v17 }
 0x3c8   : > { %3348 = vmatmul.f32.gmra.mxu0 %v3229_v22  ;;  %v2276_v22 = vrot.slane %v5837_v55, 2 }
 0x3c9   : > { %v2632_v47 = vmax.f32 %v2584_v61, 0.0  ;;  %v6762_v61 = vpop.f32.mrf.mxu2 }
 0x3cb   : > { %v6755_v58 = vmul.f32 %v2632_v47, %v8137_v60  ;;  %v8138_v47 = vld [vmem:[#allocation134_spill] sm:$0xff] }
 0x3cc   : > { %v2437_v38 = vpop.f32.mrf.mxu1  ;;  %v1620_v18 = vadd.f32 %v6141_v27, %v8138_v47 }
 0x3cd   : > { %v2533_v2 = vadd.f32 %v2437_v38, %v2210_v56  ;;  %2919 = vmatmul.f32.gmra.mxu2 %v6755_v58  ;;  %v3179_v19 = vrot.slane %v6755_v58, 1  ;;  %v6776_v56 = vpop.f32.mrf.mxu3 }
 0x3ce   : > { %v1889_v55 = vadd.f32 %v6671_v40, %v1620_v18  ;;  %v8141_v18 = vld [vmem:[#allocation120_spill] sm:$0xff] }
 0x3cf   : > { %v2585_v5 = vadd.f32 %v6308_v10, %v2533_v2  ;;  %2484 = vmatmul.f32.gmra.mxu1 %v2289_v6  ;;  %v3228_v33 = vsel %vm1959_vm1, %v3178_v53, %v3179_v19  ;;  %v2288_v6 = vsel %vm2282_vm4, %v2275_v34, %v2276_v22  ;;  %v8140_v34 = vld [vmem:[#allocation57_spill] sm:$0xff] }
 0x3d0   : > { %3351 = vmatmul.f32.gmra.mxu0 %v3228_v33  ;;  %v6788_v33 = vpop.f32.mrf.mxu0  ;;  %v2212_v47 = vadd.f32 %v6161_v49, %v1889_v55 }
 0x3d1   : > { %v2633_v41 = vmax.f32 %v2585_v5, 0.0  ;;  %v6786_v17 = vpop.f32.mrf.mxu2 }
 0x3d3   : > { %v6774_v0 = vmul.f32 %v2633_v41, %v8139_v20  ;;  %v1623_v41 = vadd.f32 %v6156_v8, %v6048_v30  ;;  %v8151_v20 = vld [vmem:[#allocation69_spill] sm:$0xff] }
 0x3d4   : > { %v2440_v38 = vpop.f32.mrf.mxu1 }
 0x3d5   : > { %v2534_v2 = vadd.f32 %v2440_v38, %v2211_v46  ;;  %2922 = vmatmul.f32.gmra.mxu2 %v6774_v0  ;;  %v3180_v53 = vrot.slane %v6774_v0, 1  ;;  %v2277_v38 = vrot.slane %v8141_v18, 2  ;;  %v1890_v30 = vadd.f32 %v6697_v54, %v1623_v41  ;;  %v8143_v41 = vld [vmem:[#allocation61_spill] sm:$0xff] }
 0x3d7   : > { %v2586_v27 = vadd.f32 %v6308_v10, %v2534_v2  ;;  %2487 = vmatmul.f32.gmra.mxu1 %v2288_v6  ;;  %v3227_v62 = vsel %vm1959_vm1, %v3179_v19, %v3180_v53  ;;  %v6799_v6 = vpop.f32.mrf.mxu3  ;;  %v2213_v54 = vadd.f32 %v6183_v23, %v1890_v30 }
 0x3d8   : > { %3354 = vmatmul.f32.gmra.mxu0 %v3227_v62  ;;  %v2806_v62 = vld [vmem:[%s7667_s6 + $0x28] sm:$0xff] }
 0x3d9   : > { %v2634_v5 = vmax.f32 %v2586_v27, 0.0  ;;  %v2287_v27 = vsel %vm2282_vm4, %v2276_v22, %v2277_v38  ;;  %3005 = vmatpush.msra.mxu3 %v2806_v62  ;;  %v2279_v62 = vrot.slane %v5905_v63, 2 }
 0x3db   : > { %v6794_v46 = vmul.f32 %v2634_v5, %v8140_v34  ;;  %v2278_v5 = vrot.slane %v5882_v57, 2 }
 0x3dc   : > { %v2443_v40 = vpop.f32.mrf.mxu1 }
 0x3dd   : > { %v2535_v2 = vadd.f32 %v2443_v40, %v2212_v47  ;;  %2925 = vmatmul.f32.gmra.mxu2 %v6794_v46  ;;  %v3181_v19 = vrot.slane %v6794_v46, 1  ;;  %v8142_v47 = vld [vmem:[#allocation135_spill] sm:$0xff]  ;;  %v6813_v40 = vpop.f32.mrf.mxu2  ;;  %v2286_v57 = vsel %vm2282_vm4, %v2277_v38, %v2278_v5  ;;  %v8146_v38 = vld [vmem:[#allocation65_spill] sm:$0xff]  ;;  %v2285_v63 = vsel %vm2282_vm4, %v2278_v5, %v2279_v62 }
 0x3de   : > { %v1626_v22 = vadd.f32 %v6178_v15, %v8142_v47  ;;  %v8144_v47 = vld [vmem:[#allocation136_spill] sm:$0xff] }
 0x3df   : > { %v2587_v8 = vadd.f32 %v6308_v10, %v2535_v2  ;;  %2490 = vmatmul.f32.gmra.mxu1 %v2287_v27  ;;  %v3226_v49 = vsel %vm1959_vm1, %v3180_v53, %v3181_v19  ;;  %v6819_v53 = vpop.f32.mrf.mxu0  ;;  %v6829_v30 = vpop.f32.mrf.mxu3 }
 0x3e0   : > { %3357 = vmatmul.f32.gmra.mxu0 %v3226_v49  ;;  %v1891_v15 = vadd.f32 %v6724_v4, %v1626_v22 }
 0x3e1   : > { %v2635_v55 = vmax.f32 %v2587_v8, 0.0 }
 0x3e3   : > { %v6817_v18 = vmul.f32 %v2635_v55, %v8143_v41 }
 0x3e4   : > { %v2446_v2 = vpop.f32.mrf.mxu1 }
 0x3e5   : > { %v2536_v27 = vadd.f32 %v2446_v2, %v2213_v54  ;;  %2928 = vmatmul.f32.gmra.mxu2 %v6817_v18  ;;  %v3182_v8 = vrot.slane %v6817_v18, 1  ;;  %v1629_v54 = vadd.f32 %v6212_v36, %v8144_v47  ;;  %v8145_v2 = vld [vmem:[#allocation36_spill] sm:$0xff]  ;;  %v6838_v22 = vpop.f32.mrf.mxu2  ;;  %v8149_v47 = vld [vmem:[#allocation151_spill] sm:$0xff] }
 0x3e6   : > { %v2214_v41 = vadd.f32 %v8145_v2, %v1891_v15 }
 0x3e7   : > { %v2588_v49 = vadd.f32 %v6308_v10, %v2536_v27  ;;  %2493 = vmatmul.f32.gmra.mxu1 %v2286_v57  ;;  %v3225_v23 = vsel %vm1959_vm1, %v3181_v19, %v3182_v8  ;;  %v6842_v57 = vpop.f32.mrf.mxu0  ;;  %v1892_v36 = vadd.f32 %v6748_v12, %v1629_v54  ;;  %v2280_v12 = vrot.slane %v8153_v42, 2 }
 0x3e8   : > { %3360 = vmatmul.f32.gmra.mxu0 %v3225_v23 }
 0x3e9   : > { %v2636_v55 = vmax.f32 %v2588_v49, 0.0 }
 0x3eb   : > { %v6836_v34 = vmul.f32 %v2636_v55, %v8146_v38  ;;  %v8148_v55 = vld [vmem:[#allocation137_spill] sm:$0xff] }
 0x3ec   : > { %v2449_v4 = vpop.f32.mrf.mxu1  ;;  %v1632_v2 = vadd.f32 %v8149_v47, %v8148_v55  ;;  %v8155_v55 = vld [vmem:[#allocation153_spill] sm:$0xff]  ;;  %v8156_v47 = vld [vmem:[#allocation43_spill] sm:$0xff] }
 0x3ed   : > { %8147 = vst [vmem:[#allocation94_spill] sm:$0xff] %v6836_v34  ;;  %v2537_v27 = vadd.f32 %v2449_v4, %v2214_v41  ;;  %2931 = vmatmul.f32.gmra.mxu2 %v6836_v34  ;;  %v3183_v19 = vrot.slane %v6836_v34, 1  ;;  %v1818_v41 = vpop.f32.mrf.mxu3  ;;  %v8150_v4 = vld [vmem:[#allocation152_spill] sm:$0xff] }
 0x3ee   : > { %v2215_v38 = vadd.f32 %v8150_v4, %v1892_v36  ;;  %v8157_v4 = vld [vmem:[#allocation71_spill] sm:$0xff] }
 0x3ef   : > { %v2589_v15 = vadd.f32 %v6308_v10, %v2537_v27  ;;  %2496 = vmatmul.f32.gmra.mxu1 %v2285_v63  ;;  %v3224_v49 = vsel %vm1959_vm1, %v3182_v8, %v3183_v19  ;;  %v2284_v8 = vsel %vm2282_vm4, %v2279_v62, %v2280_v12  ;;  %v1893_v63 = vadd.f32 %v6776_v56, %v1632_v2  ;;  %v8154_v62 = vld [vmem:[#allocation138_spill] sm:$0xff] }
 0x3f0   : > { %3363 = vmatmul.f32.gmra.mxu0 %v3224_v49  ;;  %v1635_v56 = vadd.f32 %v8155_v55, %v8154_v62 }
 0x3f1   : > { %v2637_v23 = vmax.f32 %v2589_v15, 0.0  ;;  %v6862_v15 = vpop.f32.mrf.mxu2  ;;  %v2216_v2 = vadd.f32 %v8156_v47, %v1893_v63 }
 0x3f3   : > { %v6854_v60 = vmul.f32 %v2637_v23, %v8151_v20  ;;  %v6867_v23 = vpop.f32.mrf.mxu0 }
 0x3f4   : > { %v2452_v5 = vpop.f32.mrf.mxu1 }
 0x3f5   : > { %8152 = vst [vmem:[#allocation76_spill] sm:$0xff] %v6854_v60  ;;  %v2538_v54 = vadd.f32 %v2452_v5, %v2215_v38  ;;  %2934 = vmatmul.f32.gmra.mxu2 %v6854_v60  ;;  %v3184_v27 = vrot.slane %v6854_v60, 1  ;;  %v2805_v38 = vld [vmem:[%s7667_s6 + $0x20] sm:$0xff]  ;;  %v1894_v60 = vadd.f32 %v6799_v6, %v1635_v56 }
 0x3f6   : > { %3006 = vmatpush.msra.mxu3 %v2805_v38 }
 0x3f7   : > { %v2590_v36 = vadd.f32 %v6308_v10, %v2538_v54  ;;  %2499 = vmatmul.f32.gmra.mxu1 %v2284_v8  ;;  %v3223_v49 = vsel %vm1959_vm1, %v3183_v19, %v3184_v27  ;;  %v1821_v54 = vpop.f32.mrf.mxu3 }
 0x3f8   : > { %3366 = vmatmul.f32.gmra.mxu0 %v3223_v49  ;;  %v8159_v49 = vld [vmem:[#allocation26_spill] sm:$0xff] }
 0x3f9   : > { %v2638_v42 = vmax.f32 %v2590_v36, 0.0  ;;  %v8160_v20 = vrot.slane %v8159_v49, 2 }
 0x3fb   : > { %v6876_v5 = vmul.f32 %v2638_v42, %v8157_v4  ;;  %v2283_v38 = vsel %vm2282_vm4, %v2280_v12, %v8160_v20  ;;  %v6888_v42 = vpop.f32.mrf.mxu2  ;;  %v6890_v47 = vpop.f32.mrf.mxu0  ;;  %v8163_v4 = vld [vmem:[#allocation155_spill] sm:$0xff] }
 0x3fc   : > { %v2455_v8 = vpop.f32.mrf.mxu1  ;;  %v8164_v20 = vld [vmem:[#allocation75_spill] sm:$0xff] }
 0x3fd   : > { %8158 = vst [vmem:[#allocation99_spill] sm:$0xff] %v6876_v5  ;;  %v2539_v19 = vadd.f32 %v2455_v8, %v2216_v2  ;;  %2937 = vmatmul.f32.gmra.mxu2 %v6876_v5  ;;  %v3185_v36 = vrot.slane %v6876_v5, 1  ;;  %v8161_v2 = vld [vmem:[#allocation139_spill] sm:$0xff]  ;;  %v8162_v8 = vld [vmem:[#allocation33_spill] sm:$0xff]  ;;  %v2217_v5 = vadd.f32 %v8163_v4, %v1894_v60 }
 0x3fe   : > { %v1638_v49 = vadd.f32 %v8162_v8, %v8161_v2  ;;  %v8166_v60 = vld [vmem:[#allocation53_spill] sm:$0xff] }
 0x3ff   : > { %v2591_v62 = vadd.f32 %v6308_v10, %v2539_v19  ;;  %2502 = vmatmul.f32.gmra.mxu1 %v2283_v38  ;;  %v3222_v63 = vsel %vm1959_vm1, %v3184_v27, %v3185_v36  ;;  %v1824_v56 = vpop.f32.mrf.mxu3  ;;  %v6904_v38 = vld [vmem:[%s7666_s5] ss:$0 sm:$0xff] }
 0x400   : > { %3369 = vmatmul.f32.gmra.mxu0 %v3222_v63  ;;  %v1895_v19 = vadd.f32 %v6829_v30, %v1638_v49  ;;  %v8167_v63 = vld [vmem:[#allocation140_spill] sm:$0xff] }
 0x401   : > { %v2639_v55 = vmax.f32 %v2591_v62, 0.0  ;;  %v8169_v30 = vld [vmem:[#allocation32_spill] sm:$0xff] }
 0x402   : > { %v2218_v49 = vadd.f32 %v8169_v30, %v1895_v19 }
 0x403   : > { %v6896_v12 = vmul.f32 %v2639_v55, %v8164_v20  ;;  %v8168_v55 = vld [vmem:[#allocation40_spill] sm:$0xff]  ;;  %v6912_v8 = vpop.f32.mrf.mxu2 }
 0x404   : > { %v2458_v6 = vpop.f32.mrf.mxu1  ;;  %v1641_v2 = vadd.f32 %v8168_v55, %v8167_v63  ;;  %v8172_v55 = vld [vmem:[#allocation141_spill] sm:$0xff] }
 0x405   : > { %8165 = vst [vmem:[#allocation97_spill] sm:$0xff] %v6896_v12  ;;  %v2540_v10 = vadd.f32 %v2458_v6, %v2217_v5  ;;  %2940 = vmatmul.f32.gmra.mxu2 %v6896_v12  ;;  %v3186_v27 = vrot.slane %v6896_v12, 1  ;;  %v8170_v6 = vld [vmem:[#allocation79_spill] sm:$0xff]  ;;  %v6918_v12 = vpop.f32.mrf.mxu0  ;;  %v1644_v30 = vadd.f32 %v6335_v59, %v8172_v55 }
 0x407   : > { %v2592_v62 = vadd.f32 %v6904_v38, %v2540_v10  ;;  %2505 = vmatmul.f32.gmra.mxu1 %v8166_v60  ;;  %v3221_v4 = vsel %vm1959_vm1, %v3185_v36, %v3186_v27  ;;  %v1896_v60 = vadd.f32 %v1818_v41, %v1641_v2  ;;  %v1827_v63 = vpop.f32.mrf.mxu3 }
 0x408   : > { %3372 = vmatmul.f32.gmra.mxu0 %v3221_v4 }
 0x409   : > { %v2640_v5 = vmax.f32 %v2592_v62, 0.0 }
 0x40b   : > { %v6916_v20 = vmul.f32 %v2640_v5, %v8170_v6  ;;  %v2804_v5 = vld [vmem:[%s7667_s6 + $0x18] sm:$0xff]  ;;  %v6934_v2 = vpop.f32.mrf.mxu2  ;;  %v1897_v6 = vadd.f32 %v1821_v54, %v1644_v30 }
 0x40c   : > { %v2461_v10 = vpop.f32.mrf.mxu1  ;;  %3007 = vmatpush.msra.mxu3 %v2804_v5 }
 0x40d   : > { %8171 = vst [vmem:[#allocation104_spill] sm:$0xff] %v6916_v20  ;;  %v2541_v34 = vadd.f32 %v2461_v10, %v2218_v49  ;;  %2943 = vmatmul.f32.gmra.mxu2 %v6916_v20  ;;  %v3187_v36 = vrot.slane %v6916_v20, 1  ;;  %v2219_v49 = vadd.f32 %v6340_v37, %v1896_v60  ;;  %v8173_v10 = vld [vmem:[#allocation83_spill] sm:$0xff] }
 0x40f   : > { %v2593_v62 = vadd.f32 %v6904_v38, %v2541_v34  ;;  %v3220_v4 = vsel %vm1959_vm1, %v3186_v27, %v3187_v36  ;;  %v1830_v60 = vpop.f32.mrf.mxu3 }
 0x410   : > { %3375 = vmatmul.f32.gmra.mxu0 %v3220_v4  ;;  %v6938_v4 = vpop.f32.mrf.mxu0 }
 0x411   : > { %v2641_v19 = vmax.f32 %v2593_v62, 0.0 }
 0x413   : > { %v6932_v41 = vmul.f32 %v2641_v19, %v8173_v10  ;;  %v8175_v19 = vld [vmem:[#allocation142_spill] sm:$0xff] }
 0x414   : > { %v2464_v34 = vpop.f32.mrf.mxu1  ;;  %v1647_v55 = vadd.f32 %v6365_v32, %v8175_v19  ;;  %v8180_v19 = vld [vmem:[#allocation88_spill] sm:$0xff] }
 0x415   : > { %8174 = vst [vmem:[#allocation80_spill] sm:$0xff] %v6932_v41  ;;  %v2542_v27 = vadd.f32 %v2464_v34, %v2219_v49  ;;  %2946 = vmatmul.f32.gmra.mxu2 %v6932_v41  ;;  %v3188_v62 = vrot.slane %v6932_v41, 1  ;;  %v2220_v49 = vadd.f32 %v6370_v7, %v1897_v6  ;;  %v8176_v34 = vld [vmem:[#allocation85_spill] sm:$0xff]  ;;  %v8178_v6 = vld [vmem:[#allocation143_spill] sm:$0xff] }
 0x416   : > { %v1898_v30 = vadd.f32 %v1824_v56, %v1647_v55 }
 0x417   : > { %v2594_v5 = vadd.f32 %v6904_v38, %v2542_v27  ;;  %v3219_v59 = vsel %vm1959_vm1, %v3187_v36, %v3188_v62  ;;  %v6951_v27 = vpop.f32.mrf.mxu2  ;;  %v1833_v56 = vpop.f32.mrf.mxu3 }
 0x418   : > { %3378 = vmatmul.f32.gmra.mxu0 %v3219_v59  ;;  %v6956_v32 = vpop.f32.mrf.mxu0  ;;  %v1650_v59 = vadd.f32 %v6386_v50, %v8178_v6  ;;  %v8183_v6 = vld [vmem:[#allocation144_spill] sm:$0xff] }
 0x419   : > { %v2642_v37 = vmax.f32 %v2594_v5, 0.0 }
 0x41b   : > { %v6947_v10 = vmul.f32 %v2642_v37, %v8176_v34 }
 0x41c   : > { %v2467_v41 = vpop.f32.mrf.mxu1 }
 0x41d   : > { %8177 = vst [vmem:[#allocation103_spill] sm:$0xff] %v6947_v10  ;;  %v2543_v20 = vadd.f32 %v2467_v41, %v2220_v49  ;;  %2949 = vmatmul.f32.gmra.mxu2 %v6947_v10  ;;  %v3189_v54 = vrot.slane %v6947_v10, 1  ;;  %v8179_v41 = vld [vmem:[#allocation37_spill] sm:$0xff] }
 0x41e   : > { %v2221_v37 = vadd.f32 %v8179_v41, %v1898_v30  ;;  %v8184_v41 = vld [vmem:[#allocation56_spill] sm:$0xff] }
 0x41f   : > { %v2595_v36 = vadd.f32 %v6904_v38, %v2543_v20  ;;  %v3218_v5 = vsel %vm1959_vm1, %v3188_v62, %v3189_v54  ;;  %v1899_v62 = vadd.f32 %v1827_v63, %v1650_v59  ;;  %v6969_v50 = vpop.f32.mrf.mxu2  ;;  %v8185_v63 = vld [vmem:[#allocation55_spill] sm:$0xff] }
 0x420   : > { %3381 = vmatmul.f32.gmra.mxu0 %v3218_v5  ;;  %8182 = vst [vmem:[#allocation108_spill] sm:$0xff] %v6969_v50  ;;  %v2803_v5 = vld [vmem:[%s7667_s6 + $0x10] sm:$0xff] }
 0x421   : > { %v2643_v7 = vmax.f32 %v2595_v36, 0.0  ;;  %3008 = vmatpush.msra.mxu3 %v2803_v5  ;;  %v2222_v59 = vadd.f32 %v8185_v63, %v1899_v62 }
 0x423   : > { %v6962_v49 = vmul.f32 %v2643_v7, %v8180_v19  ;;  %v6974_v7 = vpop.f32.mrf.mxu0  ;;  %v1836_v19 = vpop.f32.mrf.mxu3 }
 0x424   : > { %v2470_v55 = vpop.f32.mrf.mxu1 }
 0x425   : > { %8181 = vst [vmem:[#allocation109_spill] sm:$0xff] %v6962_v49  ;;  %v2544_v34 = vadd.f32 %v2470_v55, %v2221_v37  ;;  %2952 = vmatmul.f32.gmra.mxu2 %v6962_v49  ;;  %v3190_v20 = vrot.slane %v6962_v49, 1  ;;  %v1653_v37 = vadd.f32 %v8184_v41, %v8183_v6  ;;  %v8188_v41 = vld [vmem:[#allocation145_spill] sm:$0xff] }
 0x426   : > { %v1656_v62 = vadd.f32 %v6430_v21, %v8188_v41 }
 0x427   : > { %v2596_v10 = vadd.f32 %v6904_v38, %v2544_v34  ;;  %v3217_v36 = vsel %vm1959_vm1, %v3189_v54, %v3190_v20  ;;  %v8186_v34 = vld [vmem:[#allocation92_spill] sm:$0xff]  ;;  %v1900_v49 = vadd.f32 %v1830_v60, %v1653_v37 }
 0x428   : > { %3384 = vmatmul.f32.gmra.mxu0 %v3217_v36 }
 0x429   : > { %v2644_v30 = vmax.f32 %v2596_v10, 0.0  ;;  %v2223_v63 = vadd.f32 %v6434_v29, %v1900_v49  ;;  %v8190_v49 = vld [vmem:[#allocation146_spill] sm:$0xff] }
 0x42b   : > { %v6980_v55 = vmul.f32 %v2644_v30, %v8186_v34  ;;  %v6989_v30 = vpop.f32.mrf.mxu2  ;;  %v6995_v34 = vpop.f32.mrf.mxu0 }
 0x42c   : > { %v2473_v54 = vpop.f32.mrf.mxu1 }
 0x42d   : > { %8187 = vst [vmem:[#allocation87_spill] sm:$0xff] %v6980_v55  ;;  %v2545_v36 = vadd.f32 %v2473_v54, %v2222_v59  ;;  %2955 = vmatmul.f32.gmra.mxu2 %v6980_v55  ;;  %v3191_v10 = vrot.slane %v6980_v55, 1  ;;  %v8189_v59 = vld [vmem:[#allocation96_spill] sm:$0xff] }
 0x42f   : > { %v2597_v50 = vadd.f32 %v6904_v38, %v2545_v36  ;;  %v3216_v5 = vsel %vm1959_vm1, %v3190_v20, %v3191_v10  ;;  %v1901_v36 = vadd.f32 %v1833_v56, %v1656_v62 }
 0x430   : > { %3387 = vmatmul.f32.gmra.mxu0 %v3216_v5  ;;  %v1839_v5 = vpop.f32.mrf.mxu3 }
 0x431   : > { %v2645_v6 = vmax.f32 %v2597_v50, 0.0  ;;  %v2224_v41 = vadd.f32 %v6459_v16, %v1901_v36  ;;  %v2802_v36 = vld [vmem:[%s7667_s6 + $0x8] sm:$0xff] }
 0x432   : > { %3009 = vmatpush.msra.mxu3 %v2802_v36 }
 0x433   : > { %v6993_v54 = vmul.f32 %v2645_v6, %v8189_v59  ;;  %v1659_v6 = vadd.f32 %v6454_v14, %v8190_v49  ;;  %v8191_v59 = vld [vmem:[#allocation100_spill] sm:$0xff]  ;;  %v7008_v55 = vpop.f32.mrf.mxu2 }
 0x434   : > { %v2476_v60 = vpop.f32.mrf.mxu1 }
 0x435   : > { %v2546_v37 = vadd.f32 %v2476_v60, %v2223_v63  ;;  %2958 = vmatmul.f32.gmra.mxu2 %v6993_v54  ;;  %v3192_v20 = vrot.slane %v6993_v54, 1 }
 0x437   : > { %v2598_v50 = vadd.f32 %v6904_v38, %v2546_v37  ;;  %v3215_v21 = vsel %vm1959_vm1, %v3191_v10, %v3192_v20  ;;  %v7012_v10 = vpop.f32.mrf.mxu0  ;;  %v1902_v37 = vadd.f32 %v1836_v19, %v1659_v6 }
 0x438   : > { %3390 = vmatmul.f32.gmra.mxu0 %v3215_v21  ;;  %v1842_v21 = vpop.f32.mrf.mxu3 }
 0x439   : > { %v2646_v29 = vmax.f32 %v2598_v50, 0.0 }
 0x43b   : > { %v7006_v63 = vmul.f32 %v2646_v29, %v8191_v59  ;;  %v8193_v29 = vld [vmem:[#allocation147_spill] sm:$0xff]  ;;  %v8195_v59 = vld [vmem:[#allocation102_spill] sm:$0xff] }
 0x43c   : > { %v2479_v60 = vpop.f32.mrf.mxu1  ;;  %v1662_v49 = vadd.f32 %v6478_v48, %v8193_v29 }
 0x43d   : > { %8192 = vst [vmem:[#allocation112_spill] sm:$0xff] %v7006_v63  ;;  %v2547_v56 = vadd.f32 %v2479_v60, %v2224_v41  ;;  %2961 = vmatmul.f32.gmra.mxu2 %v7006_v63  ;;  %v3193_v62 = vrot.slane %v7006_v63, 1  ;;  %v8194_v41 = vld [vmem:[#allocation64_spill] sm:$0xff] }
 0x43e   : > { %v2225_v60 = vadd.f32 %v8194_v41, %v1902_v37 }
 0x43f   : > { %v2599_v50 = vadd.f32 %v6904_v38, %v2547_v56  ;;  %v3214_v14 = vsel %vm1959_vm1, %v3192_v20, %v3193_v62  ;;  %v7033_v48 = vpop.f32.mrf.mxu0 }
 0x440   : > { %3393 = vmatmul.f32.gmra.mxu0 %v3214_v14  ;;  %v7028_v14 = vpop.f32.mrf.mxu2  ;;  %8197 = vst [vmem:[#allocation116_spill] sm:$0xff] %v7033_v48 }
 0x441   : > { %v2647_v16 = vmax.f32 %v2599_v50, 0.0  ;;  %v1903_v50 = vadd.f32 %v1839_v5, %v1662_v49  ;;  %v1845_v5 = vpop.f32.mrf.mxu3 }
 0x443   : > { %v7024_v19 = vmul.f32 %v2647_v16, %v8195_v59  ;;  %v8198_v16 = vld [vmem:[#allocation148_spill] sm:$0xff]  ;;  %v2226_v41 = vadd.f32 %v6502_v28, %v1903_v50 }
 0x444   : > { %v2482_v6 = vpop.f32.mrf.mxu1  ;;  %v1665_v29 = vadd.f32 %v6496_v24, %v8198_v16 }
 0x445   : > { %8196 = vst [vmem:[#allocation111_spill] sm:$0xff] %v7024_v19  ;;  %v2548_v56 = vadd.f32 %v2482_v6, %v2225_v60  ;;  %2964 = vmatmul.f32.gmra.mxu2 %v7024_v19  ;;  %v3194_v20 = vrot.slane %v7024_v19, 1  ;;  %v8199_v60 = vld [vmem:[#allocation106_spill] sm:$0xff] }
 0x447   : > { %v2600_v63 = vadd.f32 %v6904_v38, %v2548_v56  ;;  %v3213_v36 = vsel %vm1959_vm1, %v3193_v62, %v3194_v20  ;;  %v1904_v62 = vadd.f32 %v1842_v21, %v1665_v29  ;;  %v7048_v50 = vpop.f32.mrf.mxu0 }
 0x448   : > { %3396 = vmatmul.f32.gmra.mxu0 %v3213_v36  ;;  %v7046_v24 = vpop.f32.mrf.mxu2  ;;  %v8201_v36 = vld [vmem:[#allocation149_spill] sm:$0xff] }
 0x449   : > { %v2648_v37 = vmax.f32 %v2600_v63, 0.0 }
 0x44b   : > { %v7039_v6 = vmul.f32 %v2648_v37, %v8199_v60  ;;  %v8202_v37 = vld [vmem:[#allocation68_spill] sm:$0xff]  ;;  %v8204_v60 = vld [vmem:[#allocation110_spill] sm:$0xff] }
 0x44c   : > { %v2485_v49 = vpop.f32.mrf.mxu1  ;;  %v1668_v16 = vadd.f32 %v8202_v37, %v8201_v36 }
 0x44d   : > { %8200 = vst [vmem:[#allocation115_spill] sm:$0xff] %v7039_v6  ;;  %v2549_v59 = vadd.f32 %v2485_v49, %v2226_v41  ;;  %2967 = vmatmul.f32.gmra.mxu2 %v7039_v6  ;;  %v3195_v56 = vrot.slane %v7039_v6, 1  ;;  %v8203_v41 = vld [vmem:[#allocation67_spill] sm:$0xff] }
 0x44e   : > { %v2227_v49 = vadd.f32 %v8203_v41, %v1904_v62  ;;  %v2801_v62 = vld [vmem:[%s7667_s6] sm:$0xff] }
 0x44f   : > { %v2601_v19 = vadd.f32 %v6904_v38, %v2549_v59  ;;  %v3212_v63 = vsel %vm1959_vm1, %v3194_v20, %v3195_v56  ;;  %v1848_v20 = vpop.f32.mrf.mxu3  ;;  %3010 = vmatpush.msra.mxu3 %v2801_v62 }
 0x450   : > { %3399 = vmatmul.f32.gmra.mxu0 %v3212_v63  ;;  %v1905_v63 = vadd.f32 %v1845_v5, %v1668_v16  ;;  %v7066_v41 = vpop.f32.mrf.mxu2  ;;  %v8207_v5 = vld [vmem:[#allocation113_spill] sm:$0xff] }
 0x451   : > { %v2649_v28 = vmax.f32 %v2601_v19, 0.0 }
 0x453   : > { %v7054_v48 = vmul.f32 %v2649_v28, %v8204_v60  ;;  %v8206_v28 = vld [vmem:[#allocation35_spill] sm:$0xff]  ;;  %v8210_v60 = vld [vmem:[#allocation114_spill] sm:$0xff] }
 0x454   : > { %v2488_v21 = vpop.f32.mrf.mxu1  ;;  %v1671_v37 = vadd.f32 %v6546_v51, %v8206_v28 }
 0x455   : > { %8205 = vst [vmem:[#allocation119_spill] sm:$0xff] %v7054_v48  ;;  %v2550_v29 = vadd.f32 %v2488_v21, %v2227_v49  ;;  %2970 = vmatmul.f32.gmra.mxu2 %v7054_v48  ;;  %v3196_v59 = vrot.slane %v7054_v48, 1  ;;  %v2228_v49 = vadd.f32 %v6551_v43, %v1905_v63  ;;  %v7072_v21 = vpop.f32.mrf.mxu0  ;;  %v8209_v63 = vld [vmem:[#allocation150_spill] sm:$0xff] }
 0x457   : > { %v2602_v19 = vadd.f32 %v6904_v38, %v2550_v29  ;;  %v3211_v6 = vsel %vm1959_vm1, %v3195_v56, %v3196_v59  ;;  %v1851_v28 = vpop.f32.mrf.mxu3 }
 0x458   : > { %3402 = vmatmul.f32.gmra.mxu0 %v3211_v6  ;;  %v7085_v48 = vpop.f32.mrf.mxu2 }
 0x459   : > { %v2650_v36 = vmax.f32 %v2602_v19, 0.0  ;;  %v1906_v19 = vadd.f32 %v1848_v20, %v1671_v37 }
 0x45b   : > { %v7070_v16 = vmul.f32 %v2650_v36, %v8207_v5  ;;  %v1674_v36 = vadd.f32 %v6567_v11, %v8209_v63  ;;  %v2229_v5 = vadd.f32 %v6572_v9, %v1906_v19  ;;  %v8213_v63 = vld [vmem:[#allocation77_spill] sm:$0xff] }
 0x45c   : > { %v2491_v56 = vpop.f32.mrf.mxu1 }
 0x45d   : > { %8208 = vst [vmem:[#allocation93_spill] sm:$0xff] %v7070_v16  ;;  %v2551_v6 = vadd.f32 %v2491_v56, %v2228_v49  ;;  %2973 = vmatmul.f32.gmra.mxu2 %v7070_v16  ;;  %v3197_v29 = vrot.slane %v7070_v16, 1 }
 0x45f   : > { %v2603_v62 = vadd.f32 %v6904_v38, %v2551_v6  ;;  %v3210_v51 = vsel %vm1959_vm1, %v3196_v59, %v3197_v29  ;;  %v7089_v59 = vpop.f32.mrf.mxu0  ;;  %v1907_v6 = vadd.f32 %v1851_v28, %v1674_v36  ;;  %v1854_v19 = vpop.f32.mrf.mxu3 }
 0x460   : > { %3405 = vmatmul.f32.gmra.mxu0 %v3210_v51  ;;  %v8212_v51 = vld [vmem:[#allocation41_spill] sm:$0xff] }
 0x461   : > { %v2651_v43 = vmax.f32 %v2603_v62, 0.0 }
 0x463   : > { %v7083_v49 = vmul.f32 %v2651_v43, %v8210_v60  ;;  %v1677_v43 = vadd.f32 %v6589_v44, %v8212_v51  ;;  %v8217_v51 = vld [vmem:[#allocation121_spill] sm:$0xff] }
 0x464   : > { %v2494_v56 = vpop.f32.mrf.mxu1 }
 0x465   : > { %8211 = vst [vmem:[#allocation117_spill] sm:$0xff] %v7083_v49  ;;  %v2552_v20 = vadd.f32 %v2494_v56, %v2229_v5  ;;  %2976 = vmatmul.f32.gmra.mxu2 %v7083_v49  ;;  %v3198_v37 = vrot.slane %v7083_v49, 1  ;;  %v2230_v5 = vadd.f32 %v8213_v63, %v1907_v6  ;;  %v8214_v56 = vld [vmem:[#allocation118_spill] sm:$0xff]  ;;  %v1908_v36 = vadd.f32 %v1854_v19, %v1677_v43 }
 0x467   : > { %v2604_v62 = vadd.f32 %v6904_v38, %v2552_v20  ;;  %v3209_v11 = vsel %vm1959_vm1, %v3197_v29, %v3198_v37  ;;  %v7102_v20 = vpop.f32.mrf.mxu2  ;;  %v7107_v44 = vpop.f32.mrf.mxu0 }
 0x468   : > { %3408 = vmatmul.f32.gmra.mxu0 %v3209_v11  ;;  %v8216_v11 = vld [vmem:[#allocation42_spill] sm:$0xff]  ;;  %v1857_v19 = vpop.f32.mrf.mxu3 }
 0x469   : > { %v2652_v9 = vmax.f32 %v2604_v62, 0.0 }
 0x46b   : > { %v7098_v60 = vmul.f32 %v2652_v9, %v8214_v56  ;;  %v1680_v9 = vadd.f32 %v6611_v35, %v8216_v11  ;;  %v8221_v11 = vld [vmem:[#allocation81_spill] sm:$0xff] }
 0x46c   : > { %v2497_v49 = vpop.f32.mrf.mxu1 }
 0x46d   : > { %8215 = vst [vmem:[#allocation123_spill] sm:$0xff] %v7098_v60  ;;  %v2553_v16 = vadd.f32 %v2497_v49, %v2230_v5  ;;  %2979 = vmatmul.f32.gmra.mxu2 %v7098_v60  ;;  %v3199_v28 = vrot.slane %v7098_v60, 1  ;;  %v2231_v49 = vadd.f32 %v6615_v25, %v1908_v36  ;;  %v8254_v60 = vld [vmem:[#allocation89_spill] sm:$0xff] }
 0x46f   : > { %v2605_v29 = vadd.f32 %v6904_v38, %v2553_v16  ;;  %v3208_v62 = vsel %vm1959_vm1, %v3198_v37, %v3199_v28  ;;  %v1909_v37 = vadd.f32 %v1857_v19, %v1680_v9  ;;  %v7120_v35 = vpop.f32.mrf.mxu2  ;;  %v7122_v36 = vpop.f32.mrf.mxu0 }
 0x470   : > { %3411 = vmatmul.f32.gmra.mxu0 %v3208_v62  ;;  %8219 = vst [vmem:[#allocation126_spill] sm:$0xff] %v7120_v35  ;;  %v8220_v62 = vld [vmem:[#allocation154_spill] sm:$0xff] }
 0x471   : > { %v2653_v6 = vmax.f32 %v2605_v29, 0.0 }
 0x473   : > { %v7113_v63 = vmul.f32 %v2653_v6, %v8217_v51  ;;  %v1683_v6 = vadd.f32 %v6640_v31, %v8220_v62 }
 0x474   : > { %v2500_v43 = vpop.f32.mrf.mxu1 }
 0x475   : > { %8218 = vst [vmem:[#allocation122_spill] sm:$0xff] %v7113_v63  ;;  %v2554_v5 = vadd.f32 %v2500_v43, %v2231_v49  ;;  %2982 = vmatmul.f32.gmra.mxu2 %v7113_v63  ;;  %v3200_v16 = vrot.slane %v7113_v63, 1  ;;  %v2232_v49 = vadd.f32 %v8221_v11, %v1909_v37  ;;  %v8222_v43 = vld [vmem:[#allocation124_spill] sm:$0xff]  ;;  %v8226_v11 = vld [vmem:[#allocation127_spill] sm:$0xff] }
 0x476   : > { %v8225_v37 = vld [vmem:[#allocation84_spill] sm:$0xff] }
 0x477   : > { %v2606_v56 = vadd.f32 %v6904_v38, %v2554_v5  ;;  %v3207_v29 = vsel %vm1959_vm1, %v3199_v28, %v3200_v16  ;;  %v1860_v5 = vpop.f32.mrf.mxu3  ;;  %v7135_v62 = vpop.f32.mrf.mxu2 }
 0x478   : > { %3414 = vmatmul.f32.gmra.mxu0 %v3207_v29  ;;  %v1910_v29 = vadd.f32 %v1860_v5, %v1683_v6  ;;  %8224 = vst [vmem:[#allocation125_spill] sm:$0xff] %v7135_v62  ;;  %v8229_v5 = vld [vmem:[#allocation15_spill] sm:$0xff] }
 0x479   : > { %v2654_v25 = vmax.f32 %v2606_v56, 0.0 }
 0x47b   : > { %v7128_v51 = vmul.f32 %v2654_v25, %v8222_v43  ;;  %v2233_v25 = vadd.f32 %v8225_v37, %v1910_v29  ;;  %v8232_v37 = vld [vmem:[#allocation39_spill] sm:$0xff] }
 0x47c   : > { %v2503_v9 = vpop.f32.mrf.mxu1 }
 0x47d   : > { %8223 = vst [vmem:[#allocation101_spill] sm:$0xff] %v7128_v51  ;;  %v2555_v19 = vadd.f32 %v2503_v9, %v2232_v49  ;;  %2985 = vmatmul.f32.gmra.mxu2 %v7128_v51  ;;  %v3201_v28 = vrot.slane %v7128_v51, 1  ;;  %v7141_v49 = vpop.f32.mrf.mxu0 }
 0x47e   : > { %8228 = vst [vmem:[#allocation130_spill] sm:$0xff] %v7141_v49 }
 0x47f   : > { %v2607_v56 = vadd.f32 %v6904_v38, %v2555_v19  ;;  %v3206_v63 = vsel %vm1959_vm1, %v3200_v16, %v3201_v28 }
 0x480   : > { %3417 = vmatmul.f32.gmra.mxu0 %v3206_v63 }
 0x481   : > { %v2655_v31 = vmax.f32 %v2607_v56, 0.0  ;;  %v7151_v56 = vpop.f32.mrf.mxu2 }
 0x482   : > { %8231 = vst [vmem:[#allocation107_spill] sm:$0xff] %v7151_v56  ;;  %v8257_v56 = vld [vmem:[#allocation90_spill] sm:$0xff] }
 0x483   : > { %v7139_v43 = vmul.f32 %v2655_v31, %v8226_v11 }
 0x484   : > { %v2506_v9 = vpop.f32.mrf.mxu1 }
 0x485   : > { %8227 = vst [vmem:[#allocation105_spill] sm:$0xff] %v7139_v43  ;;  %v2556_v51 = vadd.f32 %v2506_v9, %v2233_v25  ;;  %2988 = vmatmul.f32.gmra.mxu2 %v7139_v43  ;;  %v3202_v6 = vrot.slane %v7139_v43, 1  ;;  %v2705_v25 = vrot.slane %v8232_v37, 7  ;;  %v7157_v11 = vpop.f32.mrf.mxu0 }
 0x486   : > { %8233 = vst [vmem:[#allocation132_spill] sm:$0xff] %v7157_v11  ;;  %v8258_v11 = vld [vmem:[#allocation11_spill] sm:$0xff] }
 0x487   : > { %v2608_v19 = vadd.f32 %v6904_v38, %v2556_v51  ;;  %v3205_v63 = vsel %vm1959_vm1, %v3201_v28, %v3202_v6  ;;  %v8234_v28 = vld [vmem:[#allocation47_spill] sm:$0xff] }
 0x488   : > { %3420 = vmatmul.f32.gmra.mxu0 %v3205_v63 }
 0x489   : > { %v2656_v16 = vmax.f32 %v2608_v19, 0.0  ;;  %v2706_v19 = vrot.slane %v8234_v28, 7 }
 0x48b   : > { %v7149_v29 = vmul.f32 %v2656_v16, %v8229_v5  ;;  %v2799_v63 = vsel %vm1297_vm2, %v2705_v25, %v2706_v19  ;;  %v8235_v16 = vrot.slane %v8232_v37, 1  ;;  %v8239_v37 = vld [vmem:[#allocation49_spill] sm:$0xff] }
 0x48c   : > { %v2709_v28 = vrot.slane %v8239_v37, 7 }
 0x48d   : > { %8230 = vst [vmem:[#allocation129_spill] sm:$0xff] %v7149_v29  ;;  %v7839_v31 = vrot.slane %v7149_v29, 7  ;;  %2991 = vmatmul.f32.gmra.mxu2 %v7149_v29  ;;  %v3203_v9 = vrot.slane %v7149_v29, 1  ;;  %v7172_v43 = vpop.f32.mrf.mxu0 }
 0x48e   : > { %8236 = vst [vmem:[#allocation131_spill] sm:$0xff] %v7172_v43 }
 0x48f   : > { %v2800_v38 = vsel %vm1297_vm2, %v7839_v31, %v2705_v25  ;;  %v3204_v51 = vsel %vm1959_vm1, %v3202_v6, %v3203_v9  ;;  %v3251_v5 = vsel %vm1959_vm1, %v3203_v9, %v8235_v16  ;;  %v8237_v31 = vld [vmem:[#allocation46_spill] sm:$0xff] }
 0x490   : > { %3011 = vmatmul.f32.vlgmr.msra.gmra.mxu3 %v2800_v38  ;;  %3423 = vmatmul.f32.gmra.mxu0 %v3204_v51  ;;  %v2707_v29 = vrot.slane %v8237_v31, 7  ;;  %v8238_v38 = vld [vmem:[#allocation51_spill] sm:$0xff] }
 0x491   : > { %v2708_v51 = vrot.slane %v8238_v38, 7 }
 0x492   : > { %v2798_v6 = vsel %vm1297_vm2, %v2706_v19, %v2707_v29  ;;  %v8241_v19 = vld [vmem:[#allocation45_spill] sm:$0xff] }
 0x493   : > { %v2797_v25 = vsel %vm1297_vm2, %v2707_v29, %v2708_v51  ;;  %v2796_v9 = vsel %vm1297_vm2, %v2708_v51, %v2709_v28  ;;  %v2711_v16 = vrot.slane %v8241_v19, 7  ;;  %v8242_v29 = vld [vmem:[#allocation60_spill] sm:$0xff]  ;;  %v8243_v51 = vld [vmem:[#allocation59_spill] sm:$0xff] }
 0x494   : > { %v2712_v38 = vrot.slane %v8242_v29, 7  ;;  %v2713_v37 = vrot.slane %v8243_v51, 7 }
 0x498   : > { %3014 = vmatmul.f32.gmra.mxu3 %v2799_v63  ;;  %3426 = vmatmul.f32.gmra.mxu0 %v3251_v5  ;;  %v8240_v63 = vld [vmem:[#allocation91_spill] sm:$0xff] }
 0x499   : > { %v2710_v5 = vrot.slane %v8240_v63, 7 }
 0x49b   : > { %v2795_v31 = vsel %vm1297_vm2, %v2709_v28, %v2710_v5  ;;  %v8244_v28 = vld [vmem:[#allocation98_spill] sm:$0xff] }
 0x49c   : > { %v2714_v63 = vrot.slane %v8244_v28, 7 }
 0x4a0   : > { %3017 = vmatmul.f32.gmra.mxu3 %v2798_v6  ;;  %v2794_v6 = vsel %vm1297_vm2, %v2710_v5, %v2711_v16  ;;  %v8245_v5 = vld [vmem:[#allocation63_spill] sm:$0xff] }
 0x4a1   : > { %v2715_v19 = vrot.slane %v8245_v5, 7 }
 0x4a8   : > { %3020 = vmatmul.f32.gmra.mxu3 %v2797_v25  ;;  %v2793_v25 = vsel %vm1297_vm2, %v2711_v16, %v2712_v38  ;;  %v8246_v16 = vld [vmem:[#allocation52_spill] sm:$0xff] }
 0x4a9   : > { %v2716_v29 = vrot.slane %v8246_v16, 7 }
 0x4b0   : > { %3023 = vmatmul.f32.gmra.mxu3 %v2796_v9  ;;  %v2792_v9 = vsel %vm1297_vm2, %v2712_v38, %v2713_v37  ;;  %v8247_v38 = vld [vmem:[#allocation74_spill] sm:$0xff] }
 0x4b1   : > { %v2717_v51 = vrot.slane %v8247_v38, 7  ;;  %v8251_v38 = vld [vmem:[#allocation62_spill] sm:$0xff] }
 0x4b8   : > { %3026 = vmatmul.f32.gmra.mxu3 %v2795_v31  ;;  %v2791_v31 = vsel %vm1297_vm2, %v2713_v37, %v2714_v63  ;;  %v8248_v37 = vld [vmem:[#allocation73_spill] sm:$0xff] }
 0x4b9   : > { %v2718_v28 = vrot.slane %v8248_v37, 7 }
 0x4c0   : > { %3029 = vmatmul.f32.gmra.mxu3 %v2794_v6  ;;  %v2790_v6 = vsel %vm1297_vm2, %v2714_v63, %v2715_v19  ;;  %v8249_v63 = vld [vmem:[#allocation78_spill] sm:$0xff] }
 0x4c1   : > { %v2719_v5 = vrot.slane %v8249_v63, 7  ;;  %v8253_v63 = vld [vmem:[#allocation86_spill] sm:$0xff] }
 0x4c8   : > { %3032 = vmatmul.f32.gmra.mxu3 %v2793_v25  ;;  %v2789_v25 = vsel %vm1297_vm2, %v2715_v19, %v2716_v29  ;;  %v8250_v19 = vld [vmem:[#allocation58_spill] sm:$0xff] }
 0x4c9   : > { %v2720_v16 = vrot.slane %v8250_v19, 7 }
 0x4d0   : > { %3035 = vmatmul.f32.gmra.mxu3 %v2792_v9  ;;  %v2788_v9 = vsel %vm1297_vm2, %v2716_v29, %v2717_v51  ;;  %v2785_v29 = vsel %vm1297_vm2, %v2719_v5, %v2720_v16 }
 0x4d8   : > { %3038 = vmatmul.f32.gmra.mxu3 %v2791_v31  ;;  %v2787_v31 = vsel %vm1297_vm2, %v2717_v51, %v2718_v28  ;;  %v2721_v51 = vrot.slane %v8251_v38, 7 }
 0x4e0   : > { %3041 = vmatmul.f32.gmra.mxu3 %v2790_v6  ;;  %v2786_v6 = vsel %vm1297_vm2, %v2718_v28, %v2719_v5  ;;  %v8252_v28 = vld [vmem:[#allocation82_spill] sm:$0xff]  ;;  %v7230_v5 = vld [vmem:[%s7668_s7] ss:$0 sm:$0xff] }
 0x4e8   : > { %3044 = vmatmul.f32.gmra.mxu3 %v2789_v25  ;;  %v3785_v25 = vld [vmem:[%s7669_s8 + $0x78] sm:$0xff] }
 0x4e9   : > { %3829 = vmatpush.msrb.mxu1 %v3785_v25 }
 0x4f0   : > { %3047 = vmatmul.f32.gmra.mxu3 %v2788_v9  ;;  %v2784_v9 = vsel %vm1297_vm2, %v2720_v16, %v2721_v51 }
 0x4f8   : > { %3050 = vmatmul.f32.gmra.mxu3 %v2787_v31  ;;  %v2722_v31 = vrot.slane %v8252_v28, 7 }
 0x4fa   : > { %v2783_v19 = vsel %vm1297_vm2, %v2721_v51, %v2722_v31  ;;  %v3784_v51 = vld [vmem:[%s7669_s8 + $0x70] sm:$0xff] }
 0x4fb   : > { %3830 = vmatpush.msrb.mxu1 %v3784_v51 }
 0x500   : > { %3053 = vmatmul.f32.gmra.mxu3 %v2786_v6 }
 0x508   : > { %3056 = vmatmul.f32.gmra.mxu3 %v2785_v29  ;;  %v8255_v29 = vld [vmem:[#allocation66_spill] sm:$0xff] }
 0x509   : > { %v2723_v16 = vrot.slane %v8255_v29, 7 }
 0x510   : > { %3059 = vmatmul.f32.gmra.mxu3 %v2784_v9  ;;  %v8256_v9 = vld [vmem:[#allocation70_spill] sm:$0xff] }
 0x513   : > { %v3012_v37 = vpop.f32.mrf.mxu3 }
 0x514   : > { %v3013_v6 = vadd.f32 %v3012_v37, %v8253_v63 }
 0x516   : > { %v3430_v43 = vadd.f32 %v8254_v60, %v3013_v6  ;;  %v2782_v60 = vsel %vm1297_vm2, %v2722_v31, %v2723_v16 }
 0x518   : > { %3062 = vmatmul.f32.gmra.mxu3 %v2783_v19  ;;  %v3482_v38 = vadd.f32 %v7230_v5, %v3430_v43  ;;  %v2724_v43 = vrot.slane %v8257_v56, 7  ;;  %v8261_v56 = vld [vmem:[#allocation13_spill] sm:$0xff] }
 0x51a   : > { %v3530_v63 = vmax.f32 %v3482_v38, 0.0  ;;  %v2781_v31 = vsel %vm1297_vm2, %v2723_v16, %v2724_v43 }
 0x51b   : > { %v3015_v25 = vpop.f32.mrf.mxu3 }
 0x51c   : > { %v3016_v28 = vadd.f32 %v3015_v25, %v8256_v9  ;;  %v3578_v25 = vmul.f32 %v3530_v63, %v8258_v11  ;;  %v8259_v9 = vld [vmem:[#allocation12_spill] sm:$0xff] }
 0x51e   : > { %v3431_v37 = vadd.f32 %v6713_v26, %v3016_v28 }
 0x520   : > { %v3483_v6 = vadd.f32 %v7230_v5, %v3431_v37  ;;  %3065 = vmatmul.f32.gmra.mxu3 %v2782_v60  ;;  %v8260_v60 = vld [vmem:[#allocation72_spill] sm:$0xff] }
 0x522   : > { %v3531_v19 = vmax.f32 %v3483_v6, 0.0  ;;  %v2725_v6 = vrot.slane %v8260_v60, 7 }
 0x523   : > { %v3018_v29 = vpop.f32.mrf.mxu3 }
 0x524   : > { %v3579_v26 = vmul.f32 %v3531_v19, %v8259_v9  ;;  %v3019_v28 = vadd.f32 %v3018_v29, %v6707_v3  ;;  %v2780_v3 = vsel %vm1297_vm2, %v2724_v43, %v2725_v6  ;;  %v8262_v19 = vld [vmem:[#allocation95_spill] sm:$0xff] }
 0x526   : > { %v3626_v49 = vadd.f32 %v3579_v26, %v3578_v25  ;;  %v3432_v62 = vadd.f32 %v6737_v45, %v3019_v28  ;;  %v2727_v28 = vrot.slane %v6730_v39, 7  ;;  %v8265_v39 = vld [vmem:[#allocation17_spill] sm:$0xff] }
 0x528   : > { %v3484_v38 = vadd.f32 %v7230_v5, %v3432_v62  ;;  %3068 = vmatmul.f32.gmra.mxu3 %v2781_v31  ;;  %v2726_v62 = vrot.slane %v8262_v19, 7  ;;  %v8263_v31 = vld [vmem:[#allocation14_spill] sm:$0xff] }
 0x52a   : > { %v3532_v37 = vmax.f32 %v3484_v38, 0.0  ;;  %v8264_v38 = vld [vmem:[#allocation16_spill] sm:$0xff] }
 0x52b   : > { %v3021_v51 = vpop.f32.mrf.mxu3 }
 0x52c   : > { %v3580_v35 = vmul.f32 %v3532_v37, %v8261_v56  ;;  %v3022_v11 = vadd.f32 %v3021_v51, %v6733_v52  ;;  %v3783_v52 = vld [vmem:[%s7669_s8 + $0x68] sm:$0xff] }
 0x52d   : > { %3831 = vmatpush.msrb.mxu1 %v3783_v52 }
 0x52e   : > { %v7253_v63 = vadd.f32 %v3626_v49, %v3580_v35  ;;  %v3433_v45 = vadd.f32 %v6767_v1, %v3022_v11  ;;  %v2779_v35 = vsel %vm1297_vm2, %v2725_v6, %v2726_v62  ;;  %v2778_v6 = vsel %vm1297_vm2, %v2726_v62, %v2727_v28 }
 0x530   : > { %3071 = vmatmul.f32.gmra.mxu3 %v2780_v3  ;;  %v3485_v29 = vadd.f32 %v7230_v5, %v3433_v45  ;;  %v2728_v45 = vrot.slane %v6755_v58, 7 }
 0x532   : > { %v3533_v49 = vmax.f32 %v3485_v29, 0.0 }
 0x533   : > { %v3024_v16 = vpop.f32.mrf.mxu3 }
 0x534   : > { %v3025_v25 = vadd.f32 %v3024_v16, %v6762_v61  ;;  %v3581_v61 = vmul.f32 %v3533_v49, %v8263_v31 }
 0x536   : > { %v3434_v9 = vadd.f32 %v6788_v33, %v3025_v25  ;;  %v2729_v25 = vrot.slane %v6774_v0, 7 }
 0x538   : > { %v3486_v1 = vadd.f32 %v7230_v5, %v3434_v9  ;;  %3074 = vmatmul.f32.gmra.mxu3 %v2779_v35  ;;  %v2776_v35 = vsel %vm1297_vm2, %v2728_v45, %v2729_v25 }
 0x53a   : > { %v3534_v43 = vmax.f32 %v3486_v1, 0.0 }
 0x53b   : > { %v3027_v26 = vpop.f32.mrf.mxu3 }
 0x53c   : > { %v3582_v33 = vmul.f32 %v3534_v43, %v8264_v38  ;;  %v3028_v37 = vadd.f32 %v3027_v26, %v6786_v17  ;;  %v2777_v17 = vsel %vm1297_vm2, %v2727_v28, %v2728_v45  ;;  %v2730_v43 = vrot.slane %v6794_v46, 7  ;;  %v8266_v26 = vld [vmem:[#allocation18_spill] sm:$0xff]  ;;  %v8267_v28 = vld [vmem:[#allocation19_spill] sm:$0xff]  ;;  %v8268_v46 = vld [vmem:[#allocation20_spill] sm:$0xff] }
 0x53e   : > { %v3634_v51 = vadd.f32 %v3582_v33, %v3581_v61  ;;  %v3435_v60 = vadd.f32 %v6819_v53, %v3028_v37  ;;  %v2775_v33 = vsel %vm1297_vm2, %v2729_v25, %v2730_v43 }
 0x540   : > { %v3487_v56 = vadd.f32 %v7230_v5, %v3435_v60  ;;  %3077 = vmatmul.f32.gmra.mxu3 %v2778_v6  ;;  %v2731_v6 = vrot.slane %v6817_v18, 7 }
 0x542   : > { %v3535_v11 = vmax.f32 %v3487_v56, 0.0 }
 0x543   : > { %v3030_v3 = vpop.f32.mrf.mxu3 }
 0x544   : > { %v3583_v16 = vmul.f32 %v3535_v11, %v8265_v39  ;;  %v3031_v19 = vadd.f32 %v3030_v3, %v6813_v40  ;;  %v3782_v40 = vld [vmem:[%s7669_s8 + $0x60] sm:$0xff] }
 0x545   : > { %3832 = vmatpush.msrb.mxu1 %v3782_v40  ;;  %v8269_v39 = vld [vmem:[#allocation94_spill] sm:$0xff]  ;;  %v8271_v40 = vld [vmem:[#allocation21_spill] sm:$0xff] }
 0x546   : > { %v7279_v29 = vadd.f32 %v3634_v51, %v3583_v16  ;;  %v3436_v53 = vadd.f32 %v6842_v57, %v3031_v19  ;;  %v2732_v16 = vrot.slane %v8269_v39, 7 }
 0x548   : > { %3080 = vmatmul.f32.gmra.mxu3 %v2777_v17  ;;  %v3488_v9 = vadd.f32 %v7230_v5, %v3436_v53  ;;  %v2773_v53 = vsel %vm1297_vm2, %v2731_v6, %v2732_v16  ;;  %v3636_v39 = vrot.slane %v7279_v29, 4 }
 0x54a   : > { %v3536_v49 = vmax.f32 %v3488_v9, 0.0 }
 0x54b   : > { %v3033_v62 = vpop.f32.mrf.mxu3 }
 0x54c   : > { %v3034_v52 = vadd.f32 %v3033_v62, %v6838_v22  ;;  %v3584_v22 = vmul.f32 %v3536_v49, %v8266_v26 }
 0x54e   : > { %v3437_v58 = vadd.f32 %v6867_v23, %v3034_v52  ;;  %v8270_v52 = vld [vmem:[#allocation76_spill] sm:$0xff] }
 0x550   : > { %v3489_v57 = vadd.f32 %v7230_v5, %v3437_v58  ;;  %3083 = vmatmul.f32.gmra.mxu3 %v2776_v35  ;;  %v2733_v58 = vrot.slane %v8270_v52, 7  ;;  %v8272_v35 = vld [vmem:[#allocation22_spill] sm:$0xff]  ;;  %v3637_v52 = vadd.f32 %v3636_v39, %v7279_v29  ;;  %v8284_v39 = vld [vmem:[#allocation87_spill] sm:$0xff] }
 0x552   : > { %v3537_v1 = vmax.f32 %v3489_v57, 0.0 }
 0x553   : > { %v3036_v0 = vpop.f32.mrf.mxu3 }
 0x554   : > { %v3585_v23 = vmul.f32 %v3537_v1, %v8267_v28  ;;  %v3037_v31 = vadd.f32 %v3036_v0, %v6862_v15  ;;  %v2774_v15 = vsel %vm1297_vm2, %v2730_v43, %v2731_v6  ;;  %v2772_v0 = vsel %vm1297_vm2, %v2732_v16, %v2733_v58  ;;  %v8273_v28 = vld [vmem:[#allocation99_spill] sm:$0xff] }
 0x556   : > { %v3642_v61 = vadd.f32 %v3585_v23, %v3584_v22  ;;  %v3438_v38 = vadd.f32 %v6890_v47, %v3037_v31  ;;  %v2734_v23 = vrot.slane %v8273_v28, 7  ;;  %v8274_v31 = vld [vmem:[#allocation23_spill] sm:$0xff] }
 0x558   : > { %v3490_v37 = vadd.f32 %v7230_v5, %v3438_v38  ;;  %3086 = vmatmul.f32.gmra.mxu3 %v2775_v33 }
 0x55a   : > { %v3538_v51 = vmax.f32 %v3490_v37, 0.0 }
 0x55b   : > { %v3039_v60 = vpop.f32.mrf.mxu3 }
 0x55c   : > { %v3586_v56 = vmul.f32 %v3538_v51, %v8268_v46  ;;  %v3040_v11 = vadd.f32 %v3039_v60, %v6888_v42  ;;  %v3781_v42 = vld [vmem:[%s7669_s8 + $0x58] sm:$0xff] }
 0x55d   : > { %3833 = vmatpush.msrb.mxu1 %v3781_v42  ;;  %v8275_v51 = vld [vmem:[#allocation97_spill] sm:$0xff]  ;;  %v8276_v46 = vld [vmem:[#allocation108_spill] sm:$0xff] }
 0x55e   : > { %v7305_v3 = vadd.f32 %v3642_v61, %v3586_v56  ;;  %v3439_v47 = vadd.f32 %v6918_v12, %v3040_v11  ;;  %v2735_v60 = vrot.slane %v8275_v51, 7  ;;  %v8279_v42 = vld [vmem:[#allocation25_spill] sm:$0xff] }
 0x560   : > { %3089 = vmatmul.f32.gmra.mxu3 %v2774_v15  ;;  %v3491_v19 = vadd.f32 %v7230_v5, %v3439_v47  ;;  %v2770_v15 = vsel %vm1297_vm2, %v2734_v23, %v2735_v60 }
 0x562   : > { %v3539_v62 = vmax.f32 %v3491_v19, 0.0  ;;  %v8277_v19 = vld [vmem:[#allocation104_spill] sm:$0xff] }
 0x563   : > { %v3042_v45 = vpop.f32.mrf.mxu3 }
 0x564   : > { %v3043_v17 = vadd.f32 %v3042_v45, %v6912_v8  ;;  %v3587_v8 = vmul.f32 %v3539_v62, %v8271_v40 }
 0x566   : > { %v3440_v18 = vadd.f32 %v6938_v4, %v3043_v17  ;;  %v2736_v17 = vrot.slane %v8277_v19, 7  ;;  %v7377_v19 = vpop.f32.mrf.mxu2 }
 0x568   : > { %v3492_v12 = vadd.f32 %v7230_v5, %v3440_v18  ;;  %3092 = vmatmul.f32.gmra.mxu3 %v2773_v53  ;;  %v8278_v18 = vld [vmem:[#allocation24_spill] sm:$0xff] }
 0x56a   : > { %v3540_v25 = vmax.f32 %v3492_v12, 0.0  ;;  %v3628_v12 = vrot.slane %v7253_v63, 4 }
 0x56b   : > { %v3045_v9 = vpop.f32.mrf.mxu3 }
 0x56c   : > { %v3588_v4 = vmul.f32 %v3540_v25, %v8272_v35  ;;  %v3046_v49 = vadd.f32 %v3045_v9, %v6934_v2  ;;  %v2771_v2 = vsel %vm1297_vm2, %v2733_v58, %v2734_v23  ;;  %v2769_v58 = vsel %vm1297_vm2, %v2735_v60, %v2736_v17 }
 0x56d   : > { %v3644_v60 = vrot.slane %v7305_v3, 4 }
 0x56e   : > { %v3650_v57 = vadd.f32 %v3588_v4, %v3587_v8  ;;  %v3441_v1 = vadd.f32 %v6956_v32, %v3046_v49  ;;  %v3629_v8 = vadd.f32 %v3628_v12, %v7253_v63  ;;  %v3638_v4 = vrot.slane %v3637_v52, 2  ;;  %v3778_v12 = vld [vmem:[%s7669_s8 + $0x40] sm:$0xff] }
 0x570   : > { %v3493_v43 = vadd.f32 %v7230_v5, %v3441_v1  ;;  %3095 = vmatmul.f32.gmra.mxu3 %v2772_v0  ;;  %v8281_v1 = vld [vmem:[#allocation27_spill] sm:$0xff] }
 0x572   : > { %v3541_v26 = vmax.f32 %v3493_v43, 0.0  ;;  %v3630_v43 = vrot.slane %v3629_v8, 2 }
 0x573   : > { %v3048_v22 = vpop.f32.mrf.mxu3 }
 0x574   : > { %v3589_v61 = vmul.f32 %v3541_v26, %v8274_v31  ;;  %v3049_v38 = vadd.f32 %v3048_v22, %v6951_v27  ;;  %v3780_v27 = vld [vmem:[%s7669_s8 + $0x50] sm:$0xff]  ;;  %v3631_v22 = vadd.f32 %v3630_v43, %v3629_v8 }
 0x575   : > { %3834 = vmatpush.msrb.mxu1 %v3780_v27  ;;  %v8282_v31 = vld [vmem:[#allocation103_spill] sm:$0xff]  ;;  %v3645_v27 = vadd.f32 %v3644_v60, %v7305_v3 }
 0x576   : > { %v7331_v33 = vadd.f32 %v3650_v57, %v3589_v61  ;;  %v3442_v32 = vadd.f32 %v6974_v7, %v3049_v38  ;;  %v8280_v57 = vld [vmem:[#allocation80_spill] sm:$0xff]  ;;  %v2738_v63 = vrot.slane %v8282_v31, 7  ;;  %v3632_v61 = vrot.slane %v3631_v22, 1  ;;  %v3779_v38 = vld [vmem:[%s7669_s8 + $0x48] sm:$0xff] }
 0x577   : > { %3835 = vmatpush.msrb.mxu1 %v3779_v38  ;;  %v8287_v38 = vld [vmem:[#allocation111_spill] sm:$0xff] }
 0x578   : > { %3098 = vmatmul.f32.gmra.mxu3 %v2771_v2  ;;  %v3494_v6 = vadd.f32 %v7230_v5, %v3442_v32 }
 0x579   : > { %3836 = vmatpush.msrb.mxu1 %v3778_v12  ;;  %v8292_v12 = vld [vmem:[#allocation34_spill] sm:$0xff] }
 0x57a   : > { %v3542_v47 = vmax.f32 %v3494_v6, 0.0 }
 0x57b   : > { %v3051_v37 = vpop.f32.mrf.mxu3 }
 0x57c   : > { %v3052_v56 = vadd.f32 %v3051_v37, %v8276_v46  ;;  %v3633_v37 = vadd.f32 %v3632_v61, %v3631_v22  ;;  %v8283_v46 = vld [vmem:[#allocation109_spill] sm:$0xff] }
 0x57e   : > { %v3443_v11 = vadd.f32 %v6995_v34, %v3052_v56  ;;  %v3590_v34 = vmul.f32 %v3542_v47, %v8278_v18  ;;  %v2739_v56 = vrot.slane %v8283_v46, 7 }
 0x580   : > { %v3495_v7 = vadd.f32 %v7230_v5, %v3443_v11  ;;  %3101 = vmatmul.f32.gmra.mxu3 %v2770_v15  ;;  %v3754_v11 = vmul.f32 0.0625, %v3633_v37  ;;  %v2766_v15 = vsel %vm1297_vm2, %v2738_v63, %v2739_v56 }
 0x582   : > { %v3543_v45 = vmax.f32 %v3495_v7, 0.0  ;;  %v3646_v7 = vrot.slane %v3645_v27, 2 }
 0x583   : > { %v3054_v16 = vpop.f32.mrf.mxu3 }
 0x584   : > { %v3591_v53 = vmul.f32 %v3543_v45, %v8279_v42  ;;  %v3055_v62 = vadd.f32 %v3054_v16, %v6989_v30  ;;  %v2737_v30 = vrot.slane %v8280_v57, 7  ;;  %v2740_v16 = vrot.slane %v8284_v39, 7 }
 0x585   : > { %v3647_v18 = vadd.f32 %v3646_v7, %v3645_v27  ;;  %v8290_v7 = vld [vmem:[#allocation30_spill] sm:$0xff] }
 0x586   : > { %v3658_v25 = vadd.f32 %v3591_v53, %v3590_v34  ;;  %v3444_v9 = vadd.f32 %v7012_v10, %v3055_v62  ;;  %v3639_v10 = vadd.f32 %v3638_v4, %v3637_v52  ;;  %v2768_v29 = vsel %vm1297_vm2, %v2736_v17, %v2737_v30  ;;  %v7379_v17 = vpop.f32.mrf.mxu0 }
 0x587   : > { %v2767_v32 = vsel %vm1297_vm2, %v2737_v30, %v2738_v63  ;;  %v2765_v34 = vsel %vm1297_vm2, %v2739_v56, %v2740_v16  ;;  %v3648_v3 = vrot.slane %v3647_v18, 1  ;;  %v2741_v53 = vrot.slane %v6993_v54, 7  ;;  %v8285_v30 = vld [vmem:[#allocation112_spill] sm:$0xff] }
 0x588   : > { %v3496_v40 = vadd.f32 %v7230_v5, %v3444_v9  ;;  %3104 = vmatmul.f32.gmra.mxu3 %v2769_v58  ;;  %v3640_v28 = vrot.slane %v3639_v10, 1 }
 0x589   : > { %v3649_v9 = vadd.f32 %v3648_v3, %v3647_v18  ;;  %v2764_v52 = vsel %vm1297_vm2, %v2740_v16, %v2741_v53  ;;  %v8291_v3 = vld [vmem:[#allocation126_spill] sm:$0xff] }
 0x58a   : > { %v3544_v35 = vmax.f32 %v3496_v40, 0.0  ;;  %v3641_v2 = vadd.f32 %v3640_v28, %v3639_v10 }
 0x58b   : > { %v3057_v49 = vpop.f32.mrf.mxu3 }
 0x58c   : > { %v3592_v0 = vmul.f32 %v3544_v35, %v8281_v1  ;;  %v3755_v51 = vmul.f32 0.0625, %v3641_v2  ;;  %v3058_v58 = vadd.f32 %v3057_v49, %v7008_v55  ;;  %v3652_v35 = vrot.slane %v7331_v33, 4 }
 0x58d   : > { %v2742_v1 = vrot.slane %v8285_v30, 7  ;;  %v2743_v2 = vrot.slane %v8287_v38, 7 }
 0x58e   : > { %v7360_v26 = vadd.f32 %v3658_v25, %v3592_v0  ;;  %v3807_v47 = vsel %vm3806_vm5, %v3755_v51, %v3754_v11  ;;  %v7388_v25 = vpop.f32.mrf.mxu2  ;;  %v7394_v8 = vpop.f32.mrf.mxu0  ;;  %v8286_v0 = vld [vmem:[#allocation116_spill] sm:$0xff] }
 0x58f   : > { %v3445_v43 = vadd.f32 %v8286_v0, %v3058_v58  ;;  %v3777_v51 = vld [vmem:[%s7669_s8 + $0x38] sm:$0xff]  ;;  %v2762_v27 = vsel %vm1297_vm2, %v2742_v1, %v2743_v2  ;;  %v8293_v58 = vld [vmem:[#allocation115_spill] sm:$0xff] }
 0x590   : > { %3107 = vmatmul.f32.gmra.mxu3 %v2768_v29  ;;  %3837 = vmatpush.msrb.mxu1 %v3777_v51  ;;  %v3660_v18 = vrot.slane %v7360_v26, 4 }
 0x591   : > { %v3497_v28 = vadd.f32 %v7230_v5, %v3445_v43 }
 0x592   : > { %v3661_v43 = vadd.f32 %v3660_v18, %v7360_v26 }
 0x593   : > { %v3060_v23 = vpop.f32.mrf.mxu3 }
 0x594   : > { %v3061_v62 = vadd.f32 %v3060_v23, %v7028_v14  ;;  %v3756_v14 = vmul.f32 0.0625, %v3649_v9 }
 0x596   : > { %v3446_v54 = vadd.f32 %v7048_v50, %v3061_v62  ;;  %v3653_v50 = vadd.f32 %v3652_v35, %v7331_v33  ;;  %v7410_v22 = vsel %vm3808_vm6, %v3756_v14, %v3807_v47  ;;  %v7418_v31 = vpop.f32.mrf.mxu0  ;;  %v8294_v14 = vld [vmem:[#allocation125_spill] sm:$0xff] }
 0x598   : > { %3110 = vmatmul.f32.gmra.mxu3 %v2767_v32  ;;  %v3498_v49 = vadd.f32 %v7230_v5, %v3446_v54  ;;  %v3545_v32 = vmax.f32 %v3497_v28, 0.0 }
 0x59a   : > { %v3546_v33 = vmax.f32 %v3498_v49, 0.0 }
 0x59b   : > { %v3063_v6 = vpop.f32.mrf.mxu3 }
 0x59c   : > { %v3064_v40 = vadd.f32 %v3063_v6, %v7046_v24  ;;  %v8288_v6 = vld [vmem:[#allocation29_spill] sm:$0xff] }
 0x59d   : > { %v3594_v46 = vmul.f32 %v3546_v33, %v8288_v6 }
 0x59e   : > { %v3447_v10 = vadd.f32 %v7072_v21, %v3064_v40  ;;  %v2744_v40 = vrot.slane %v8293_v58, 7  ;;  %v8304_v58 = vld [vmem:[#allocation93_spill] sm:$0xff] }
 0x5a0   : > { %3113 = vmatmul.f32.gmra.mxu3 %v2766_v15  ;;  %v3499_v21 = vadd.f32 %v7230_v5, %v3447_v10  ;;  %v8289_v15 = vld [vmem:[#allocation28_spill] sm:$0xff]  ;;  %v8297_v10 = vld [vmem:[#allocation130_spill] sm:$0xff] }
 0x5a1   : > { %v3593_v47 = vmul.f32 %v3545_v32, %v8289_v15  ;;  %v8299_v32 = vld [vmem:[#allocation119_spill] sm:$0xff] }
 0x5a2   : > { %v3547_v37 = vmax.f32 %v3499_v21, 0.0  ;;  %v2761_v21 = vsel %vm1297_vm2, %v2743_v2, %v2744_v40 }
 0x5a3   : > { %v3066_v45 = vpop.f32.mrf.mxu3 }
 0x5a4   : > { %v3067_v55 = vadd.f32 %v3066_v45, %v7066_v41  ;;  %v7414_v41 = vpop.f32.mrf.mxu2  ;;  %v3595_v45 = vmul.f32 %v3547_v37, %v8290_v7  ;;  %v2745_v37 = vrot.slane %v8299_v32, 7 }
 0x5a6   : > { %v2760_v7 = vsel %vm1297_vm2, %v2744_v40, %v2745_v37  ;;  %v8305_v40 = vld [vmem:[#allocation50_spill] sm:$0xff] }
 0x5a8   : > { %3116 = vmatmul.f32.gmra.mxu3 %v2765_v34  ;;  %v3666_v34 = vadd.f32 %v3594_v46, %v3593_v47 }
 0x5aa   : > { %v3667_v54 = vadd.f32 %v3666_v34, %v3595_v45 }
 0x5ab   : > { %v3069_v42 = vpop.f32.mrf.mxu3 }
 0x5ac   : > { %v3070_v4 = vadd.f32 %v3069_v42, %v7085_v48  ;;  %v2763_v48 = vsel %vm1297_vm2, %v2741_v53, %v2742_v1  ;;  %v7437_v53 = vpop.f32.mrf.mxu2  ;;  %v8296_v1 = vld [vmem:[#allocation38_spill] sm:$0xff] }
 0x5ae   : > { %v3449_v29 = vadd.f32 %v7107_v44, %v3070_v4  ;;  %v3654_v44 = vrot.slane %v3653_v50, 2  ;;  %v7442_v4 = vpop.f32.mrf.mxu0 }
 0x5b0   : > { %3119 = vmatmul.f32.gmra.mxu3 %v2764_v52  ;;  %v3501_v63 = vadd.f32 %v7230_v5, %v3449_v29  ;;  %v3655_v56 = vadd.f32 %v3654_v44, %v3653_v50  ;;  %v3775_v50 = vld [vmem:[%s7669_s8 + $0x28] sm:$0xff]  ;;  %v3774_v29 = vld [vmem:[%s7669_s8 + $0x20] sm:$0xff]  ;;  %v3662_v44 = vrot.slane %v3661_v43, 2 }
 0x5b2   : > { %v3549_v11 = vmax.f32 %v3501_v63, 0.0  ;;  %v3656_v62 = vrot.slane %v3655_v56, 1 }
 0x5b3   : > { %v3072_v57 = vpop.f32.mrf.mxu3 }
 0x5b4   : > { %v3073_v24 = vadd.f32 %v3072_v57, %v7102_v20  ;;  %v3448_v20 = vadd.f32 %v7089_v59, %v3067_v55  ;;  %v3776_v59 = vld [vmem:[%s7669_s8 + $0x30] sm:$0xff]  ;;  %v3597_v9 = vmul.f32 %v3549_v11, %v8292_v12  ;;  %v7467_v6 = vpop.f32.mrf.mxu2 }
 0x5b5   : > { %3838 = vmatpush.msrb.mxu1 %v3776_v59  ;;  %v8295_v57 = vld [vmem:[#allocation31_spill] sm:$0xff] }
 0x5b6   : > { %v3450_v23 = vadd.f32 %v7122_v36, %v3073_v24  ;;  %v3500_v36 = vadd.f32 %v7230_v5, %v3448_v20  ;;  %v8298_v24 = vld [vmem:[#allocation132_spill] sm:$0xff]  ;;  %v3668_v20 = vrot.slane %v3667_v54, 4  ;;  %v7470_v47 = vpop.f32.mrf.mxu0 }
 0x5b7   : > { %3839 = vmatpush.msrb.mxu1 %v3775_v50 }
 0x5b8   : > { %3122 = vmatmul.f32.gmra.mxu3 %v2763_v48  ;;  %v3502_v60 = vadd.f32 %v7230_v5, %v3450_v23  ;;  %v3548_v39 = vmax.f32 %v3500_v36, 0.0  ;;  %v3657_v48 = vadd.f32 %v3656_v62, %v3655_v56  ;;  %v3773_v23 = vld [vmem:[%s7669_s8 + $0x18] sm:$0xff]  ;;  %v3669_v51 = vadd.f32 %v3668_v20, %v3667_v54  ;;  %v8300_v36 = vld [vmem:[#allocation107_spill] sm:$0xff] }
 0x5b9   : > { %3840 = vmatpush.msrb.mxu1 %v3774_v29  ;;  %v3663_v56 = vadd.f32 %v3662_v44, %v3661_v43  ;;  %v8303_v62 = vld [vmem:[#allocation44_spill] sm:$0xff]  ;;  %v2746_v54 = vrot.slane %v8304_v58, 7  ;;  %v8306_v20 = vld [vmem:[#allocation117_spill] sm:$0xff] }
 0x5ba   : > { %v3550_v16 = vmax.f32 %v3502_v60, 0.0  ;;  %v3596_v30 = vmul.f32 %v3548_v39, %v8295_v57  ;;  %v3757_v38 = vmul.f32 0.0625, %v3657_v48  ;;  %v3670_v39 = vrot.slane %v3669_v51, 2  ;;  %v3770_v44 = vld [vmem:[%s7669_s8] sm:$0xff] }
 0x5bb   : > { %v3075_v61 = vpop.f32.mrf.mxu3  ;;  %3841 = vmatpush.msrb.mxu1 %v3773_v23 }
 0x5bc   : > { %v3076_v42 = vadd.f32 %v3075_v61, %v8291_v3  ;;  %v3598_v0 = vmul.f32 %v3550_v16, %v8296_v1  ;;  %v3674_v28 = vadd.f32 %v3597_v9, %v3596_v30  ;;  %v3772_v61 = vld [vmem:[%s7669_s8 + $0x10] sm:$0xff]  ;;  %v3811_v45 = vsel %vm3810_vm7, %v3757_v38, %v7410_v22  ;;  %v7482_v43 = vpop.f32.mrf.mxu2 }
 0x5bd   : > { %3842 = vmatpush.msrb.mxu1 %v3772_v61  ;;  %v8302_v16 = vld [vmem:[#allocation48_spill] sm:$0xff] }
 0x5be   : > { %v3451_v55 = vadd.f32 %v8297_v10, %v3076_v42  ;;  %v3675_v33 = vadd.f32 %v3674_v28, %v3598_v0  ;;  %v3664_v42 = vrot.slane %v3663_v56, 1  ;;  %v7487_v50 = vpop.f32.mrf.mxu0 }
 0x5c0   : > { %3125 = vmatmul.f32.gmra.mxu3 %v2762_v27  ;;  %v3503_v63 = vadd.f32 %v7230_v5, %v3451_v55  ;;  %v3676_v46 = vrot.slane %v3675_v33, 4  ;;  %v8301_v27 = vld [vmem:[#allocation131_spill] sm:$0xff]  ;;  %v3665_v1 = vadd.f32 %v3664_v42, %v3663_v56  ;;  %v2759_v55 = vsel %vm1297_vm2, %v2745_v37, %v2746_v54 }
 0x5c2   : > { %v3551_v11 = vmax.f32 %v3503_v63, 0.0  ;;  %v3677_v3 = vadd.f32 %v3676_v46, %v3675_v33  ;;  %v3758_v48 = vmul.f32 0.0625, %v3665_v1 }
 0x5c3   : > { %v3078_v52 = vpop.f32.mrf.mxu3 }
 0x5c4   : > { %v3079_v35 = vadd.f32 %v3078_v52, %v8294_v14  ;;  %v3599_v12 = vmul.f32 %v3551_v11, %v8303_v62  ;;  %v3671_v14 = vadd.f32 %v3670_v39, %v3669_v51  ;;  %v3678_v30 = vrot.slane %v3677_v3, 2  ;;  %v2941_v46 = vpop.f32.mrf.mxu2  ;;  %v8308_v39 = vld [vmem:[#allocation123_spill] sm:$0xff] }
 0x5c5   : > { %v3813_v32 = vsel %vm3812_vm8, %v3758_v48, %v3811_v45 }
 0x5c6   : > { %v3452_v49 = vadd.f32 %v8298_v24, %v3079_v35  ;;  %v3672_v24 = vrot.slane %v3671_v14, 1  ;;  %v3679_v29 = vadd.f32 %v3678_v30, %v3677_v3  ;;  %v8311_v30 = vld [vmem:[#allocation61_spill] sm:$0xff] }
 0x5c8   : > { %v3504_v26 = vadd.f32 %v7230_v5, %v3452_v49  ;;  %3128 = vmatmul.f32.gmra.mxu3 %v2761_v21  ;;  %v3673_v63 = vadd.f32 %v3672_v24, %v3671_v14  ;;  %v3680_v61 = vrot.slane %v3679_v29, 1 }
 0x5ca   : > { %v3552_v59 = vmax.f32 %v3504_v26, 0.0  ;;  %v2747_v26 = vrot.slane %v8306_v20, 7  ;;  %v3681_v51 = vadd.f32 %v3680_v61, %v3679_v29  ;;  %v8312_v29 = vld [vmem:[#allocation101_spill] sm:$0xff] }
 0x5cb   : > { %v3081_v2 = vpop.f32.mrf.mxu3  ;;  %v2750_v48 = vrot.slane %v8312_v29, 7  ;;  %v8314_v61 = vld [vmem:[#allocation65_spill] sm:$0xff] }
 0x5cc   : > { %v3082_v60 = vadd.f32 %v3081_v2, %v8300_v36  ;;  %v3600_v18 = vmul.f32 %v3552_v59, %v8302_v16  ;;  %v3760_v56 = vmul.f32 0.0625, %v3681_v51  ;;  %v2748_v16 = vrot.slane %v8308_v39, 7 }
 0x5ce   : > { %v3453_v15 = vadd.f32 %v8301_v27, %v3082_v60  ;;  %v3682_v35 = vadd.f32 %v3600_v18, %v3599_v12  ;;  %v3759_v60 = vmul.f32 0.0625, %v3673_v63  ;;  %v8309_v18 = vld [vmem:[#allocation57_spill] sm:$0xff] }
 0x5d0   : > { %v3505_v34 = vadd.f32 %v7230_v5, %v3453_v15  ;;  %3131 = vmatmul.f32.gmra.mxu3 %v2760_v7  ;;  %v8307_v15 = vld [vmem:[#allocation54_spill] sm:$0xff]  ;;  %v3815_v62 = vsel %vm3814_vm9, %v3759_v60, %v3813_v32 }
 0x5d1   : > { %v3817_v12 = vsel %vm3816_vm10, %v3760_v56, %v3815_v62 }
 0x5d2   : > { %v3553_v9 = vmax.f32 %v3505_v34, 0.0 }
 0x5d3   : > { %v3084_v52 = vpop.f32.mrf.mxu3 }
 0x5d4   : > { %v3601_v57 = vmul.f32 %v3553_v9, %v8305_v40  ;;  %v3085_v22 = vadd.f32 %v3084_v52, %v7377_v19  ;;  %v2944_v40 = vpop.f32.mrf.mxu2 }
 0x5d6   : > { %v3683_v0 = vadd.f32 %v3682_v35, %v3601_v57  ;;  %v3454_v10 = vadd.f32 %v7379_v17, %v3085_v22  ;;  %v3771_v17 = vld [vmem:[%s7669_s8 + $0x8] sm:$0xff] }
 0x5d7   : > { %3843 = vmatpush.msrb.mxu1 %v3771_v17  ;;  %v8310_v57 = vld [vmem:[#allocation122_spill] sm:$0xff] }
 0x5d8   : > { %v3684_v49 = vrot.slane %v3683_v0, 4  ;;  %3134 = vmatmul.f32.gmra.mxu3 %v2759_v55  ;;  %v3506_v19 = vadd.f32 %v7230_v5, %v3454_v10  ;;  %v2749_v22 = vrot.slane %v8310_v57, 7 }
 0x5d9   : > { %3844 = vmatpush.msrb.mxu1 %v3770_v44  ;;  %v8313_v44 = vld [vmem:[#allocation105_spill] sm:$0xff] }
 0x5da   : > { %v3685_v28 = vadd.f32 %v3684_v49, %v3683_v0  ;;  %v3554_v37 = vmax.f32 %v3506_v19, 0.0  ;;  %v2756_v55 = vsel %vm1297_vm2, %v2748_v16, %v2749_v22  ;;  %v2751_v63 = vrot.slane %v8313_v44, 7  ;;  %v8322_v44 = vld [vmem:[#allocation85_spill] sm:$0xff] }
 0x5db   : > { %v3087_v21 = vpop.f32.mrf.mxu3 }
 0x5dc   : > { %v3686_v23 = vrot.slane %v3685_v28, 2  ;;  %v3088_v33 = vadd.f32 %v3087_v21, %v7388_v25  ;;  %v2758_v25 = vsel %vm1297_vm2, %v2746_v54, %v2747_v26  ;;  %v3602_v7 = vmul.f32 %v3554_v37, %v8307_v15  ;;  %v2947_v21 = vpop.f32.mrf.mxu2 }
 0x5dd   : > { %v2757_v54 = vsel %vm1297_vm2, %v2747_v26, %v2748_v16  ;;  %v2755_v26 = vsel %vm1297_vm2, %v2749_v22, %v2750_v48  ;;  %v2754_v51 = vsel %vm1297_vm2, %v2750_v48, %v2751_v63 }
 0x5de   : > { %v3455_v38 = vadd.f32 %v7394_v8, %v3088_v33  ;;  %v3687_v2 = vadd.f32 %v3686_v23, %v3685_v28  ;;  %v3376_v8 = vpop.f32.mrf.mxu0 }
 0x5e0   : > { %v3507_v59 = vadd.f32 %v7230_v5, %v3455_v38  ;;  %3137 = vmatmul.f32.gmra.mxu3 %v2758_v25  ;;  %v3688_v36 = vrot.slane %v3687_v2, 1 }
 0x5e2   : > { %v3555_v11 = vmax.f32 %v3507_v59, 0.0  ;;  %v3689_v27 = vadd.f32 %v3688_v36, %v3687_v2  ;;  %v8315_v2 = vld [vmem:[#allocation69_spill] sm:$0xff] }
 0x5e3   : > { %v3090_v45 = vpop.f32.mrf.mxu3 }
 0x5e4   : > { %v3603_v34 = vmul.f32 %v3555_v11, %v8309_v18  ;;  %v3091_v3 = vadd.f32 %v3090_v45, %v7414_v41  ;;  %v3761_v42 = vmul.f32 0.0625, %v3689_v27  ;;  %v2950_v25 = vpop.f32.mrf.mxu2  ;;  %v8316_v11 = vld [vmem:[#allocation71_spill] sm:$0xff]  ;;  %v8317_v45 = vld [vmem:[#allocation129_spill] sm:$0xff] }
 0x5e6   : > { %v3690_v9 = vadd.f32 %v3603_v34, %v3602_v7  ;;  %v3456_v52 = vadd.f32 %v7418_v31, %v3091_v3  ;;  %v3819_v58 = vsel %vm3818_vm11, %v3761_v42, %v3817_v12  ;;  %v3379_v10 = vpop.f32.mrf.mxu0 }
 0x5e7   : > { %3845 = vmatmul.f32.vlgmr.msrb.gmra.mxu1 %v3819_v58 }
 0x5e8   : > { %v3508_v14 = vadd.f32 %v7230_v5, %v3456_v52  ;;  %3140 = vmatmul.f32.gmra.mxu3 %v2757_v54  ;;  %v8319_v54 = vld [vmem:[#allocation75_spill] sm:$0xff] }
 0x5ea   : > { %v3556_v35 = vmax.f32 %v3508_v14, 0.0 }
 0x5eb   : > { %v3093_v41 = vpop.f32.mrf.mxu3 }
 0x5ec   : > { %v3604_v1 = vmul.f32 %v3556_v35, %v8311_v30  ;;  %v3094_v0 = vadd.f32 %v3093_v41, %v7437_v53  ;;  %v2953_v16 = vpop.f32.mrf.mxu2  ;;  %v8320_v35 = vld [vmem:[#allocation79_spill] sm:$0xff] }
 0x5ee   : > { %v7517_v31 = vadd.f32 %v3690_v9, %v3604_v1  ;;  %v3457_v24 = vadd.f32 %v7442_v4, %v3094_v0  ;;  %v3382_v53 = vpop.f32.mrf.mxu0 }
 0x5f0   : > { %3143 = vmatmul.f32.gmra.mxu3 %v2756_v55  ;;  %v3509_v28 = vadd.f32 %v7230_v5, %v3457_v24 }
 0x5f2   : > { %v3557_v23 = vmax.f32 %v3509_v28, 0.0 }
 0x5f3   : > { %v3096_v49 = vpop.f32.mrf.mxu3 }
 0x5f4   : > { %v3097_v19 = vadd.f32 %v3096_v49, %v7467_v6  ;;  %v3605_v38 = vmul.f32 %v3557_v23, %v8314_v61  ;;  %v2956_v52 = vpop.f32.mrf.mxu2  ;;  %v8323_v61 = vld [vmem:[#allocation88_spill] sm:$0xff] }
 0x5f6   : > { %v3458_v20 = vadd.f32 %v7470_v47, %v3097_v19  ;;  %v3385_v36 = vpop.f32.mrf.mxu0 }
 0x5f8   : > { %v3510_v33 = vadd.f32 %v7230_v5, %v3458_v20  ;;  %3146 = vmatmul.f32.gmra.mxu3 %v2755_v26 }
 0x5fa   : > { %v3558_v4 = vmax.f32 %v3510_v33, 0.0 }
 0x5fb   : > { %v3099_v17 = vpop.f32.mrf.mxu3 }
 0x5fc   : > { %v3606_v32 = vmul.f32 %v3558_v4, %v8315_v2  ;;  %v3100_v6 = vadd.f32 %v3099_v17, %v7482_v43  ;;  %v8318_v43 = vrot.slane %v8317_v45, 7  ;;  %v2959_v24 = vpop.f32.mrf.mxu2 }
 0x5fe   : > { %v3698_v37 = vadd.f32 %v3606_v32, %v3605_v38  ;;  %v3459_v47 = vadd.f32 %v7487_v50, %v3100_v6  ;;  %v2753_v50 = vsel %vm1297_vm2, %v2751_v63, %v8318_v43  ;;  %v3388_v18 = vpop.f32.mrf.mxu0 }
 0x600   : > { %v3511_v59 = vadd.f32 %v7230_v5, %v3459_v47  ;;  %3149 = vmatmul.f32.gmra.mxu3 %v2754_v51 }
 0x602   : > { %v3559_v60 = vmax.f32 %v3511_v59, 0.0 }
 0x603   : > { %v3102_v56 = vpop.f32.mrf.mxu3 }
 0x604   : > { %v3607_v27 = vmul.f32 %v3559_v60, %v8316_v11  ;;  %v3103_v15 = vadd.f32 %v3102_v56, %v2941_v46  ;;  %v2962_v26 = vpop.f32.mrf.mxu2 }
 0x606   : > { %v7538_v7 = vadd.f32 %v3698_v37, %v3607_v27  ;;  %v3460_v39 = vadd.f32 %v3376_v8, %v3103_v15  ;;  %v3391_v8 = vpop.f32.mrf.mxu0 }
 0x608   : > { %3152 = vmatmul.f32.gmra.mxu3 %v2753_v50  ;;  %v3512_v3 = vadd.f32 %v7230_v5, %v3460_v39 }
 0x60a   : > { %v3560_v12 = vmax.f32 %v3512_v3, 0.0 }
 0x60b   : > { %v3105_v34 = vpop.f32.mrf.mxu3 }
 0x60c   : > { %v3106_v42 = vadd.f32 %v3105_v34, %v2944_v40  ;;  %v3608_v14 = vmul.f32 %v3560_v12, %v8319_v54  ;;  %v8321_v40 = vld [vmem:[#allocation83_spill] sm:$0xff]  ;;  %v2965_v47 = vpop.f32.mrf.mxu2  ;;  %v8325_v12 = vld [vmem:[#allocation96_spill] sm:$0xff] }
 0x60e   : > { %v3461_v62 = vadd.f32 %v3379_v10, %v3106_v42  ;;  %v3394_v29 = vpop.f32.mrf.mxu0  ;;  %v3700_v42 = vrot.slane %v7538_v7, 4 }
 0x610   : > { %v3513_v9 = vadd.f32 %v7230_v5, %v3461_v62 }
 0x612   : > { %v3561_v46 = vmax.f32 %v3513_v9, 0.0 }
 0x613   : > { %v3108_v58 = vpop.f32.mrf.mxu3 }
 0x614   : > { %v3609_v13 = vmul.f32 %v3561_v46, %v8320_v35  ;;  %v3109_v41 = vadd.f32 %v3108_v58, %v2947_v21  ;;  %v7560_v15 = vpop.f32.mrf.mxu2  ;;  %v8326_v46 = vld [vmem:[#allocation100_spill] sm:$0xff] }
 0x616   : > { %v3706_v57 = vadd.f32 %v3609_v13, %v3608_v14  ;;  %v3462_v22 = vadd.f32 %v3382_v53, %v3109_v41  ;;  %v3397_v33 = vpop.f32.mrf.mxu0  ;;  %v3692_v14 = vrot.slane %v7517_v31, 4 }
 0x618   : > { %v3514_v30 = vadd.f32 %v7230_v5, %v3462_v22  ;;  %v3693_v22 = vadd.f32 %v3692_v14, %v7517_v31 }
 0x61a   : > { %v3562_v1 = vmax.f32 %v3514_v30, 0.0 }
 0x61b   : > { %v3111_v0 = vpop.f32.mrf.mxu3 }
 0x61c   : > { %v3610_v10 = vmul.f32 %v3562_v1, %v8321_v40  ;;  %v3112_v55 = vadd.f32 %v3111_v0, %v2950_v25  ;;  %v2971_v54 = vpop.f32.mrf.mxu2  ;;  %v8327_v40 = vld [vmem:[#allocation102_spill] sm:$0xff] }
 0x61e   : > { %v7550_v49 = vadd.f32 %v3706_v57, %v3610_v10  ;;  %v3463_v48 = vadd.f32 %v3385_v36, %v3112_v55  ;;  %v3400_v51 = vpop.f32.mrf.mxu0  ;;  %v8324_v36 = vld [vmem:[#allocation92_spill] sm:$0xff]  ;;  %v3694_v55 = vrot.slane %v3693_v22, 2 }
 0x620   : > { %v3515_v19 = vadd.f32 %v7230_v5, %v3463_v48 }
 0x622   : > { %v3563_v23 = vmax.f32 %v3515_v19, 0.0  ;;  %v3695_v19 = vadd.f32 %v3694_v55, %v3693_v22 }
 0x623   : > { %v3114_v28 = vpop.f32.mrf.mxu3 }
 0x624   : > { %v3115_v20 = vadd.f32 %v3114_v28, %v2953_v16  ;;  %v3611_v63 = vmul.f32 %v3563_v23, %v8322_v44 }
 0x626   : > { %v3464_v21 = vadd.f32 %v3388_v18, %v3115_v20  ;;  %v7563_v39 = vpop.f32.mrf.mxu0 }
 0x628   : > { %v3516_v53 = vadd.f32 %v7230_v5, %v3464_v21 }
 0x62a   : > { %v3564_v4 = vmax.f32 %v3516_v53, 0.0 }
 0x62b   : > { %v3117_v17 = vpop.f32.mrf.mxu3 }
 0x62c   : > { %v3612_v38 = vmul.f32 %v3564_v4, %v8323_v61  ;;  %v3118_v2 = vadd.f32 %v3117_v17, %v2956_v52  ;;  %v7582_v61 = vld [vmem:[#allocation5] ss:$0 sm:$0xff] }
 0x62e   : > { %v3714_v32 = vadd.f32 %v3612_v38, %v3611_v63  ;;  %v3465_v6 = vadd.f32 %v3391_v8, %v3118_v2  ;;  %v7570_v41 = vpop.f32.mrf.mxu0  ;;  %v3701_v8 = vadd.f32 %v3700_v42, %v7538_v7  ;;  %v3696_v7 = vrot.slane %v3695_v19, 1 }
 0x630   : > { %v3517_v37 = vadd.f32 %v7230_v5, %v3465_v6  ;;  %v3702_v1 = vrot.slane %v3701_v8, 2  ;;  %v3697_v23 = vadd.f32 %v3696_v7, %v3695_v19 }
 0x632   : > { %v3565_v25 = vmax.f32 %v3517_v37, 0.0  ;;  %v3703_v48 = vadd.f32 %v3702_v1, %v3701_v8  ;;  %v3762_v17 = vmul.f32 0.0625, %v3697_v23 }
 0x633   : > { %v3120_v59 = vpop.f32.mrf.mxu3 }
 0x634   : > { %v3613_v60 = vmul.f32 %v3565_v25, %v8324_v36  ;;  %v3121_v56 = vadd.f32 %v3120_v59, %v2959_v24  ;;  %v3704_v20 = vrot.slane %v3703_v48, 1 }
 0x636   : > { %v7558_v11 = vadd.f32 %v3714_v32, %v3613_v60  ;;  %v3466_v27 = vadd.f32 %v3394_v29, %v3121_v56  ;;  %v2974_v29 = vpop.f32.mrf.mxu2  ;;  %v3409_v28 = vpop.f32.mrf.mxu0 }
 0x638   : > { %v3518_v43 = vadd.f32 %v7230_v5, %v3466_v27  ;;  %v3716_v56 = vrot.slane %v7558_v11, 4 }
 0x63a   : > { %v3566_v18 = vmax.f32 %v3518_v43, 0.0 }
 0x63b   : > { %v3123_v45 = vpop.f32.mrf.mxu3 }
 0x63c   : > { %v3124_v50 = vadd.f32 %v3123_v45, %v2962_v26  ;;  %v3614_v9 = vmul.f32 %v3566_v18, %v8325_v12  ;;  %v3705_v26 = vadd.f32 %v3704_v20, %v3703_v48 }
 0x63e   : > { %v3467_v16 = vadd.f32 %v3397_v33, %v3124_v50  ;;  %v3412_v31 = vpop.f32.mrf.mxu0  ;;  %v3763_v53 = vmul.f32 0.0625, %v3705_v26  ;;  %v3708_v33 = vrot.slane %v7550_v49, 4 }
 0x640   : > { %v3519_v34 = vadd.f32 %v7230_v5, %v3467_v16  ;;  %v3709_v44 = vadd.f32 %v3708_v33, %v7550_v49  ;;  %v3820_v63 = vsel %vm3806_vm5, %v3763_v53, %v3762_v17 }
 0x642   : > { %v3567_v3 = vmax.f32 %v3519_v34, 0.0  ;;  %v3710_v2 = vrot.slane %v3709_v44, 2  ;;  %v3717_v34 = vadd.f32 %v3716_v56, %v7558_v11 }
 0x643   : > { %v3126_v62 = vpop.f32.mrf.mxu3 }
 0x644   : > { %v3615_v52 = vmul.f32 %v3567_v3, %v8326_v46  ;;  %v3127_v58 = vadd.f32 %v3126_v62, %v2965_v47  ;;  %v3711_v25 = vadd.f32 %v3710_v2, %v3709_v44  ;;  %v3718_v14 = vrot.slane %v3717_v34, 2  ;;  %v8328_v44 = vld [vmem:[#allocation110_spill] sm:$0xff] }
 0x646   : > { %v3722_v35 = vadd.f32 %v3615_v52, %v3614_v9  ;;  %v3468_v13 = vadd.f32 %v3400_v51, %v3127_v58  ;;  %v3415_v37 = vpop.f32.mrf.mxu0  ;;  %v3712_v43 = vrot.slane %v3711_v25, 1 }
 0x648   : > { %v3520_v57 = vadd.f32 %v7230_v5, %v3468_v13  ;;  %v2977_v5 = vpop.f32.mrf.mxu2  ;;  %v3713_v12 = vadd.f32 %v3712_v43, %v3711_v25 }
 0x64a   : > { %v3568_v30 = vmax.f32 %v3520_v57, 0.0  ;;  %v3764_v8 = vmul.f32 0.0625, %v3713_v12 }
 0x64b   : > { %v3129_v0 = vpop.f32.mrf.mxu3 }
 0x64c   : > { %v3616_v10 = vmul.f32 %v3568_v30, %v8327_v40  ;;  %v3130_v46 = vadd.f32 %v3129_v0, %v7560_v15  ;;  %v3719_v40 = vadd.f32 %v3718_v14, %v3717_v34  ;;  %v4230_v15 = vld [vmem:[%s7668_s7] ss:$0 sm:$0xff] }
 0x64e   : > { %v3723_v24 = vadd.f32 %v3722_v35, %v3616_v10  ;;  %v3418_v62 = vpop.f32.mrf.mxu0  ;;  %v3469_v11 = vadd.f32 %v7563_v39, %v3130_v46 }
 0x650   : > { %v2980_v38 = vpop.f32.mrf.mxu2  ;;  %v3724_v27 = vrot.slane %v3723_v24, 4  ;;  %v3521_v48 = vadd.f32 %v4230_v15, %v3469_v11 }
 0x652   : > { %v3725_v3 = vadd.f32 %v3724_v27, %v3723_v24 }
 0x653   : > { %v3132_v21 = vpop.f32.mrf.mxu3 }
 0x654   : > { %v3133_v42 = vadd.f32 %v3132_v21, %v2971_v54  ;;  %v3726_v35 = vrot.slane %v3725_v3, 2 }
 0x656   : > { %v3470_v13 = vadd.f32 %v7570_v41, %v3133_v42  ;;  %v3727_v10 = vadd.f32 %v3726_v35, %v3725_v3  ;;  %v3821_v41 = vsel %vm3808_vm6, %v3764_v8, %v3820_v63  ;;  %v3421_v20 = vpop.f32.mrf.mxu0 }
 0x658   : > { %v2983_v18 = vpop.f32.mrf.mxu2  ;;  %v3522_v0 = vadd.f32 %v4230_v15, %v3470_v13  ;;  %v3728_v7 = vrot.slane %v3727_v10, 1 }
 0x65a   : > { %v3570_v26 = vmax.f32 %v3522_v0, 0.0  ;;  %v3729_v2 = vadd.f32 %v3728_v7, %v3727_v10  ;;  %v8334_v0 = vld [vmem:[#allocation127_spill] sm:$0xff] }
 0x65b   : > { %v3135_v4 = vpop.f32.mrf.mxu3 }
 0x65c   : > { %v3136_v52 = vadd.f32 %v3135_v4, %v2974_v29  ;;  %v3766_v43 = vmul.f32 0.0625, %v3729_v2 }
 0x65e   : > { %v3471_v30 = vadd.f32 %v3409_v28, %v3136_v52  ;;  %v3720_v28 = vrot.slane %v3719_v40, 1 }
 0x660   : > { %v2986_v24 = vpop.f32.mrf.mxu2  ;;  %v3523_v19 = vadd.f32 %v4230_v15, %v3471_v30  ;;  %v3721_v17 = vadd.f32 %v3720_v28, %v3719_v40 }
 0x662   : > { %v3571_v53 = vmax.f32 %v3523_v19, 0.0 }
 0x663   : > { %v3138_v32 = vpop.f32.mrf.mxu3 }
 0x664   : > { %v3846_v6 = vpop.f32.mrf.mxu1  ;;  %v3139_v58 = vadd.f32 %v3138_v32, %v2977_v5  ;;  %v8329_v32 = vld [vmem:[#allocation118_spill] sm:$0xff] }
 0x665   : > { %v3847_v47 = vadd.f32 %v7582_v61, %v3846_v6  ;;  %v8330_v6 = vld [vmem:[#allocation106_spill] sm:$0xff] }
 0x666   : > { %v3472_v1 = vadd.f32 %v3412_v31, %v3139_v58  ;;  %v3569_v31 = vmax.f32 %v3521_v48, 0.0 }
 0x667   : > { %v3854_v51 = vrot.slane %v3847_v47, 1  ;;  %v3855_v59 = vrot.slane %v3847_v47, 2  ;;  %v3856_v36 = vrot.slane %v3847_v47, 3  ;;  %3882 = vst [vmem:[%s7585_s12] sm:$0x1] %v3847_v47  ;;  %v3857_v49 = vrot.slane %v3847_v47, 4 }
 0x668   : > { %v3858_v60 = vrot.slane %v3847_v47, 5  ;;  %v3859_v45 = vrot.slane %v3847_v47, 6  ;;  %v3860_v50 = vrot.slane %v3847_v47, 7  ;;  %v3524_v21 = vadd.f32 %v4230_v15, %v3472_v1  ;;  %v8331_v47 = vld [vmem:[#allocation113_spill] sm:$0xff] }
 0x669   : > { %3883 = vst [vmem:[%s7585_s12 + $0x1] sm:$0x1] %v3854_v51  ;;  %v3619_v25 = vmul.f32 %v3571_v53, %v8331_v47  ;;  %v2989_v51 = vpop.f32.mrf.mxu2 }
 0x66a   : > { %3884 = vst [vmem:[%s7585_s12 + $0x2] sm:$0x1] %v3855_v59  ;;  %v3572_v33 = vmax.f32 %v3524_v21, 0.0  ;;  %v8332_v59 = vld [vmem:[#allocation114_spill] sm:$0xff] }
 0x66b   : > { %3885 = vst [vmem:[%s7585_s12 + $0x3] sm:$0x1] %v3856_v36  ;;  %v3141_v16 = vpop.f32.mrf.mxu3 }
 0x66c   : > { %3886 = vst [vmem:[%s7585_s12 + $0x4] sm:$0x1] %v3857_v49  ;;  %v3142_v9 = vadd.f32 %v3141_v16, %v2980_v38  ;;  %v3618_v38 = vmul.f32 %v3570_v26, %v8328_v44  ;;  %v3620_v36 = vmul.f32 %v3572_v33, %v8332_v59  ;;  %v8333_v49 = vld [vmem:[#allocation121_spill] sm:$0xff] }
 0x66d   : > { %3887 = vst [vmem:[%s7585_s12 + $0x5] sm:$0x1] %v3858_v60 }
 0x66e   : > { %3888 = vst [vmem:[%s7585_s12 + $0x6] sm:$0x1] %v3859_v45  ;;  %v3473_v57 = vadd.f32 %v3415_v37, %v3142_v9  ;;  %v3617_v37 = vmul.f32 %v3569_v31, %v8330_v6  ;;  %v3765_v45 = vmul.f32 0.0625, %v3721_v17 }
 0x66f   : > { %3889 = vst [vmem:[%s7585_s12 + $0x7] sm:$0x1] %v3860_v50  ;;  %v3424_v50 = vpop.f32.mrf.mxu0 }
 0x670   : > { %v3525_v29 = vadd.f32 %v4230_v15, %v3473_v57  ;;  %v3730_v56 = vadd.f32 %v3618_v38, %v3617_v37  ;;  %v3822_v42 = vsel %vm3810_vm7, %v3765_v45, %v3821_v41  ;;  %v8335_v41 = vld [vmem:[#allocation124_spill] sm:$0xff] }
 0x671   : > { %v3823_v12 = vsel %vm3812_vm8, %v3766_v43, %v3822_v42  ;;  %v2992_v13 = vpop.f32.mrf.mxu2 }
 0x672   : > { %v3573_v5 = vmax.f32 %v3525_v29, 0.0  ;;  %v3731_v34 = vadd.f32 %v3730_v56, %v3619_v25 }
 0x673   : > { %v3144_v22 = vpop.f32.mrf.mxu3 }
 0x674   : > { %v3145_v54 = vadd.f32 %v3144_v22, %v2983_v18  ;;  %v3621_v63 = vmul.f32 %v3573_v5, %v8329_v32  ;;  %v3732_v52 = vrot.slane %v3731_v34, 4 }
 0x676   : > { %v3474_v55 = vadd.f32 %v3418_v62, %v3145_v54  ;;  %v3738_v16 = vadd.f32 %v3621_v63, %v3620_v36  ;;  %v3733_v57 = vadd.f32 %v3732_v52, %v3731_v34 }
 0x677   : > { %v3427_v30 = vpop.f32.mrf.mxu0 }
 0x678   : > { %v3526_v39 = vadd.f32 %v4230_v15, %v3474_v55  ;;  %v3734_v10 = vrot.slane %v3733_v57, 2 }
 0x67a   : > { %v3574_v4 = vmax.f32 %v3526_v39, 0.0  ;;  %v8336_v39 = vld [vmem:[#allocation15_spill] sm:$0xff] }
 0x67b   : > { %v3147_v23 = vpop.f32.mrf.mxu3 }
 0x67c   : > { %v3622_v60 = vmul.f32 %v3574_v4, %v8333_v49  ;;  %v3148_v27 = vadd.f32 %v3147_v23, %v2986_v24 }
 0x67e   : > { %v3739_v62 = vadd.f32 %v3738_v16, %v3622_v60  ;;  %v3475_v9 = vadd.f32 %v3421_v20, %v3148_v27  ;;  %v3735_v20 = vadd.f32 %v3734_v10, %v3733_v57 }
 0x680   : > { %v3740_v14 = vrot.slane %v3739_v62, 4  ;;  %v3527_v35 = vadd.f32 %v4230_v15, %v3475_v9  ;;  %v3736_v23 = vrot.slane %v3735_v20, 1 }
 0x682   : > { %v3741_v54 = vadd.f32 %v3740_v14, %v3739_v62  ;;  %v3575_v1 = vmax.f32 %v3527_v35, 0.0  ;;  %v3737_v33 = vadd.f32 %v3736_v23, %v3735_v20 }
 0x683   : > { %v3150_v18 = vpop.f32.mrf.mxu3 }
 0x684   : > { %v3151_v3 = vadd.f32 %v3150_v18, %v2989_v51  ;;  %v3742_v29 = vrot.slane %v3741_v54, 2  ;;  %v3623_v48 = vmul.f32 %v3575_v1, %v8335_v41  ;;  %v3767_v38 = vmul.f32 0.0625, %v3737_v33 }
 0x686   : > { %v3476_v46 = vadd.f32 %v3424_v50, %v3151_v3  ;;  %v3743_v7 = vadd.f32 %v3742_v29, %v3741_v54  ;;  %v3824_v6 = vsel %vm3814_vm9, %v3767_v38, %v3823_v12 }
 0x688   : > { %v3528_v58 = vadd.f32 %v4230_v15, %v3476_v46  ;;  %v3744_v31 = vrot.slane %v3743_v7, 1 }
 0x68a   : > { %v3576_v22 = vmax.f32 %v3528_v58, 0.0  ;;  %v3745_v17 = vadd.f32 %v3744_v31, %v3743_v7 }
 0x68b   : > { %v3153_v8 = vpop.f32.mrf.mxu3 }
 0x68c   : > { %v3154_v11 = vadd.f32 %v3153_v8, %v2992_v13  ;;  %v3624_v55 = vmul.f32 %v3576_v22, %v8334_v0  ;;  %v3768_v2 = vmul.f32 0.0625, %v3745_v17 }
 0x68e   : > { %v3477_v40 = vadd.f32 %v3427_v30, %v3154_v11  ;;  %v3746_v21 = vadd.f32 %v3624_v55, %v3623_v48  ;;  %v3825_v37 = vsel %vm3816_vm10, %v3768_v2, %v3824_v6 }
 0x690   : > { %v3529_v24 = vadd.f32 %v4230_v15, %v3477_v40 }
 0x692   : > { %v3577_v19 = vmax.f32 %v3529_v24, 0.0 }
 0x694   : > { %v3625_v28 = vmul.f32 %v3577_v19, %v8336_v39 }
 0x696   : > { %v3747_v26 = vadd.f32 %v3746_v21, %v3625_v28 }
 0x698   : > { %v3748_v5 = vrot.slane %v3747_v26, 4 }
 0x69a   : > { %v3749_v53 = vadd.f32 %v3748_v5, %v3747_v26 }
 0x69c   : > { %v3750_v4 = vrot.slane %v3749_v53, 2 }
 0x69e   : > { %v3751_v44 = vadd.f32 %v3750_v4, %v3749_v53 }
 0x6a0   : > { %v3752_v15 = vrot.slane %v3751_v44, 1 }
 0x6a2   : > { %v3753_v32 = vadd.f32 %v3752_v15, %v3751_v44 }
 0x6a4   : > { %v3769_v63 = vmul.f32 0.0625, %v3753_v32 }
 0x6a6   : > { %v3826_v47 = vsel %vm3818_vm11, %v3769_v63, %v3825_v37 }
 0x6a7   : > { %3848 = vmatmul.f32.gmra.mxu1 %v3826_v47 }
 0x724   : > { %v3849_v25 = vpop.f32.mrf.mxu1 }
 0x725   : > { %v3850_v51 = vadd.f32 %v7582_v61, %v3849_v25 }
 0x727   : > { %v3861_v59 = vrot.slane %v3850_v51, 1  ;;  %v3862_v36 = vrot.slane %v3850_v51, 2  ;;  %v3863_v49 = vrot.slane %v3850_v51, 3  ;;  %3890 = vst [vmem:[%s7585_s12 + $0x8] sm:$0x1] %v3850_v51  ;;  %v3864_v60 = vrot.slane %v3850_v51, 4 }
 0x728   : > { %v3865_v56 = vrot.slane %v3850_v51, 5  ;;  %v3866_v27 = vrot.slane %v3850_v51, 6  ;;  %v3867_v61 = vrot.slane %v3850_v51, 7 }
 0x729   : > { %3891 = vst [vmem:[%s7585_s12 + $0x9] sm:$0x1] %v3861_v59 }
 0x72a   : > { %3892 = vst [vmem:[%s7585_s12 + $0xa] sm:$0x1] %v3862_v36 }
 0x72b   : > { %3893 = vst [vmem:[%s7585_s12 + $0xb] sm:$0x1] %v3863_v49 }
 0x72c   : > { %3894 = vst [vmem:[%s7585_s12 + $0xc] sm:$0x1] %v3864_v60 }
 0x72d   : > { %3895 = vst [vmem:[%s7585_s12 + $0xd] sm:$0x1] %v3865_v56 }
 0x72e   : > { %3896 = vst [vmem:[%s7585_s12 + $0xe] sm:$0x1] %v3866_v27 }
 0x72f   : > { %3897 = vst [vmem:[%s7585_s12 + $0xf] sm:$0x1] %v3867_v61 }
 0x730   : > { %4318 = shalt.err (!%p4315_p8)
}
 0x731   : > { %s4366_s18 = smov 16   ;;  %s4367_s12 = smov 1  }
 0x732   : > { %4166 = dma.vmem_to_hbm [thread:$0]  (%p4461_p5), %s3911_s29, 256, %s3913_s17, %s3899_s30, %s4366_s18, %s4366_s18, %s4367_s12  }
 0x733 PF: > { %p4183_p9 = scmp.ge.s32.totalorder %s4361_s16, 2  ;;  %s3927_s21 = sand.u32 1, %s4349_s13  }
 0x734   : > { %s3928_s26 = scalar_lea.sflag [#allocation4], %s3927_s21 }
 0x735   : > { %p4176_p10 = pnand %p4183_p9, %p4465_p6 }
 0x737   : > { %p4177_p11 = pneg %p4176_p10 }
 0x739   : > { %4344 = dma.done.wait (%p4177_p11), %s3928_s26, 256  }
 0x73a   : > { %4346 = vsyncadd (%p4177_p11), %s3928_s26, 4294967040  ;;  %p22_p12 = scmp.ge.s32.totalorder %s4448_s19, 4   ;;  %s8337_s13 = smov %s4353_s14 }
 0x73b   : > { %s8338_s14 = smov %s4357_s15  ;;  %s8339_s15 = smov %s4459_s22 }
 0x73c   : > { %s8340_s16 = smov %s4448_s19  ;;  %24 = sbr.rel (!%p22_p12) target bundleno = 5 (0x5), region = 110 }
 0x741   :  { %3934 = vsyncpa [#allocation3], 1 }
 0x742   :  { %3936 = vsyncpa [#allocation3 + $0x1], 1 }
 0x743   :  { %3937 = vsyncpa [#allocation6], 1 }
 0x744   :  { %3938 = vsyncpa [#allocation4], 1 }
 0x745   :  { %3940 = vsyncpa [#allocation4 + $0x1], 1 }

</bundles_post_ra>
